<compile_context>
chip_gen: v5e
topology: v5e:2x2
jax: 0.10.0
libtpu: 0.0.40
codegen_flags: <defaults>
</compile_context>

<pallas_src>
import numpy as np
import jax
import jax.numpy as jnp
from jax.experimental import pallas as pl
from jax.experimental.pallas import tpu as pltpu


# ---------------------------------------------------------------------------
# host-side (numpy) constants: windows, interleaved IDFT bases, 1/envelope
# ---------------------------------------------------------------------------
def _hann_periodic(n):
    k = np.arange(n, dtype=np.float64)
    return 0.5 - 0.5 * np.cos(2.0 * np.pi * k / n)


def _hamming_periodic(n):
    k = np.arange(n, dtype=np.float64)
    return 0.54 - 0.46 * np.cos(2.0 * np.pi * k / n)


def _pad_window(win, n_fft):
    win = np.asarray(win, dtype=np.float64)
    wl = win.shape[0]
    if wl == n_fft:
        return win
    left = (n_fft - wl) // 2
    out = np.zeros(n_fft, dtype=np.float64)
    out[left:left + wl] = win
    return out


def _envelope(win_pad, hop, n_frames):
    n_fft = win_pad.shape[0]
    L = n_fft + hop * (n_frames - 1)
    env = np.zeros(L, dtype=np.float64)
    w2 = win_pad ** 2
    for f in range(n_frames):
        env[f * hop:f * hop + n_fft] += w2
    return env


def _onesided_basis(n_fft, win, normalized):
    """Rows interleave (re_k, im_k); cols = time samples. Window folded in."""
    K = n_fft // 2 + 1
    wpad = _pad_window(win, n_fft)
    k = np.arange(K, dtype=np.float64)[:, None]
    t = np.arange(n_fft, dtype=np.float64)[None, :]
    ang = 2.0 * np.pi * k * t / n_fft
    wgt = np.full((K, 1), 2.0)
    wgt[0, 0] = 1.0
    wgt[-1, 0] = 1.0
    scale = 1.0 / np.sqrt(n_fft) if normalized else 1.0 / n_fft
    bre = scale * wgt * np.cos(ang) * wpad[None, :]
    bim = -scale * wgt * np.sin(ang) * wpad[None, :]
    basis = np.empty((2 * K, n_fft), dtype=np.float64)
    basis[0::2] = bre
    basis[1::2] = bim
    return basis.astype(np.float32)


def _full_complex_basis(n_fft):
    """onesided=False, return_complex=True, rect window.
    Rows interleave (re_k, im_k); cols [0:n) = real out, [n:2n) = imag out."""
    k = np.arange(n_fft, dtype=np.float64)[:, None]
    t = np.arange(n_fft, dtype=np.float64)[None, :]
    ang = 2.0 * np.pi * k * t / n_fft
    c = np.cos(ang) / n_fft
    s = np.sin(ang) / n_fft
    basis = np.empty((2 * n_fft, 2 * n_fft), dtype=np.float64)
    basis[0::2, :n_fft] = c
    basis[1::2, :n_fft] = -s
    basis[0::2, n_fft:] = s
    basis[1::2, n_fft:] = c
    return basis.astype(np.float32)


def _make_config(B, F, n_fft, hop, win, center, normalized, full_complex):
    wpad = _pad_window(win, n_fft)
    L = n_fft + hop * (F - 1)
    start = n_fft // 2 if center else 0
    Lk = L - n_fft if center else L
    inv_env = (1.0 / _envelope(wpad, hop, F)[start:start + Lk]).astype(np.float32)
    if full_complex:
        basis, planes = _full_complex_basis(n_fft), 2
    else:
        basis, planes = _onesided_basis(n_fft, win, normalized), 1
    return dict(B=B, F=F, n_fft=n_fft, hop=hop, L=L, start=start, Lk=Lk,
                planes=planes, basis=basis, inv_env=inv_env[None, :])


# the 4 istft configurations of the reference Model (static, host-built)
_CFGS = (
    _make_config(B=2, F=9, n_fft=64, hop=16, win=_hann_periodic(44),
                 center=True, normalized=True, full_complex=False),
    _make_config(B=1, F=7, n_fft=128, hop=32, win=np.ones(128),
                 center=False, normalized=False, full_complex=False),
    _make_config(B=1, F=8, n_fft=512, hop=128, win=_hamming_periodic(256),
                 center=True, normalized=False, full_complex=False),
    _make_config(B=1, F=6, n_fft=512, hop=128, win=np.ones(512),
                 center=False, normalized=False, full_complex=True),
)


# ---------------------------------------------------------------------------
# fused Pallas kernel: 4x (IDFT matmul + value-space overlap-add + 1/env mul)
# ---------------------------------------------------------------------------
def _fused_istft_kernel(*refs):
    n_cfg = len(_CFGS)
    in_refs = refs[:3 * n_cfg]
    out_refs = refs[3 * n_cfg:]

    for i, c in enumerate(_CFGS):
        s_ref, b_ref, e_ref = in_refs[3 * i], in_refs[3 * i + 1], in_refs[3 * i + 2]
        o_ref = out_refs[i]
        B, F, n_fft, hop = c["B"], c["F"], c["n_fft"], c["hop"]
        L, start, Lk, planes = c["L"], c["start"], c["Lk"], c["planes"]

        # one MXU matmul per config: (B*F, 2K) @ (2K, planes*n_fft)
        frames = jnp.dot(s_ref[...], b_ref[...],
                         preferred_element_type=jnp.float32)

        rows = []
        for p in range(planes):                 # real / imag output planes
            col0 = p * n_fft
            for b in range(B):                  # batch folded into matmul rows
                acc = None
                for f in range(F):              # value-space overlap-add
                    frm = frames[b * F + f:b * F + f + 1, col0:col0 + n_fft]
                    off = f * hop
                    tail = L - off - n_fft
                    parts = []
                    if off > 0:
                        parts.append(jnp.zeros((1, off), jnp.float32))
                    parts.append(frm)
                    if tail > 0:
                        parts.append(jnp.zeros((1, tail), jnp.float32))
                    placed = (jnp.concatenate(parts, axis=1)
                              if len(parts) > 1 else parts[0])
                    acc = placed if acc is None else acc + placed
                rows.append(acc[:, start:start + Lk])
        ola = rows[0] if len(rows) == 1 else jnp.concatenate(rows, axis=0)
        o_ref[...] = ola * e_ref[...]           # one dense store per output


def _fused_istft(specs):
    in_arrays = []
    for s, c in zip(specs, _CFGS):
        in_arrays += [s, jnp.asarray(c["basis"]), jnp.asarray(c["inv_env"])]
    out_shape = tuple(
        jax.ShapeDtypeStruct((c["B"] * c["planes"], c["Lk"]), jnp.float32)
        for c in _CFGS)
    in_specs = [pl.BlockSpec(a.shape, lambda i: (0, 0)) for a in in_arrays]
    out_specs = [pl.BlockSpec(s.shape, lambda i: (0, 0)) for s in out_shape]
    return pl.pallas_call(
        _fused_istft_kernel,
        out_shape=out_shape,
        grid_spec=pltpu.PrefetchScalarGridSpec(
            num_scalar_prefetch=0,
            grid=(1,),
            in_specs=in_specs,
            out_specs=out_specs,
        ),
        compiler_params=pltpu.CompilerParams(
            dimension_semantics=("arbitrary",),
            vmem_limit_bytes=32 * 1024 * 1024,
        ),
    )(*in_arrays)


# ---------------------------------------------------------------------------
# model forward
# ---------------------------------------------------------------------------
def _prep(x):
    # (B?, K, F, 2) -> (B*F, 2K): frame rows, (re, im)-interleaved freq columns
    if x.ndim == 3:
        x = x[None]
    B, K, F, _ = x.shape
    return jnp.transpose(x, (0, 2, 1, 3)).reshape(B * F, 2 * K).astype(jnp.float32)


def model_forward(x, y, z, w):
    o0, o1, o2, o3 = _fused_istft([_prep(x), _prep(y), _prep(z), _prep(w)])
    out0 = o0                       # (2, 128)
    out1 = o1                       # (1, 320)
    out2 = o2[0]                    # (896,)       (unbatched input)
    out3 = jnp.transpose(o3)        # (1152, 2)    == view_as_real(istft(...))
    return out0, out1, out2, out3


# ---------------------------------------------------------------------------
# numpy reference (float64) for a sanity check
# ---------------------------------------------------------------------------
def _np_istft(spec_ri, n_fft, hop, win, center, normalized, onesided,
              return_complex):
    spec = spec_ri[..., 0].astype(np.float64) + 1j * spec_ri[..., 1].astype(np.float64)
    squeeze = spec.ndim == 2
    if squeeze:
        spec = spec[None]
    B, K, F = spec.shape
    wpad = _pad_window(win, n_fft)
    norm = "ortho" if normalized else "backward"
    spec_t = np.transpose(spec, (0, 2, 1))
    if return_complex:
        frames = np.fft.ifft(spec_t, n=n_fft, axis=-1, norm=norm)
    else:
        if not onesided:
            spec_t = spec_t[..., :n_fft // 2 + 1]
        frames = np.fft.irfft(spec_t, n=n_fft, axis=-1, norm=norm)
    frames = frames * wpad
    L = n_fft + hop * (F - 1)
    ysig = np.zeros((B, L), dtype=frames.dtype)
    for f in range(F):
        ysig[:, f * hop:f * hop + n_fft] += frames[:, f]
    env = _envelope(wpad, hop, F)
    start = n_fft // 2 if center else 0
    end = (L - n_fft // 2) if center else L
    ysig = ysig[:, start:end] / env[start:end]
    return ysig[0] if squeeze else ysig


if __name__ == "__main__":
    key = jax.random.PRNGKey(0)
    kx, ky, kz, kw = jax.random.split(key, 4)
    # shapes consistent with the module (onesided bins = n_fft//2+1, etc.)
    x = jax.random.uniform(kx, (2, 33, 9, 2), dtype=jnp.float32)    # n_fft=64
    y = jax.random.uniform(ky, (1, 65, 7, 2), dtype=jnp.float32)    # n_fft=128
    z = jax.random.uniform(kz, (257, 8, 2), dtype=jnp.float32)      # n_fft=512
    w = jax.random.uniform(kw, (512, 6, 2), dtype=jnp.float32)      # n_fft=512, full

    fwd = jax.jit(model_forward)
    outs = jax.block_until_ready(fwd(x, y, z, w))

    # sanity check vs float64 numpy istft; tolerances sized for DEFAULT
    # (single-pass bf16) MXU precision used per the performance review.
    xr, yr, zr, wr = (np.asarray(a) for a in (x, y, z, w))
    ref0 = _np_istft(xr, 64, 16, _hann_periodic(44), True, True, True, False)
    ref1 = _np_istft(yr, 128, 32, np.ones(128), False, False, True, False)
    ref2 = _np_istft(zr, 512, 128, _hamming_periodic(256), True, False, True, False)
    ref3c = _np_istft(wr, 512, 128, np.ones(512), False, False, False, True)
    ref3 = np.stack([ref3c.real, ref3c.imag], axis=-1)

    np.testing.assert_allclose(np.asarray(outs[0]), ref0, rtol=2e-2, atol=1e-2)
    np.testing.assert_allclose(np.asarray(outs[1]), ref1, rtol=2e-2, atol=1e-2)
    np.testing.assert_allclose(np.asarray(outs[2]), ref2, rtol=2e-2, atol=1e-2)
    np.testing.assert_allclose(np.asarray(outs[3]), ref3, rtol=2e-2, atol=1e-2)

    assert outs[0].shape == (2, 128)
    assert outs[1].shape == (1, 320)
    assert outs[2].shape == (896,)
    assert outs[3].shape == (1152, 2)

    print("KERNEL_OK")
</pallas_src>

<mosaic_0001>
module attributes {stable_mosaic.version = 11 : i64} {
  func.func @_fused_istft_kernel(%arg0: i32, %arg1: memref<18x66xf32, #tpu.memory_space<vmem>>, %arg2: memref<66x64xf32, #tpu.memory_space<vmem>>, %arg3: memref<1x128xf32, #tpu.memory_space<vmem>>, %arg4: memref<7x130xf32, #tpu.memory_space<vmem>>, %arg5: memref<130x128xf32, #tpu.memory_space<vmem>>, %arg6: memref<1x320xf32, #tpu.memory_space<vmem>>, %arg7: memref<8x514xf32, #tpu.memory_space<vmem>>, %arg8: memref<514x512xf32, #tpu.memory_space<vmem>>, %arg9: memref<1x896xf32, #tpu.memory_space<vmem>>, %arg10: memref<6x1024xf32, #tpu.memory_space<vmem>>, %arg11: memref<1024x1024xf32, #tpu.memory_space<vmem>>, %arg12: memref<1x1152xf32, #tpu.memory_space<vmem>>, %arg13: memref<2x128xf32, #tpu.memory_space<vmem>>, %arg14: memref<1x320xf32, #tpu.memory_space<vmem>>, %arg15: memref<1x896xf32, #tpu.memory_space<vmem>>, %arg16: memref<2x1152xf32, #tpu.memory_space<vmem>>) attributes {dimension_semantics = [#tpu.dimension_semantics<arbitrary>], iteration_bounds = array<i64: 1>, scalar_prefetch = 0 : i64, scratch_operands = 0 : i64, tpu.core_type = #tpu.core_type<tc>, window_params = [{pipeline_mode = #tpu.pipeline_mode<synchronous>, transform_indices = @transform_0, window_bounds = array<i64: 18, 66>}, {pipeline_mode = #tpu.pipeline_mode<synchronous>, transform_indices = @transform_1, window_bounds = array<i64: 66, 64>}, {pipeline_mode = #tpu.pipeline_mode<synchronous>, transform_indices = @transform_2, window_bounds = array<i64: 1, 128>}, {pipeline_mode = #tpu.pipeline_mode<synchronous>, transform_indices = @transform_3, window_bounds = array<i64: 7, 130>}, {pipeline_mode = #tpu.pipeline_mode<synchronous>, transform_indices = @transform_4, window_bounds = array<i64: 130, 128>}, {pipeline_mode = #tpu.pipeline_mode<synchronous>, transform_indices = @transform_5, window_bounds = array<i64: 1, 320>}, {pipeline_mode = #tpu.pipeline_mode<synchronous>, transform_indices = @transform_6, window_bounds = array<i64: 8, 514>}, {pipeline_mode = #tpu.pipeline_mode<synchronous>, transform_indices = @transform_7, window_bounds = array<i64: 514, 512>}, {pipeline_mode = #tpu.pipeline_mode<synchronous>, transform_indices = @transform_8, window_bounds = array<i64: 1, 896>}, {pipeline_mode = #tpu.pipeline_mode<synchronous>, transform_indices = @transform_9, window_bounds = array<i64: 6, 1024>}, {pipeline_mode = #tpu.pipeline_mode<synchronous>, transform_indices = @transform_10, window_bounds = array<i64: 1024, 1024>}, {pipeline_mode = #tpu.pipeline_mode<synchronous>, transform_indices = @transform_11, window_bounds = array<i64: 1, 1152>}, {pipeline_mode = #tpu.pipeline_mode<synchronous>, transform_indices = @transform_12, window_bounds = array<i64: 2, 128>}, {pipeline_mode = #tpu.pipeline_mode<synchronous>, transform_indices = @transform_13, window_bounds = array<i64: 1, 320>}, {pipeline_mode = #tpu.pipeline_mode<synchronous>, transform_indices = @transform_14, window_bounds = array<i64: 1, 896>}, {pipeline_mode = #tpu.pipeline_mode<synchronous>, transform_indices = @transform_15, window_bounds = array<i64: 2, 1152>}]} {
    %c0 = arith.constant 0 : index
    %c0_0 = arith.constant 0 : index
    %0 = vector.load %arg1[%c0, %c0_0] : memref<18x66xf32, #tpu.memory_space<vmem>>, vector<18x66xf32>
    %c0_1 = arith.constant 0 : index
    %c0_2 = arith.constant 0 : index
    %1 = vector.load %arg2[%c0_1, %c0_2] : memref<66x64xf32, #tpu.memory_space<vmem>>, vector<66x64xf32>
    %cst = arith.constant dense<0.000000e+00> : vector<18x64xf32>
    %2 = tpu.matmul %0, %1, %cst {dimension_numbers = #tpu.dot_dimension_numbers<[1], [0], [0], [1], [0, 0, 1, 1], [], []>} : vector<18x66xf32>, vector<66x64xf32>, vector<18x64xf32> -> vector<18x64xf32>
    %3 = vector.extract_strided_slice %2 {offsets = [0, 0], sizes = [1, 64], strides = [1, 1]} : vector<18x64xf32> to vector<1x64xf32>
    %cst_3 = arith.constant 0.000000e+00 : f32
    %4 = vector.broadcast %cst_3 : f32 to vector<1x128xf32>
    %5 = tpu.concatenate %3, %4 in 1 : vector<1x64xf32>, vector<1x128xf32> -> vector<1x192xf32>
    %6 = vector.extract_strided_slice %2 {offsets = [1, 0], sizes = [1, 64], strides = [1, 1]} : vector<18x64xf32> to vector<1x64xf32>
    %cst_4 = arith.constant 0.000000e+00 : f32
    %7 = vector.broadcast %cst_4 : f32 to vector<1x16xf32>
    %cst_5 = arith.constant 0.000000e+00 : f32
    %8 = vector.broadcast %cst_5 : f32 to vector<1x112xf32>
    %9 = tpu.concatenate %7, %6, %8 in 1 : vector<1x16xf32>, vector<1x64xf32>, vector<1x112xf32> -> vector<1x192xf32>
    %10 = arith.addf %5, %9 : vector<1x192xf32>
    %11 = vector.extract_strided_slice %2 {offsets = [2, 0], sizes = [1, 64], strides = [1, 1]} : vector<18x64xf32> to vector<1x64xf32>
    %cst_6 = arith.constant 0.000000e+00 : f32
    %12 = vector.broadcast %cst_6 : f32 to vector<1x32xf32>
    %cst_7 = arith.constant 0.000000e+00 : f32
    %13 = vector.broadcast %cst_7 : f32 to vector<1x96xf32>
    %14 = tpu.concatenate %12, %11, %13 in 1 : vector<1x32xf32>, vector<1x64xf32>, vector<1x96xf32> -> vector<1x192xf32>
    %15 = arith.addf %10, %14 : vector<1x192xf32>
    %16 = vector.extract_strided_slice %2 {offsets = [3, 0], sizes = [1, 64], strides = [1, 1]} : vector<18x64xf32> to vector<1x64xf32>
    %cst_8 = arith.constant 0.000000e+00 : f32
    %17 = vector.broadcast %cst_8 : f32 to vector<1x48xf32>
    %cst_9 = arith.constant 0.000000e+00 : f32
    %18 = vector.broadcast %cst_9 : f32 to vector<1x80xf32>
    %19 = tpu.concatenate %17, %16, %18 in 1 : vector<1x48xf32>, vector<1x64xf32>, vector<1x80xf32> -> vector<1x192xf32>
    %20 = arith.addf %15, %19 : vector<1x192xf32>
    %21 = vector.extract_strided_slice %2 {offsets = [4, 0], sizes = [1, 64], strides = [1, 1]} : vector<18x64xf32> to vector<1x64xf32>
    %cst_10 = arith.constant 0.000000e+00 : f32
    %22 = vector.broadcast %cst_10 : f32 to vector<1x64xf32>
    %cst_11 = arith.constant 0.000000e+00 : f32
    %23 = vector.broadcast %cst_11 : f32 to vector<1x64xf32>
    %24 = tpu.concatenate %22, %21, %23 in 1 : vector<1x64xf32>, vector<1x64xf32>, vector<1x64xf32> -> vector<1x192xf32>
    %25 = arith.addf %20, %24 : vector<1x192xf32>
    %26 = vector.extract_strided_slice %2 {offsets = [5, 0], sizes = [1, 64], strides = [1, 1]} : vector<18x64xf32> to vector<1x64xf32>
    %cst_12 = arith.constant 0.000000e+00 : f32
    %27 = vector.broadcast %cst_12 : f32 to vector<1x80xf32>
    %cst_13 = arith.constant 0.000000e+00 : f32
    %28 = vector.broadcast %cst_13 : f32 to vector<1x48xf32>
    %29 = tpu.concatenate %27, %26, %28 in 1 : vector<1x80xf32>, vector<1x64xf32>, vector<1x48xf32> -> vector<1x192xf32>
    %30 = arith.addf %25, %29 : vector<1x192xf32>
    %31 = vector.extract_strided_slice %2 {offsets = [6, 0], sizes = [1, 64], strides = [1, 1]} : vector<18x64xf32> to vector<1x64xf32>
    %cst_14 = arith.constant 0.000000e+00 : f32
    %32 = vector.broadcast %cst_14 : f32 to vector<1x96xf32>
    %cst_15 = arith.constant 0.000000e+00 : f32
    %33 = vector.broadcast %cst_15 : f32 to vector<1x32xf32>
    %34 = tpu.concatenate %32, %31, %33 in 1 : vector<1x96xf32>, vector<1x64xf32>, vector<1x32xf32> -> vector<1x192xf32>
    %35 = arith.addf %30, %34 : vector<1x192xf32>
    %36 = vector.extract_strided_slice %2 {offsets = [7, 0], sizes = [1, 64], strides = [1, 1]} : vector<18x64xf32> to vector<1x64xf32>
    %cst_16 = arith.constant 0.000000e+00 : f32
    %37 = vector.broadcast %cst_16 : f32 to vector<1x112xf32>
    %cst_17 = arith.constant 0.000000e+00 : f32
    %38 = vector.broadcast %cst_17 : f32 to vector<1x16xf32>
    %39 = tpu.concatenate %37, %36, %38 in 1 : vector<1x112xf32>, vector<1x64xf32>, vector<1x16xf32> -> vector<1x192xf32>
    %40 = arith.addf %35, %39 : vector<1x192xf32>
    %41 = vector.extract_strided_slice %2 {offsets = [8, 0], sizes = [1, 64], strides = [1, 1]} : vector<18x64xf32> to vector<1x64xf32>
    %cst_18 = arith.constant 0.000000e+00 : f32
    %42 = vector.broadcast %cst_18 : f32 to vector<1x128xf32>
    %43 = tpu.concatenate %42, %41 in 1 : vector<1x128xf32>, vector<1x64xf32> -> vector<1x192xf32>
    %44 = arith.addf %40, %43 : vector<1x192xf32>
    %45 = vector.extract_strided_slice %44 {offsets = [0, 32], sizes = [1, 128], strides = [1, 1]} : vector<1x192xf32> to vector<1x128xf32>
    %46 = vector.extract_strided_slice %2 {offsets = [9, 0], sizes = [1, 64], strides = [1, 1]} : vector<18x64xf32> to vector<1x64xf32>
    %cst_19 = arith.constant 0.000000e+00 : f32
    %47 = vector.broadcast %cst_19 : f32 to vector<1x128xf32>
    %48 = tpu.concatenate %46, %47 in 1 : vector<1x64xf32>, vector<1x128xf32> -> vector<1x192xf32>
    %49 = vector.extract_strided_slice %2 {offsets = [10, 0], sizes = [1, 64], strides = [1, 1]} : vector<18x64xf32> to vector<1x64xf32>
    %cst_20 = arith.constant 0.000000e+00 : f32
    %50 = vector.broadcast %cst_20 : f32 to vector<1x16xf32>
    %cst_21 = arith.constant 0.000000e+00 : f32
    %51 = vector.broadcast %cst_21 : f32 to vector<1x112xf32>
    %52 = tpu.concatenate %50, %49, %51 in 1 : vector<1x16xf32>, vector<1x64xf32>, vector<1x112xf32> -> vector<1x192xf32>
    %53 = arith.addf %48, %52 : vector<1x192xf32>
    %54 = vector.extract_strided_slice %2 {offsets = [11, 0], sizes = [1, 64], strides = [1, 1]} : vector<18x64xf32> to vector<1x64xf32>
    %cst_22 = arith.constant 0.000000e+00 : f32
    %55 = vector.broadcast %cst_22 : f32 to vector<1x32xf32>
    %cst_23 = arith.constant 0.000000e+00 : f32
    %56 = vector.broadcast %cst_23 : f32 to vector<1x96xf32>
    %57 = tpu.concatenate %55, %54, %56 in 1 : vector<1x32xf32>, vector<1x64xf32>, vector<1x96xf32> -> vector<1x192xf32>
    %58 = arith.addf %53, %57 : vector<1x192xf32>
    %59 = vector.extract_strided_slice %2 {offsets = [12, 0], sizes = [1, 64], strides = [1, 1]} : vector<18x64xf32> to vector<1x64xf32>
    %cst_24 = arith.constant 0.000000e+00 : f32
    %60 = vector.broadcast %cst_24 : f32 to vector<1x48xf32>
    %cst_25 = arith.constant 0.000000e+00 : f32
    %61 = vector.broadcast %cst_25 : f32 to vector<1x80xf32>
    %62 = tpu.concatenate %60, %59, %61 in 1 : vector<1x48xf32>, vector<1x64xf32>, vector<1x80xf32> -> vector<1x192xf32>
    %63 = arith.addf %58, %62 : vector<1x192xf32>
    %64 = vector.extract_strided_slice %2 {offsets = [13, 0], sizes = [1, 64], strides = [1, 1]} : vector<18x64xf32> to vector<1x64xf32>
    %cst_26 = arith.constant 0.000000e+00 : f32
    %65 = vector.broadcast %cst_26 : f32 to vector<1x64xf32>
    %cst_27 = arith.constant 0.000000e+00 : f32
    %66 = vector.broadcast %cst_27 : f32 to vector<1x64xf32>
    %67 = tpu.concatenate %65, %64, %66 in 1 : vector<1x64xf32>, vector<1x64xf32>, vector<1x64xf32> -> vector<1x192xf32>
    %68 = arith.addf %63, %67 : vector<1x192xf32>
    %69 = vector.extract_strided_slice %2 {offsets = [14, 0], sizes = [1, 64], strides = [1, 1]} : vector<18x64xf32> to vector<1x64xf32>
    %cst_28 = arith.constant 0.000000e+00 : f32
    %70 = vector.broadcast %cst_28 : f32 to vector<1x80xf32>
    %cst_29 = arith.constant 0.000000e+00 : f32
    %71 = vector.broadcast %cst_29 : f32 to vector<1x48xf32>
    %72 = tpu.concatenate %70, %69, %71 in 1 : vector<1x80xf32>, vector<1x64xf32>, vector<1x48xf32> -> vector<1x192xf32>
    %73 = arith.addf %68, %72 : vector<1x192xf32>
    %74 = vector.extract_strided_slice %2 {offsets = [15, 0], sizes = [1, 64], strides = [1, 1]} : vector<18x64xf32> to vector<1x64xf32>
    %cst_30 = arith.constant 0.000000e+00 : f32
    %75 = vector.broadcast %cst_30 : f32 to vector<1x96xf32>
    %cst_31 = arith.constant 0.000000e+00 : f32
    %76 = vector.broadcast %cst_31 : f32 to vector<1x32xf32>
    %77 = tpu.concatenate %75, %74, %76 in 1 : vector<1x96xf32>, vector<1x64xf32>, vector<1x32xf32> -> vector<1x192xf32>
    %78 = arith.addf %73, %77 : vector<1x192xf32>
    %79 = vector.extract_strided_slice %2 {offsets = [16, 0], sizes = [1, 64], strides = [1, 1]} : vector<18x64xf32> to vector<1x64xf32>
    %cst_32 = arith.constant 0.000000e+00 : f32
    %80 = vector.broadcast %cst_32 : f32 to vector<1x112xf32>
    %cst_33 = arith.constant 0.000000e+00 : f32
    %81 = vector.broadcast %cst_33 : f32 to vector<1x16xf32>
    %82 = tpu.concatenate %80, %79, %81 in 1 : vector<1x112xf32>, vector<1x64xf32>, vector<1x16xf32> -> vector<1x192xf32>
    %83 = arith.addf %78, %82 : vector<1x192xf32>
    %84 = vector.extract_strided_slice %2 {offsets = [17, 0], sizes = [1, 64], strides = [1, 1]} : vector<18x64xf32> to vector<1x64xf32>
    %cst_34 = arith.constant 0.000000e+00 : f32
    %85 = vector.broadcast %cst_34 : f32 to vector<1x128xf32>
    %86 = tpu.concatenate %85, %84 in 1 : vector<1x128xf32>, vector<1x64xf32> -> vector<1x192xf32>
    %87 = arith.addf %83, %86 : vector<1x192xf32>
    %88 = vector.extract_strided_slice %87 {offsets = [0, 32], sizes = [1, 128], strides = [1, 1]} : vector<1x192xf32> to vector<1x128xf32>
    %89 = tpu.concatenate %45, %88 in 0 : vector<1x128xf32>, vector<1x128xf32> -> vector<2x128xf32>
    %c0_35 = arith.constant 0 : index
    %c0_36 = arith.constant 0 : index
    %90 = vector.load %arg3[%c0_35, %c0_36] : memref<1x128xf32, #tpu.memory_space<vmem>>, vector<1x128xf32>
    %91 = vector.broadcast %90 : vector<1x128xf32> to vector<2x128xf32>
    %92 = arith.mulf %89, %91 : vector<2x128xf32>
    %c0_37 = arith.constant 0 : index
    %c0_38 = arith.constant 0 : index
    %93 = vector.load %arg13[%c0_37, %c0_38] : memref<2x128xf32, #tpu.memory_space<vmem>>, vector<2x128xf32>
    tpu.vector_store %arg13[%c0_37, %c0_38], %92 {strides = array<i32>} : memref<2x128xf32, #tpu.memory_space<vmem>>, vector<2x128xf32>,
    %c0_39 = arith.constant 0 : index
    %c0_40 = arith.constant 0 : index
    %94 = vector.load %arg4[%c0_39, %c0_40] : memref<7x130xf32, #tpu.memory_space<vmem>>, vector<7x130xf32>
    %c0_41 = arith.constant 0 : index
    %c0_42 = arith.constant 0 : index
    %95 = vector.load %arg5[%c0_41, %c0_42] : memref<130x128xf32, #tpu.memory_space<vmem>>, vector<130x128xf32>
    %cst_43 = arith.constant dense<0.000000e+00> : vector<7x128xf32>
    %96 = tpu.matmul %94, %95, %cst_43 {dimension_numbers = #tpu.dot_dimension_numbers<[1], [0], [0], [1], [0, 0, 1, 1], [], []>} : vector<7x130xf32>, vector<130x128xf32>, vector<7x128xf32> -> vector<7x128xf32>
    %97 = vector.extract_strided_slice %96 {offsets = [0, 0], sizes = [1, 128], strides = [1, 1]} : vector<7x128xf32> to vector<1x128xf32>
    %cst_44 = arith.constant 0.000000e+00 : f32
    %98 = vector.broadcast %cst_44 : f32 to vector<1x192xf32>
    %99 = tpu.concatenate %97, %98 in 1 : vector<1x128xf32>, vector<1x192xf32> -> vector<1x320xf32>
    %100 = vector.extract_strided_slice %96 {offsets = [1, 0], sizes = [1, 128], strides = [1, 1]} : vector<7x128xf32> to vector<1x128xf32>
    %cst_45 = arith.constant 0.000000e+00 : f32
    %101 = vector.broadcast %cst_45 : f32 to vector<1x32xf32>
    %cst_46 = arith.constant 0.000000e+00 : f32
    %102 = vector.broadcast %cst_46 : f32 to vector<1x160xf32>
    %103 = tpu.concatenate %101, %100, %102 in 1 : vector<1x32xf32>, vector<1x128xf32>, vector<1x160xf32> -> vector<1x320xf32>
    %104 = arith.addf %99, %103 : vector<1x320xf32>
    %105 = vector.extract_strided_slice %96 {offsets = [2, 0], sizes = [1, 128], strides = [1, 1]} : vector<7x128xf32> to vector<1x128xf32>
    %cst_47 = arith.constant 0.000000e+00 : f32
    %106 = vector.broadcast %cst_47 : f32 to vector<1x64xf32>
    %cst_48 = arith.constant 0.000000e+00 : f32
    %107 = vector.broadcast %cst_48 : f32 to vector<1x128xf32>
    %108 = tpu.concatenate %106, %105, %107 in 1 : vector<1x64xf32>, vector<1x128xf32>, vector<1x128xf32> -> vector<1x320xf32>
    %109 = arith.addf %104, %108 : vector<1x320xf32>
    %110 = vector.extract_strided_slice %96 {offsets = [3, 0], sizes = [1, 128], strides = [1, 1]} : vector<7x128xf32> to vector<1x128xf32>
    %cst_49 = arith.constant 0.000000e+00 : f32
    %111 = vector.broadcast %cst_49 : f32 to vector<1x96xf32>
    %cst_50 = arith.constant 0.000000e+00 : f32
    %112 = vector.broadcast %cst_50 : f32 to vector<1x96xf32>
    %113 = tpu.concatenate %111, %110, %112 in 1 : vector<1x96xf32>, vector<1x128xf32>, vector<1x96xf32> -> vector<1x320xf32>
    %114 = arith.addf %109, %113 : vector<1x320xf32>
    %115 = vector.extract_strided_slice %96 {offsets = [4, 0], sizes = [1, 128], strides = [1, 1]} : vector<7x128xf32> to vector<1x128xf32>
    %cst_51 = arith.constant 0.000000e+00 : f32
    %116 = vector.broadcast %cst_51 : f32 to vector<1x128xf32>
    %cst_52 = arith.constant 0.000000e+00 : f32
    %117 = vector.broadcast %cst_52 : f32 to vector<1x64xf32>
    %118 = tpu.concatenate %116, %115, %117 in 1 : vector<1x128xf32>, vector<1x128xf32>, vector<1x64xf32> -> vector<1x320xf32>
    %119 = arith.addf %114, %118 : vector<1x320xf32>
    %120 = vector.extract_strided_slice %96 {offsets = [5, 0], sizes = [1, 128], strides = [1, 1]} : vector<7x128xf32> to vector<1x128xf32>
    %cst_53 = arith.constant 0.000000e+00 : f32
    %121 = vector.broadcast %cst_53 : f32 to vector<1x160xf32>
    %cst_54 = arith.constant 0.000000e+00 : f32
    %122 = vector.broadcast %cst_54 : f32 to vector<1x32xf32>
    %123 = tpu.concatenate %121, %120, %122 in 1 : vector<1x160xf32>, vector<1x128xf32>, vector<1x32xf32> -> vector<1x320xf32>
    %124 = arith.addf %119, %123 : vector<1x320xf32>
    %125 = vector.extract_strided_slice %96 {offsets = [6, 0], sizes = [1, 128], strides = [1, 1]} : vector<7x128xf32> to vector<1x128xf32>
    %cst_55 = arith.constant 0.000000e+00 : f32
    %126 = vector.broadcast %cst_55 : f32 to vector<1x192xf32>
    %127 = tpu.concatenate %126, %125 in 1 : vector<1x192xf32>, vector<1x128xf32> -> vector<1x320xf32>
    %128 = arith.addf %124, %127 : vector<1x320xf32>
    %c0_56 = arith.constant 0 : index
    %c0_57 = arith.constant 0 : index
    %129 = vector.load %arg6[%c0_56, %c0_57] : memref<1x320xf32, #tpu.memory_space<vmem>>, vector<1x320xf32>
    %130 = arith.mulf %128, %129 : vector<1x320xf32>
    %c0_58 = arith.constant 0 : index
    %c0_59 = arith.constant 0 : index
    %131 = vector.load %arg14[%c0_58, %c0_59] : memref<1x320xf32, #tpu.memory_space<vmem>>, vector<1x320xf32>
    tpu.vector_store %arg14[%c0_58, %c0_59], %130 {strides = array<i32>} : memref<1x320xf32, #tpu.memory_space<vmem>>, vector<1x320xf32>,
    %c0_60 = arith.constant 0 : index
    %c0_61 = arith.constant 0 : index
    %132 = vector.load %arg7[%c0_60, %c0_61] : memref<8x514xf32, #tpu.memory_space<vmem>>, vector<8x514xf32>
    %c0_62 = arith.constant 0 : index
    %c0_63 = arith.constant 0 : index
    %133 = vector.load %arg8[%c0_62, %c0_63] : memref<514x512xf32, #tpu.memory_space<vmem>>, vector<514x512xf32>
    %cst_64 = arith.constant dense<0.000000e+00> : vector<8x512xf32>
    %134 = tpu.matmul %132, %133, %cst_64 {dimension_numbers = #tpu.dot_dimension_numbers<[1], [0], [0], [1], [0, 0, 1, 1], [], []>} : vector<8x514xf32>, vector<514x512xf32>, vector<8x512xf32> -> vector<8x512xf32>
    %135 = vector.extract_strided_slice %134 {offsets = [0, 0], sizes = [1, 512], strides = [1, 1]} : vector<8x512xf32> to vector<1x512xf32>
    %cst_65 = arith.constant 0.000000e+00 : f32
    %136 = vector.broadcast %cst_65 : f32 to vector<1x896xf32>
    %137 = tpu.concatenate %135, %136 in 1 : vector<1x512xf32>, vector<1x896xf32> -> vector<1x1408xf32>
    %138 = vector.extract_strided_slice %134 {offsets = [1, 0], sizes = [1, 512], strides = [1, 1]} : vector<8x512xf32> to vector<1x512xf32>
    %cst_66 = arith.constant 0.000000e+00 : f32
    %139 = vector.broadcast %cst_66 : f32 to vector<1x128xf32>
    %cst_67 = arith.constant 0.000000e+00 : f32
    %140 = vector.broadcast %cst_67 : f32 to vector<1x768xf32>
    %141 = tpu.concatenate %139, %138, %140 in 1 : vector<1x128xf32>, vector<1x512xf32>, vector<1x768xf32> -> vector<1x1408xf32>
    %142 = arith.addf %137, %141 : vector<1x1408xf32>
    %143 = vector.extract_strided_slice %134 {offsets = [2, 0], sizes = [1, 512], strides = [1, 1]} : vector<8x512xf32> to vector<1x512xf32>
    %cst_68 = arith.constant 0.000000e+00 : f32
    %144 = vector.broadcast %cst_68 : f32 to vector<1x256xf32>
    %cst_69 = arith.constant 0.000000e+00 : f32
    %145 = vector.broadcast %cst_69 : f32 to vector<1x640xf32>
    %146 = tpu.concatenate %144, %143, %145 in 1 : vector<1x256xf32>, vector<1x512xf32>, vector<1x640xf32> -> vector<1x1408xf32>
    %147 = arith.addf %142, %146 : vector<1x1408xf32>
    %148 = vector.extract_strided_slice %134 {offsets = [3, 0], sizes = [1, 512], strides = [1, 1]} : vector<8x512xf32> to vector<1x512xf32>
    %cst_70 = arith.constant 0.000000e+00 : f32
    %149 = vector.broadcast %cst_70 : f32 to vector<1x384xf32>
    %cst_71 = arith.constant 0.000000e+00 : f32
    %150 = vector.broadcast %cst_71 : f32 to vector<1x512xf32>
    %151 = tpu.concatenate %149, %148, %150 in 1 : vector<1x384xf32>, vector<1x512xf32>, vector<1x512xf32> -> vector<1x1408xf32>
    %152 = arith.addf %147, %151 : vector<1x1408xf32>
    %153 = vector.extract_strided_slice %134 {offsets = [4, 0], sizes = [1, 512], strides = [1, 1]} : vector<8x512xf32> to vector<1x512xf32>
    %cst_72 = arith.constant 0.000000e+00 : f32
    %154 = vector.broadcast %cst_72 : f32 to vector<1x512xf32>
    %cst_73 = arith.constant 0.000000e+00 : f32
    %155 = vector.broadcast %cst_73 : f32 to vector<1x384xf32>
    %156 = tpu.concatenate %154, %153, %155 in 1 : vector<1x512xf32>, vector<1x512xf32>, vector<1x384xf32> -> vector<1x1408xf32>
    %157 = arith.addf %152, %156 : vector<1x1408xf32>
    %158 = vector.extract_strided_slice %134 {offsets = [5, 0], sizes = [1, 512], strides = [1, 1]} : vector<8x512xf32> to vector<1x512xf32>
    %cst_74 = arith.constant 0.000000e+00 : f32
    %159 = vector.broadcast %cst_74 : f32 to vector<1x640xf32>
    %cst_75 = arith.constant 0.000000e+00 : f32
    %160 = vector.broadcast %cst_75 : f32 to vector<1x256xf32>
    %161 = tpu.concatenate %159, %158, %160 in 1 : vector<1x640xf32>, vector<1x512xf32>, vector<1x256xf32> -> vector<1x1408xf32>
    %162 = arith.addf %157, %161 : vector<1x1408xf32>
    %163 = vector.extract_strided_slice %134 {offsets = [6, 0], sizes = [1, 512], strides = [1, 1]} : vector<8x512xf32> to vector<1x512xf32>
    %cst_76 = arith.constant 0.000000e+00 : f32
    %164 = vector.broadcast %cst_76 : f32 to vector<1x768xf32>
    %cst_77 = arith.constant 0.000000e+00 : f32
    %165 = vector.broadcast %cst_77 : f32 to vector<1x128xf32>
    %166 = tpu.concatenate %164, %163, %165 in 1 : vector<1x768xf32>, vector<1x512xf32>, vector<1x128xf32> -> vector<1x1408xf32>
    %167 = arith.addf %162, %166 : vector<1x1408xf32>
    %168 = vector.extract_strided_slice %134 {offsets = [7, 0], sizes = [1, 512], strides = [1, 1]} : vector<8x512xf32> to vector<1x512xf32>
    %cst_78 = arith.constant 0.000000e+00 : f32
    %169 = vector.broadcast %cst_78 : f32 to vector<1x896xf32>
    %170 = tpu.concatenate %169, %168 in 1 : vector<1x896xf32>, vector<1x512xf32> -> vector<1x1408xf32>
    %171 = arith.addf %167, %170 : vector<1x1408xf32>
    %172 = vector.extract_strided_slice %171 {offsets = [0, 256], sizes = [1, 896], strides = [1, 1]} : vector<1x1408xf32> to vector<1x896xf32>
    %c0_79 = arith.constant 0 : index
    %c0_80 = arith.constant 0 : index
    %173 = vector.load %arg9[%c0_79, %c0_80] : memref<1x896xf32, #tpu.memory_space<vmem>>, vector<1x896xf32>
    %174 = arith.mulf %172, %173 : vector<1x896xf32>
    %c0_81 = arith.constant 0 : index
    %c0_82 = arith.constant 0 : index
    %175 = vector.load %arg15[%c0_81, %c0_82] : memref<1x896xf32, #tpu.memory_space<vmem>>, vector<1x896xf32>
    tpu.vector_store %arg15[%c0_81, %c0_82], %174 {strides = array<i32>} : memref<1x896xf32, #tpu.memory_space<vmem>>, vector<1x896xf32>,
    %c0_83 = arith.constant 0 : index
    %c0_84 = arith.constant 0 : index
    %176 = vector.load %arg10[%c0_83, %c0_84] : memref<6x1024xf32, #tpu.memory_space<vmem>>, vector<6x1024xf32>
    %c0_85 = arith.constant 0 : index
    %c0_86 = arith.constant 0 : index
    %177 = vector.load %arg11[%c0_85, %c0_86] : memref<1024x1024xf32, #tpu.memory_space<vmem>>, vector<1024x1024xf32>
    %cst_87 = arith.constant dense<0.000000e+00> : vector<6x1024xf32>
    %178 = tpu.matmul %176, %177, %cst_87 {dimension_numbers = #tpu.dot_dimension_numbers<[1], [0], [0], [1], [0, 0, 1, 1], [], []>} : vector<6x1024xf32>, vector<1024x1024xf32>, vector<6x1024xf32> -> vector<6x1024xf32>
    %179 = vector.extract_strided_slice %178 {offsets = [0, 0], sizes = [1, 512], strides = [1, 1]} : vector<6x1024xf32> to vector<1x512xf32>
    %cst_88 = arith.constant 0.000000e+00 : f32
    %180 = vector.broadcast %cst_88 : f32 to vector<1x640xf32>
    %181 = tpu.concatenate %179, %180 in 1 : vector<1x512xf32>, vector<1x640xf32> -> vector<1x1152xf32>
    %182 = vector.extract_strided_slice %178 {offsets = [1, 0], sizes = [1, 512], strides = [1, 1]} : vector<6x1024xf32> to vector<1x512xf32>
    %cst_89 = arith.constant 0.000000e+00 : f32
    %183 = vector.broadcast %cst_89 : f32 to vector<1x128xf32>
    %cst_90 = arith.constant 0.000000e+00 : f32
    %184 = vector.broadcast %cst_90 : f32 to vector<1x512xf32>
    %185 = tpu.concatenate %183, %182, %184 in 1 : vector<1x128xf32>, vector<1x512xf32>, vector<1x512xf32> -> vector<1x1152xf32>
    %186 = arith.addf %181, %185 : vector<1x1152xf32>
    %187 = vector.extract_strided_slice %178 {offsets = [2, 0], sizes = [1, 512], strides = [1, 1]} : vector<6x1024xf32> to vector<1x512xf32>
    %cst_91 = arith.constant 0.000000e+00 : f32
    %188 = vector.broadcast %cst_91 : f32 to vector<1x256xf32>
    %cst_92 = arith.constant 0.000000e+00 : f32
    %189 = vector.broadcast %cst_92 : f32 to vector<1x384xf32>
    %190 = tpu.concatenate %188, %187, %189 in 1 : vector<1x256xf32>, vector<1x512xf32>, vector<1x384xf32> -> vector<1x1152xf32>
    %191 = arith.addf %186, %190 : vector<1x1152xf32>
    %192 = vector.extract_strided_slice %178 {offsets = [3, 0], sizes = [1, 512], strides = [1, 1]} : vector<6x1024xf32> to vector<1x512xf32>
    %cst_93 = arith.constant 0.000000e+00 : f32
    %193 = vector.broadcast %cst_93 : f32 to vector<1x384xf32>
    %cst_94 = arith.constant 0.000000e+00 : f32
    %194 = vector.broadcast %cst_94 : f32 to vector<1x256xf32>
    %195 = tpu.concatenate %193, %192, %194 in 1 : vector<1x384xf32>, vector<1x512xf32>, vector<1x256xf32> -> vector<1x1152xf32>
    %196 = arith.addf %191, %195 : vector<1x1152xf32>
    %197 = vector.extract_strided_slice %178 {offsets = [4, 0], sizes = [1, 512], strides = [1, 1]} : vector<6x1024xf32> to vector<1x512xf32>
    %cst_95 = arith.constant 0.000000e+00 : f32
    %198 = vector.broadcast %cst_95 : f32 to vector<1x512xf32>
    %cst_96 = arith.constant 0.000000e+00 : f32
    %199 = vector.broadcast %cst_96 : f32 to vector<1x128xf32>
    %200 = tpu.concatenate %198, %197, %199 in 1 : vector<1x512xf32>, vector<1x512xf32>, vector<1x128xf32> -> vector<1x1152xf32>
    %201 = arith.addf %196, %200 : vector<1x1152xf32>
    %202 = vector.extract_strided_slice %178 {offsets = [5, 0], sizes = [1, 512], strides = [1, 1]} : vector<6x1024xf32> to vector<1x512xf32>
    %cst_97 = arith.constant 0.000000e+00 : f32
    %203 = vector.broadcast %cst_97 : f32 to vector<1x640xf32>
    %204 = tpu.concatenate %203, %202 in 1 : vector<1x640xf32>, vector<1x512xf32> -> vector<1x1152xf32>
    %205 = arith.addf %201, %204 : vector<1x1152xf32>
    %206 = vector.extract_strided_slice %178 {offsets = [0, 512], sizes = [1, 512], strides = [1, 1]} : vector<6x1024xf32> to vector<1x512xf32>
    %cst_98 = arith.constant 0.000000e+00 : f32
    %207 = vector.broadcast %cst_98 : f32 to vector<1x640xf32>
    %208 = tpu.concatenate %206, %207 in 1 : vector<1x512xf32>, vector<1x640xf32> -> vector<1x1152xf32>
    %209 = vector.extract_strided_slice %178 {offsets = [1, 512], sizes = [1, 512], strides = [1, 1]} : vector<6x1024xf32> to vector<1x512xf32>
    %cst_99 = arith.constant 0.000000e+00 : f32
    %210 = vector.broadcast %cst_99 : f32 to vector<1x128xf32>
    %cst_100 = arith.constant 0.000000e+00 : f32
    %211 = vector.broadcast %cst_100 : f32 to vector<1x512xf32>
    %212 = tpu.concatenate %210, %209, %211 in 1 : vector<1x128xf32>, vector<1x512xf32>, vector<1x512xf32> -> vector<1x1152xf32>
    %213 = arith.addf %208, %212 : vector<1x1152xf32>
    %214 = vector.extract_strided_slice %178 {offsets = [2, 512], sizes = [1, 512], strides = [1, 1]} : vector<6x1024xf32> to vector<1x512xf32>
    %cst_101 = arith.constant 0.000000e+00 : f32
    %215 = vector.broadcast %cst_101 : f32 to vector<1x256xf32>
    %cst_102 = arith.constant 0.000000e+00 : f32
    %216 = vector.broadcast %cst_102 : f32 to vector<1x384xf32>
    %217 = tpu.concatenate %215, %214, %216 in 1 : vector<1x256xf32>, vector<1x512xf32>, vector<1x384xf32> -> vector<1x1152xf32>
    %218 = arith.addf %213, %217 : vector<1x1152xf32>
    %219 = vector.extract_strided_slice %178 {offsets = [3, 512], sizes = [1, 512], strides = [1, 1]} : vector<6x1024xf32> to vector<1x512xf32>
    %cst_103 = arith.constant 0.000000e+00 : f32
    %220 = vector.broadcast %cst_103 : f32 to vector<1x384xf32>
    %cst_104 = arith.constant 0.000000e+00 : f32
    %221 = vector.broadcast %cst_104 : f32 to vector<1x256xf32>
    %222 = tpu.concatenate %220, %219, %221 in 1 : vector<1x384xf32>, vector<1x512xf32>, vector<1x256xf32> -> vector<1x1152xf32>
    %223 = arith.addf %218, %222 : vector<1x1152xf32>
    %224 = vector.extract_strided_slice %178 {offsets = [4, 512], sizes = [1, 512], strides = [1, 1]} : vector<6x1024xf32> to vector<1x512xf32>
    %cst_105 = arith.constant 0.000000e+00 : f32
    %225 = vector.broadcast %cst_105 : f32 to vector<1x512xf32>
    %cst_106 = arith.constant 0.000000e+00 : f32
    %226 = vector.broadcast %cst_106 : f32 to vector<1x128xf32>
    %227 = tpu.concatenate %225, %224, %226 in 1 : vector<1x512xf32>, vector<1x512xf32>, vector<1x128xf32> -> vector<1x1152xf32>
    %228 = arith.addf %223, %227 : vector<1x1152xf32>
    %229 = vector.extract_strided_slice %178 {offsets = [5, 512], sizes = [1, 512], strides = [1, 1]} : vector<6x1024xf32> to vector<1x512xf32>
    %cst_107 = arith.constant 0.000000e+00 : f32
    %230 = vector.broadcast %cst_107 : f32 to vector<1x640xf32>
    %231 = tpu.concatenate %230, %229 in 1 : vector<1x640xf32>, vector<1x512xf32> -> vector<1x1152xf32>
    %232 = arith.addf %228, %231 : vector<1x1152xf32>
    %233 = tpu.concatenate %205, %232 in 0 : vector<1x1152xf32>, vector<1x1152xf32> -> vector<2x1152xf32>
    %c0_108 = arith.constant 0 : index
    %c0_109 = arith.constant 0 : index
    %234 = vector.load %arg12[%c0_108, %c0_109] : memref<1x1152xf32, #tpu.memory_space<vmem>>, vector<1x1152xf32>
    %235 = vector.broadcast %234 : vector<1x1152xf32> to vector<2x1152xf32>
    %236 = arith.mulf %233, %235 : vector<2x1152xf32>
    %c0_110 = arith.constant 0 : index
    %c0_111 = arith.constant 0 : index
    %237 = vector.load %arg16[%c0_110, %c0_111] : memref<2x1152xf32, #tpu.memory_space<vmem>>, vector<2x1152xf32>
    tpu.vector_store %arg16[%c0_110, %c0_111], %236 {strides = array<i32>} : memref<2x1152xf32, #tpu.memory_space<vmem>>, vector<2x1152xf32>,
    return
  }
  func.func @transform_0(%arg0: i32) -> (i32, i32) {
    %c0_i32 = arith.constant 0 : i32
    %c0_i32_0 = arith.constant 0 : i32
    %c0_i32_1 = arith.constant 0 : i32
    return %c0_i32, %c0_i32_0 : i32, i32
  }
  func.func @transform_1(%arg0: i32) -> (i32, i32) {
    %c0_i32 = arith.constant 0 : i32
    %c0_i32_0 = arith.constant 0 : i32
    %c0_i32_1 = arith.constant 0 : i32
    return %c0_i32, %c0_i32_0 : i32, i32
  }
  func.func @transform_2(%arg0: i32) -> (i32, i32) {
    %c0_i32 = arith.constant 0 : i32
    %c0_i32_0 = arith.constant 0 : i32
    %c0_i32_1 = arith.constant 0 : i32
    return %c0_i32, %c0_i32_0 : i32, i32
  }
  func.func @transform_3(%arg0: i32) -> (i32, i32) {
    %c0_i32 = arith.constant 0 : i32
    %c0_i32_0 = arith.constant 0 : i32
    %c0_i32_1 = arith.constant 0 : i32
    return %c0_i32, %c0_i32_0 : i32, i32
  }
  func.func @transform_4(%arg0: i32) -> (i32, i32) {
    %c0_i32 = arith.constant 0 : i32
    %c0_i32_0 = arith.constant 0 : i32
    %c0_i32_1 = arith.constant 0 : i32
    return %c0_i32, %c0_i32_0 : i32, i32
  }
  func.func @transform_5(%arg0: i32) -> (i32, i32) {
    %c0_i32 = arith.constant 0 : i32
    %c0_i32_0 = arith.constant 0 : i32
    %c0_i32_1 = arith.constant 0 : i32
    return %c0_i32, %c0_i32_0 : i32, i32
  }
  func.func @transform_6(%arg0: i32) -> (i32, i32) {
    %c0_i32 = arith.constant 0 : i32
    %c0_i32_0 = arith.constant 0 : i32
    %c0_i32_1 = arith.constant 0 : i32
    return %c0_i32, %c0_i32_0 : i32, i32
  }
  func.func @transform_7(%arg0: i32) -> (i32, i32) {
    %c0_i32 = arith.constant 0 : i32
    %c0_i32_0 = arith.constant 0 : i32
    %c0_i32_1 = arith.constant 0 : i32
    return %c0_i32, %c0_i32_0 : i32, i32
  }
  func.func @transform_8(%arg0: i32) -> (i32, i32) {
    %c0_i32 = arith.constant 0 : i32
    %c0_i32_0 = arith.constant 0 : i32
    %c0_i32_1 = arith.constant 0 : i32
    return %c0_i32, %c0_i32_0 : i32, i32
  }
  func.func @transform_9(%arg0: i32) -> (i32, i32) {
    %c0_i32 = arith.constant 0 : i32
    %c0_i32_0 = arith.constant 0 : i32
    %c0_i32_1 = arith.constant 0 : i32
    return %c0_i32, %c0_i32_0 : i32, i32
  }
  func.func @transform_10(%arg0: i32) -> (i32, i32) {
    %c0_i32 = arith.constant 0 : i32
    %c0_i32_0 = arith.constant 0 : i32
    %c0_i32_1 = arith.constant 0 : i32
    return %c0_i32, %c0_i32_0 : i32, i32
  }
  func.func @transform_11(%arg0: i32) -> (i32, i32) {
    %c0_i32 = arith.constant 0 : i32
    %c0_i32_0 = arith.constant 0 : i32
    %c0_i32_1 = arith.constant 0 : i32
    return %c0_i32, %c0_i32_0 : i32, i32
  }
  func.func @transform_12(%arg0: i32) -> (i32, i32) {
    %c0_i32 = arith.constant 0 : i32
    %c0_i32_0 = arith.constant 0 : i32
    %c0_i32_1 = arith.constant 0 : i32
    return %c0_i32, %c0_i32_0 : i32, i32
  }
  func.func @transform_13(%arg0: i32) -> (i32, i32) {
    %c0_i32 = arith.constant 0 : i32
    %c0_i32_0 = arith.constant 0 : i32
    %c0_i32_1 = arith.constant 0 : i32
    return %c0_i32, %c0_i32_0 : i32, i32
  }
  func.func @transform_14(%arg0: i32) -> (i32, i32) {
    %c0_i32 = arith.constant 0 : i32
    %c0_i32_0 = arith.constant 0 : i32
    %c0_i32_1 = arith.constant 0 : i32
    return %c0_i32, %c0_i32_0 : i32, i32
  }
  func.func @transform_15(%arg0: i32) -> (i32, i32) {
    %c0_i32 = arith.constant 0 : i32
    %c0_i32_0 = arith.constant 0 : i32
    %c0_i32_1 = arith.constant 0 : i32
    return %c0_i32, %c0_i32_0 : i32, i32
  }
}

</mosaic_0001>

<bundles_post_ra>
// kernel: model_forward.1
= control target key start
LH: loop header
LB: loop body
LE: loop exit
PB: predicated region body
PF: predicated region fallthrough
CT: control target
= control target key end

     0   :  { %21 = vsyncpa [#allocation3], 0  ;;  %s5110_s0 = inlined_call_operand.vmem [shape: f32[18,66], index: 0, kind: input, shape index: {}]   ;;  %s5111_s1 = inlined_call_operand.hbm [shape: f32[66,64], index: 1, kind: input, shape index: {}]   ;;  %s5112_s2 = inlined_call_operand.hbm [shape: f32[1,128], index: 2, kind: input, shape index: {}]   ;;  %s5113_s3 = inlined_call_operand.vmem [shape: f32[7,130], index: 3, kind: input, shape index: {}]   ;;  %s5114_s4 = inlined_call_operand.hbm [shape: f32[130,128], index: 4, kind: input, shape index: {}]   ;;  %s5115_s5 = inlined_call_operand.hbm [shape: f32[1,320], index: 5, kind: input, shape index: {}]   ;;  %s5116_s6 = inlined_call_operand.vmem [shape: f32[8,514], index: 6, kind: input, shape index: {}]   ;;  %s5117_s7 = inlined_call_operand.hbm [shape: f32[514,512], index: 7, kind: input, shape index: {}]   ;;  %s5118_s8 = inlined_call_operand.hbm [shape: f32[1,896], index: 8, kind: input, shape index: {}]   ;;  %s5119_s9 = inlined_call_operand.vmem [shape: f32[6,1024], index: 9, kind: input, shape index: {}]   ;;  %s5120_s10 = inlined_call_operand.hbm [shape: f32[1024,1024], index: 10, kind: input, shape index: {}]   ;;  %s5121_s11 = inlined_call_operand.hbm [shape: f32[1,1152], index: 11, kind: input, shape index: {}]   ;;  %s5122_s12 = inlined_call_operand.hbm [shape: f32[2,128], index: 12, kind: output, shape index: {0}]   ;;  %s5123_s13 = inlined_call_operand.hbm [shape: f32[1,320], index: 13, kind: output, shape index: {1}]   ;;  %s5124_s14 = inlined_call_operand.vmem [shape: f32[1,896], index: 14, kind: output, shape index: {2}]   ;;  %s5125_s15 = inlined_call_operand.hbm [shape: f32[2,1152], index: 15, kind: output, shape index: {3}]  }
   0x1   :  { %22 = vsyncpa [#allocation6], 0 }
   0x2   :  { %23 = vsyncpa [#allocation9], 0 }
   0x3   :  { %24 = vsyncpa [#allocation12], 0 }
   0x4   :  { %25 = vsyncpa [#allocation15], 0 }
   0x5   :  { %26 = vsyncpa [#allocation4], 0  ;;  %s48_s20 = sshll.u32 %s5112_s2, 4  ;;  %s49_s20 = int_to_ptr.hbm [resolvable:$true] %s48_s20 }
   0x6   :  { %27 = vsyncpa [#allocation18], 0  ;;  %s4311_s21 = smov [#allocation5]   ;;  %s74_s25 = sshll.u32 %s5115_s5, 4  ;;  %s75_s25 = int_to_ptr.hbm [resolvable:$true] %s74_s25 }
   0x7   :  { %s50_s22 = sshll.u32 %s4311_s21, 4  ;;  %s4312_s26 = smov [#allocation8]   ;;  %s51_s22 = int_to_ptr.vmem [resolvable:$true] %s50_s22 }
   0x8   :  { %53 = dma.hbm_to_vmem [thread:$0]  %s49_s20, 16, %s51_s22, [#allocation6]  }
   0x9   :  { %s76_s27 = sshll.u32 %s4312_s26, 4  ;;  %s100_s30 = sshll.u32 %s5118_s8, 4  ;;  %s77_s27 = int_to_ptr.vmem [resolvable:$true] %s76_s27  ;;  %s101_s30 = int_to_ptr.hbm [resolvable:$true] %s100_s30 }
   0xa   :  { %79 = dma.hbm_to_vmem [thread:$0]  %s75_s25, 48, %s77_s27, [#allocation9]  }
   0xb   :  { %s34_s17 = sshll.u32 %s5111_s1, 4  ;;  %s4313_s18 = smov [#allocation11]   ;;  %s35_s17 = int_to_ptr.hbm [resolvable:$true] %s34_s17 }
   0xc   :  { %s102_s19 = sshll.u32 %s4313_s18, 4  ;;  %s4314_s5 = smov [#allocation2]   ;;  %s103_s19 = int_to_ptr.vmem [resolvable:$true] %s102_s19 }
   0xd   :  { %105 = dma.hbm_to_vmem [thread:$0]  %s101_s30, 112, %s103_s19, [#allocation12]  }
   0xe   :  { %s36_s20 = sshll.u32 %s4314_s5, 4  ;;  %s4315_s21 = smov 128   ;;  %s37_s20 = int_to_ptr.vmem [resolvable:$true] %s36_s20 }
   0xf   :  { %s4316_s22 = smov 8   ;;  %s60_s24 = sshll.u32 %s5114_s4, 4  ;;  %s61_s24 = int_to_ptr.hbm [resolvable:$true] %s60_s24 }
  0x10   :  { %42 = dma.hbm_to_vmem [thread:$0]  %s35_s17, 1152, %s37_s20, [#allocation3], %s4315_s21, %s4315_s21, %s4316_s22  }
  0x11   :  { %s4317_s25 = smov [#allocation7]   ;;  %s86_s28 = sshll.u32 %s5117_s7, 4  ;;  %s87_s28 = int_to_ptr.hbm [resolvable:$true] %s86_s28 }
  0x12   :  { %s62_s26 = sshll.u32 %s4317_s25, 4  ;;  %s4318_s29 = smov [#allocation10]   ;;  %s63_s26 = int_to_ptr.vmem [resolvable:$true] %s62_s26 }
  0x13   :  { %68 = dma.hbm_to_vmem [thread:$0]  %s61_s24, 2176, %s63_s26, [#allocation6], %s4315_s21, %s4315_s21, %s4316_s22  }
  0x14   :  { %s88_s30 = sshll.u32 %s4318_s29, 4  ;;  %s4319_s2 = smov 512   ;;  %s89_s30 = int_to_ptr.vmem [resolvable:$true] %s88_s30 }
  0x15   :  { %s4320_s16 = smov 32   ;;  %s112_s4 = sshll.u32 %s5120_s10, 4  ;;  %s113_s4 = int_to_ptr.hbm [resolvable:$true] %s112_s4 }
  0x16   :  { %94 = dma.hbm_to_vmem [thread:$0]  %s87_s28, 33280, %s89_s30, [#allocation9], %s4319_s2, %s4319_s2, %s4320_s16  }
  0x17   :  { %s4321_s19 = smov [#allocation13]   ;;  %s126_s7 = sshll.u32 %s5121_s11, 4  ;;  %s127_s7 = int_to_ptr.hbm [resolvable:$true] %s126_s7 }
  0x18   :  { %s114_s5 = sshll.u32 %s4321_s19, 4  ;;  %s4322_s21 = smov 1024   ;;  %s115_s5 = int_to_ptr.vmem [resolvable:$true] %s114_s5 }
  0x19   :  { %s4323_s22 = smov 64   ;;  %s4324_s8 = smov [#allocation14]  }
  0x1a   :  { %120 = dma.hbm_to_vmem [thread:$0]  %s113_s4, 131072, %s115_s5, [#allocation12], %s4322_s21, %s4322_s21, %s4323_s22  }
  0x1b   :  { %s128_s24 = sshll.u32 %s4324_s8, 4  ;;  %s129_s24 = int_to_ptr.vmem [resolvable:$true] %s128_s24 }
  0x1c   :  { %131 = dma.hbm_to_vmem [thread:$0]  %s127_s7, 144, %s129_s24, [#allocation15]  }
  0x1d   :  { %4297 = dma.done.wait [#allocation3], 1152  }
  0x1e   :  { %4298 = vsyncadd [#allocation3], 4294966144 }
  0x1f   :  { %4299 = dma.done.wait [#allocation6], 2192  }
  0x20   :  { %4300 = vsyncadd [#allocation6], 4294965104 }
  0x21   :  { %4301 = dma.done.wait [#allocation9], 33328  }
  0x22   :  { %4302 = vsyncadd [#allocation9], 4294933968 }
  0x23   :  { %4303 = dma.done.wait [#allocation12], 131184  }
  0x24   :  { %4304 = vsyncadd [#allocation12], 4294836112 }
  0x25   :  { %4305 = dma.done.wait [#allocation15], 144  }
  0x26   :  { %4306 = vsyncadd [#allocation15], 4294967152  ;;  %vm186_vm0 = vcmask 1041408   ;;  %v175_v0 = vld [vmem:[#allocation2 + $0x40] sm:$0x3]  ;;  %v410_v1 = vld [vmem:[#allocation7 + $0x78] sm:$0xff] }
  0x27   :  { %v174_v2 = vld [vmem:[#allocation2 + $0x38] sm:$0xff]  ;;  %3968 = vmatpush.msk.msra.mxu0 %vm186_vm0, %v175_v0  ;;  %419 = vmatpush.msra.mxu1 %v410_v1  ;;  %v173_v4 = vld [vmem:[#allocation2 + $0x30] sm:$0xff]  ;;  %v172_v6 = vld [vmem:[#allocation2 + $0x28] sm:$0xff]  ;;  %vm176_vm1 = vcmask 539648   ;;  %vm412_vm2 = vcmask 15360   ;;  %s4326_s21 = smov 16  }
  0x28   :  { %v409_v3 = vld [vmem:[#allocation7 + $0x70] sm:$0xff]  ;;  %v408_v5 = vld [vmem:[#allocation7 + $0x68] sm:$0xff]  ;;  %v407_v7 = vld [vmem:[#allocation7 + $0x60] sm:$0xff]  ;;  %s4327_s8 = smov 80   ;;  %s4328_s24 = smov 96   ;;  %vm223_vm3 = vcmask 130048  }
  0x29   :  { %198 = vmatpush.msra.mxu0 %v174_v2  ;;  %420 = vmatpush.msra.mxu1 %v409_v3  ;;  %v594_v8 = vld [vmem:[#allocation10 + $0x1e0] sm:$0xff]  ;;  %v171_v9 = vld [vmem:[#allocation2 + $0x20] sm:$0xff]  ;;  %v411_v11 = vld [vmem:[#allocation7 + $0x80] sm:$0x3]  ;;  %s4329_s10 = smov 112   ;;  %vm232_vm4 = vcmask 261120  }
  0x2a   :  { %v406_v10 = vld [vmem:[#allocation7 + $0x58] sm:$0xff]  ;;  %809 = vmatpush.msra.mxu3 %v594_v8  ;;  %v590_v12 = vld [vmem:[#allocation10 + $0x1c0] sm:$0xff]  ;;  %3973 = vmatpush.msk.msra.mxu2 %vm186_vm0, %v411_v11  ;;  %v403_v24 = vld [vmem:[#allocation7 + $0x40] sm:$0xff]  ;;  %vm225_vm5 = vcmask 654336   ;;  %vm216_vm6 = vcmask 523264   ;;  %vm234_vm7 = vcmask 785408  }
  0x2b   :  { %199 = vmatpush.msra.mxu0 %v173_v4  ;;  %421 = vmatpush.msra.mxu1 %v408_v5  ;;  %v658_v13 = vld [vmem:[#allocation10 + $0x3e0] sm:$0xff]  ;;  %v168_v23 = vld [vmem:[#allocation2 + $0x8] sm:$0xff]  ;;  %v167_v27 = vld [vmem:[#allocation2] sm:$0xff]  ;;  %vm241_vm8 = vcmask 392192   ;;  %vm243_vm9 = vcmask 916480   ;;  %vm373_vm10 = vcmask 1040384  }
  0x2c   :  { %v170_v14 = vld [vmem:[#allocation2 + $0x18] sm:$0xff]  ;;  %810 = vmatpush.msra.mxu3 %v590_v12  ;;  %v169_v19 = vld [vmem:[#allocation2 + $0x10] sm:$0xff]  ;;  %829 = vmatpush.msrb.mxu2 %v658_v13  ;;  %v402_v28 = vld [vmem:[#allocation7 + $0x38] sm:$0xff]  ;;  %vm1337_vm11 = vcmask 1042434   ;;  %vm1340_vm12 = vcmask 1044484   ;;  %vm1342_vm13 = vcmask 1045508  }
  0x2d   :  { %200 = vmatpush.msra.mxu0 %v172_v6  ;;  %422 = vmatpush.msra.mxu1 %v407_v7  ;;  %v405_v15 = vld [vmem:[#allocation7 + $0x50] sm:$0xff]  ;;  %v404_v20 = vld [vmem:[#allocation7 + $0x48] sm:$0xff]  ;;  %v399_v39 = vld [vmem:[#allocation7 + $0x20] sm:$0xff]  ;;  %vm1344_vm14 = vcmask 1043456   ;;  %s4331_s4 = smov [#allocation17]   ;;  %s4332_s5 = smov [#allocation16]  }
  0x2e   :  { %v586_v16 = vld [vmem:[#allocation10 + $0x1a0] sm:$0xff]  ;;  %v164_v29 = vld [vmem:[%s5110_s0] sm:$0xff]  ;;  %v165_v45 = vld [vmem:[%s5110_s0 + $0x8] sm:$0xff]  ;;  %s3928_s19 = sshll.u32 %s4331_s4, 4  ;;  %s3919_s23 = sshll.u32 %s5122_s12, 4  ;;  %s3929_s19 = int_to_ptr.vmem [resolvable:$true] %s3928_s19  ;;  %s3920_s23 = int_to_ptr.hbm [resolvable:$true] %s3919_s23 }
  0x2f   :  { %201 = vmatpush.msra.mxu0 %v171_v9  ;;  %423 = vmatpush.msra.mxu1 %v406_v10  ;;  %v654_v17 = vld [vmem:[#allocation10 + $0x3c0] sm:$0xff]  ;;  %v398_v43 = vld [vmem:[#allocation7 + $0x18] sm:$0xff]  ;;  %v395_v55 = vld [vmem:[#allocation7] sm:$0xff]  ;;  %s4333_s12 = smov [#allocation19]  }
  0x30   :  { %v582_v18 = vld [vmem:[#allocation10 + $0x180] sm:$0xff]  ;;  %811 = vmatpush.msra.mxu3 %v586_v16  ;;  %830 = vmatpush.msrb.mxu2 %v654_v17  ;;  %v394_v63 = vld [vmem:[%s5113_s3 + $0x8] sm:$0x7f]  ;;  %v659_v16 = vld [vmem:[#allocation10 + $0x3e8] sm:$0xff] }
  0x31   :  { %202 = vmatpush.msra.mxu0 %v170_v14  ;;  %424 = vmatpush.msra.mxu1 %v405_v15  ;;  %v650_v21 = vld [vmem:[#allocation10 + $0x3a0] sm:$0xff]  ;;  %v4457_v14 = vld [vmem:[%s5116_s6] sm:$0xff] }
  0x32   :  { %v578_v22 = vld [vmem:[#allocation10 + $0x160] sm:$0xff]  ;;  %812 = vmatpush.msra.mxu3 %v582_v18  ;;  %831 = vmatpush.msrb.mxu2 %v650_v21 }
  0x33   :  { %203 = vmatpush.msra.mxu0 %v169_v19  ;;  %425 = vmatpush.msra.mxu1 %v404_v20  ;;  %v646_v25 = vld [vmem:[#allocation10 + $0x380] sm:$0xff]  ;;  %v166_v19 = vld [vmem:[%s5110_s0 + $0x10] sm:$0x3]  ;;  %v4467_v20 = vld [vmem:[%s5116_s6 + $0x8] sm:$0xff]  ;;  %s3930_s0 = sshll.u32 %s5123_s13, 4  ;;  %s3941_s13 = sshll.u32 %s4333_s12, 4  ;;  %s3931_s0 = int_to_ptr.hbm [resolvable:$true] %s3930_s0  ;;  %s3942_s13 = int_to_ptr.vmem [resolvable:$true] %s3941_s13 }
  0x34   :  { %v574_v26 = vld [vmem:[#allocation10 + $0x140] sm:$0xff]  ;;  %813 = vmatpush.msra.mxu3 %v578_v22  ;;  %832 = vmatpush.msrb.mxu2 %v646_v25 }
  0x35   :  { %204 = vmatpush.msra.mxu0 %v168_v23  ;;  %426 = vmatpush.msra.mxu1 %v403_v24  ;;  %v642_v30 = vld [vmem:[#allocation10 + $0x360] sm:$0xff]  ;;  %v595_v23 = vld [vmem:[#allocation10 + $0x1e8] sm:$0xff] }
  0x36   :  { %v401_v31 = vld [vmem:[#allocation7 + $0x30] sm:$0xff]  ;;  %814 = vmatpush.msra.mxu3 %v574_v26  ;;  %v400_v35 = vld [vmem:[#allocation7 + $0x28] sm:$0xff]  ;;  %833 = vmatpush.msrb.mxu2 %v642_v30 }
  0x37   :  { %v722_v32 = vld [vmem:[#allocation10 + $0x5e0] sm:$0xff]  ;;  %205 = vmatpush.msra.mxu0 %v167_v27  ;;  %427 = vmatpush.msra.mxu1 %v402_v28  ;;  %v655_v24 = vld [vmem:[#allocation10 + $0x3c8] sm:$0xff] }
  0x38   :  { %v570_v33 = vld [vmem:[#allocation10 + $0x120] sm:$0xff]  ;;  %3969 = vmatmul.msk.f32.vlgmr.msra.gmra.mxu0 %vm176_vm1, %v164_v29  ;;  %3974 = vmatmul.msk.f32.vlgmr.msra.gmra.mxu2 %vm412_vm2, %v394_v63  ;;  %v591_v27 = vld [vmem:[#allocation10 + $0x1c8] sm:$0xff] }
  0x39   :  { %v638_v34 = vld [vmem:[#allocation10 + $0x340] sm:$0xff]  ;;  %428 = vmatpush.msra.mxu1 %v401_v31  ;;  %849 = vmatpush.msrb.mxu0 %v722_v32  ;;  %v651_v28 = vld [vmem:[#allocation10 + $0x3a8] sm:$0xff] }
  0x3a   :  { %v718_v36 = vld [vmem:[#allocation10 + $0x5c0] sm:$0xff]  ;;  %815 = vmatpush.msra.mxu3 %v570_v33  ;;  %834 = vmatpush.msrb.mxu2 %v638_v34  ;;  %v587_v31 = vld [vmem:[#allocation10 + $0x1a8] sm:$0xff] }
  0x3b   :  { %v566_v37 = vld [vmem:[#allocation10 + $0x100] sm:$0xff]  ;;  %429 = vmatpush.msra.mxu1 %v400_v35  ;;  %850 = vmatpush.msrb.mxu0 %v718_v36  ;;  %v647_v32 = vld [vmem:[#allocation10 + $0x388] sm:$0xff] }
  0x3c   :  { %v634_v38 = vld [vmem:[#allocation10 + $0x320] sm:$0xff]  ;;  %816 = vmatpush.msra.mxu3 %v566_v37  ;;  %v393_v35 = vld [vmem:[%s5113_s3] sm:$0x7f]  ;;  %s3917_s3 = sshll.u32 %s4332_s5, 4  ;;  %s3918_s3 = int_to_ptr.vmem [resolvable:$true] %s3917_s3 }
  0x3d   :  { %v714_v40 = vld [vmem:[#allocation10 + $0x5a0] sm:$0xff]  ;;  %835 = vmatpush.msrb.mxu2 %v634_v38  ;;  %430 = vmatpush.msra.mxu1 %v399_v39  ;;  %v583_v36 = vld [vmem:[#allocation10 + $0x188] sm:$0xff] }
  0x3e   :  { %v562_v41 = vld [vmem:[#allocation10 + $0xe0] sm:$0xff]  ;;  %851 = vmatpush.msrb.mxu0 %v714_v40  ;;  %v643_v38 = vld [vmem:[#allocation10 + $0x368] sm:$0xff] }
  0x3f   :  { %v630_v42 = vld [vmem:[#allocation10 + $0x300] sm:$0xff]  ;;  %817 = vmatpush.msra.mxu3 %v562_v41  ;;  %431 = vmatpush.msra.mxu1 %v398_v43  ;;  %v723_v39 = vld [vmem:[#allocation10 + $0x5e8] sm:$0xff] }
  0x40   :  { %v710_v44 = vld [vmem:[#allocation10 + $0x580] sm:$0xff]  ;;  %836 = vmatpush.msrb.mxu2 %v630_v42  ;;  %3970 = vmatmul.msk.f32.gmra.mxu0 %vm176_vm1, %v165_v45  ;;  %v579_v40 = vld [vmem:[#allocation10 + $0x168] sm:$0xff] }
  0x41   :  { %v558_v46 = vld [vmem:[#allocation10 + $0xc0] sm:$0xff]  ;;  %852 = vmatpush.msrb.mxu0 %v710_v44  ;;  %v639_v43 = vld [vmem:[#allocation10 + $0x348] sm:$0xff] }
  0x42   :  { %v397_v47 = vld [vmem:[#allocation7 + $0x10] sm:$0xff]  ;;  %v396_v51 = vld [vmem:[#allocation7 + $0x8] sm:$0xff]  ;;  %818 = vmatpush.msra.mxu3 %v558_v46 }
  0x43   :  { %v706_v48 = vld [vmem:[#allocation10 + $0x560] sm:$0xff]  ;;  %432 = vmatpush.msra.mxu1 %v397_v47  ;;  %v719_v44 = vld [vmem:[#allocation10 + $0x5c8] sm:$0xff] }
  0x44   :  { %v626_v49 = vld [vmem:[#allocation10 + $0x2e0] sm:$0xff]  ;;  %853 = vmatpush.msrb.mxu0 %v706_v48  ;;  %v4482_v46 = vld [vmem:[%s5116_s6 + $0x20] sm:$0xff] }
  0x45   :  { %v554_v50 = vld [vmem:[#allocation10 + $0xa0] sm:$0xff]  ;;  %837 = vmatpush.msrb.mxu2 %v626_v49  ;;  %433 = vmatpush.msra.mxu1 %v396_v51  ;;  %v575_v47 = vld [vmem:[#allocation10 + $0x148] sm:$0xff] }
  0x46   :  { %v702_v52 = vld [vmem:[#allocation10 + $0x540] sm:$0xff]  ;;  %819 = vmatpush.msra.mxu3 %v554_v50  ;;  %v635_v48 = vld [vmem:[#allocation10 + $0x328] sm:$0xff] }
  0x47   :  { %v622_v53 = vld [vmem:[#allocation10 + $0x2c0] sm:$0xff]  ;;  %854 = vmatpush.msrb.mxu0 %v702_v52  ;;  %434 = vmatpush.msra.mxu1 %v395_v55  ;;  %v715_v50 = vld [vmem:[#allocation10 + $0x5a8] sm:$0xff] }
  0x48   :  { %v550_v54 = vld [vmem:[#allocation10 + $0x80] sm:$0xff]  ;;  %838 = vmatpush.msrb.mxu2 %v622_v53  ;;  %3971 = vmatmul.msk.f32.gmra.mxu0 %vm176_vm1, %v166_v19  ;;  %v571_v51 = vld [vmem:[#allocation10 + $0x128] sm:$0xff] }
  0x49   :  { %v698_v56 = vld [vmem:[#allocation10 + $0x520] sm:$0xff]  ;;  %820 = vmatpush.msra.mxu3 %v550_v54  ;;  %435 = vmatmul.f32.vlgmr.msra.gmra.mxu1 %v393_v35  ;;  %v631_v52 = vld [vmem:[#allocation10 + $0x308] sm:$0xff] }
  0x4a   :  { %v786_v57 = vld [vmem:[#allocation10 + $0x7e0] sm:$0xff]  ;;  %855 = vmatpush.msrb.mxu0 %v698_v56  ;;  %v711_v54 = vld [vmem:[#allocation10 + $0x588] sm:$0xff] }
  0x4b   :  { %v618_v58 = vld [vmem:[#allocation10 + $0x2a0] sm:$0xff]  ;;  %869 = vmatpush.msrb.mxu1 %v786_v57  ;;  %v567_v56 = vld [vmem:[#allocation10 + $0x108] sm:$0xff] }
  0x4c   :  { %v546_v59 = vld [vmem:[#allocation10 + $0x60] sm:$0xff]  ;;  %839 = vmatpush.msrb.mxu2 %v618_v58  ;;  %v787_v57 = vld [vmem:[#allocation10 + $0x7e8] sm:$0xff] }
  0x4d   :  { %v694_v60 = vld [vmem:[#allocation10 + $0x500] sm:$0xff]  ;;  %821 = vmatpush.msra.mxu3 %v546_v59  ;;  %v627_v58 = vld [vmem:[#allocation10 + $0x2e8] sm:$0xff] }
  0x4e   :  { %v782_v61 = vld [vmem:[#allocation10 + $0x7c0] sm:$0xff]  ;;  %856 = vmatpush.msrb.mxu0 %v694_v60  ;;  %v707_v59 = vld [vmem:[#allocation10 + $0x568] sm:$0xff] }
  0x4f   :  { %v614_v62 = vld [vmem:[#allocation10 + $0x280] sm:$0xff]  ;;  %870 = vmatpush.msrb.mxu1 %v782_v61  ;;  %v563_v60 = vld [vmem:[#allocation10 + $0xe8] sm:$0xff] }
  0x50   :  { %v542_v0 = vld [vmem:[#allocation10 + $0x40] sm:$0xff]  ;;  %840 = vmatpush.msrb.mxu2 %v614_v62  ;;  %v783_v61 = vld [vmem:[#allocation10 + $0x7c8] sm:$0xff] }
  0x51   :  { %v778_v1 = vld [vmem:[#allocation10 + $0x7a0] sm:$0xff]  ;;  %822 = vmatpush.msra.mxu3 %v542_v0  ;;  %v623_v62 = vld [vmem:[#allocation10 + $0x2c8] sm:$0xff] }
  0x52   :  { %v690_v2 = vld [vmem:[#allocation10 + $0x4e0] sm:$0xff]  ;;  %871 = vmatpush.msrb.mxu1 %v778_v1  ;;  %v703_v63 = vld [vmem:[#allocation10 + $0x548] sm:$0xff] }
  0x53   :  { %v610_v3 = vld [vmem:[#allocation10 + $0x260] sm:$0xff]  ;;  %857 = vmatpush.msrb.mxu0 %v690_v2  ;;  %v559_v0 = vld [vmem:[#allocation10 + $0xc8] sm:$0xff] }
  0x54   :  { %v538_v4 = vld [vmem:[#allocation10 + $0x20] sm:$0xff]  ;;  %841 = vmatpush.msrb.mxu2 %v610_v3  ;;  %v779_v1 = vld [vmem:[#allocation10 + $0x7a8] sm:$0xff] }
  0x55   :  { %v774_v5 = vld [vmem:[#allocation10 + $0x780] sm:$0xff]  ;;  %823 = vmatpush.msra.mxu3 %v538_v4  ;;  %v619_v2 = vld [vmem:[#allocation10 + $0x2a8] sm:$0xff] }
  0x56   :  { %v686_v6 = vld [vmem:[#allocation10 + $0x4c0] sm:$0xff]  ;;  %872 = vmatpush.msrb.mxu1 %v774_v5  ;;  %v699_v3 = vld [vmem:[#allocation10 + $0x528] sm:$0xff] }
  0x57   :  { %v606_v7 = vld [vmem:[#allocation10 + $0x240] sm:$0xff]  ;;  %858 = vmatpush.msrb.mxu0 %v686_v6  ;;  %v555_v4 = vld [vmem:[#allocation10 + $0xa8] sm:$0xff] }
  0x58   :  { %v534_v8 = vld [vmem:[#allocation10] sm:$0xff]  ;;  %842 = vmatpush.msrb.mxu2 %v606_v7  ;;  %v775_v5 = vld [vmem:[#allocation10 + $0x788] sm:$0xff] }
  0x59   :  { %v770_v9 = vld [vmem:[#allocation10 + $0x760] sm:$0xff]  ;;  %824 = vmatpush.msra.mxu3 %v534_v8  ;;  %v615_v6 = vld [vmem:[#allocation10 + $0x288] sm:$0xff] }
  0x5a   :  { %v682_v10 = vld [vmem:[#allocation10 + $0x4a0] sm:$0xff]  ;;  %873 = vmatpush.msrb.mxu1 %v770_v9  ;;  %825 = vmatmul.f32.vlgmr.msra.gmra.mxu3 %v4457_v14  ;;  %v695_v7 = vld [vmem:[#allocation10 + $0x508] sm:$0xff] }
  0x5b   :  { %v602_v11 = vld [vmem:[#allocation10 + $0x220] sm:$0xff]  ;;  %859 = vmatpush.msrb.mxu0 %v682_v10  ;;  %v551_v8 = vld [vmem:[#allocation10 + $0x88] sm:$0xff] }
  0x5c   :  { %v790_v12 = vld [vmem:[#allocation10 + $0x800] sm:$0x3]  ;;  %843 = vmatpush.msrb.mxu2 %v602_v11  ;;  %v4490_v55 = vld [vmem:[%s5116_s6 + $0x18] sm:$0xff] }
  0x5d   :  { %v766_v13 = vld [vmem:[#allocation10 + $0x740] sm:$0xff]  ;;  %3975 = vmatpush.msk.msrb.mxu3 %vm186_vm0, %v790_v12  ;;  %v771_v9 = vld [vmem:[#allocation10 + $0x768] sm:$0xff] }
  0x5e   :  { %v678_v15 = vld [vmem:[#allocation10 + $0x480] sm:$0xff]  ;;  %874 = vmatpush.msrb.mxu1 %v766_v13  ;;  %v611_v10 = vld [vmem:[#allocation10 + $0x268] sm:$0xff] }
  0x5f   :  { %v762_v17 = vld [vmem:[#allocation10 + $0x720] sm:$0xff]  ;;  %860 = vmatpush.msrb.mxu0 %v678_v15  ;;  %929 = vmatpush.msra.mxu3 %v659_v16  ;;  %v691_v11 = vld [vmem:[#allocation10 + $0x4e8] sm:$0xff] }
  0x60   :  { %v598_v18 = vld [vmem:[#allocation10 + $0x200] sm:$0xff]  ;;  %875 = vmatpush.msrb.mxu1 %v762_v17  ;;  %v547_v12 = vld [vmem:[#allocation10 + $0x68] sm:$0xff] }
  0x61   :  { %v758_v21 = vld [vmem:[#allocation10 + $0x700] sm:$0xff]  ;;  %844 = vmatpush.msrb.mxu2 %v598_v18  ;;  %930 = vmatpush.msra.mxu3 %v655_v24  ;;  %v767_v13 = vld [vmem:[#allocation10 + $0x748] sm:$0xff] }
  0x62   :  { %v674_v22 = vld [vmem:[#allocation10 + $0x460] sm:$0xff]  ;;  %845 = vmatmul.f32.vlgmr.msrb.gmra.mxu2 %v4467_v20  ;;  %876 = vmatpush.msrb.mxu1 %v758_v21  ;;  %v607_v15 = vld [vmem:[#allocation10 + $0x248] sm:$0xff] }
  0x63   :  { %v754_v25 = vld [vmem:[#allocation10 + $0x6e0] sm:$0xff]  ;;  %861 = vmatpush.msrb.mxu0 %v674_v22  ;;  %909 = vmatpush.msra.mxu2 %v595_v23  ;;  %v687_v16 = vld [vmem:[#allocation10 + $0x4c8] sm:$0xff] }
  0x64   :  { %v670_v26 = vld [vmem:[#allocation10 + $0x440] sm:$0xff]  ;;  %877 = vmatpush.msrb.mxu1 %v754_v25  ;;  %931 = vmatpush.msra.mxu3 %v651_v28  ;;  %v543_v17 = vld [vmem:[#allocation10 + $0x48] sm:$0xff] }
  0x65   :  { %v750_v29 = vld [vmem:[#allocation10 + $0x6c0] sm:$0xff]  ;;  %862 = vmatpush.msrb.mxu0 %v670_v26  ;;  %910 = vmatpush.msra.mxu2 %v591_v27  ;;  %v763_v18 = vld [vmem:[#allocation10 + $0x728] sm:$0xff]  ;;  %v596_v26 = vld [vmem:[#allocation10 + $0x1f0] sm:$0xff] }
  0x66   :  { %v666_v30 = vld [vmem:[#allocation10 + $0x420] sm:$0xff]  ;;  %878 = vmatpush.msrb.mxu1 %v750_v29  ;;  %932 = vmatpush.msra.mxu3 %v647_v32  ;;  %v603_v19 = vld [vmem:[#allocation10 + $0x228] sm:$0xff]  ;;  %v592_v32 = vld [vmem:[#allocation10 + $0x1d0] sm:$0xff] }
  0x67   :  { %v746_v33 = vld [vmem:[#allocation10 + $0x6a0] sm:$0xff]  ;;  %863 = vmatpush.msrb.mxu0 %v666_v30  ;;  %911 = vmatpush.msra.mxu2 %v587_v31  ;;  %v683_v21 = vld [vmem:[#allocation10 + $0x4a8] sm:$0xff] }
  0x68   :  { %v662_v34 = vld [vmem:[#allocation10 + $0x400] sm:$0xff]  ;;  %879 = vmatpush.msrb.mxu1 %v746_v33  ;;  %933 = vmatpush.msra.mxu3 %v643_v38  ;;  %v539_v22 = vld [vmem:[#allocation10 + $0x28] sm:$0xff]  ;;  %v656_v38 = vld [vmem:[#allocation10 + $0x3d0] sm:$0xff] }
  0x69   :  { %v742_v37 = vld [vmem:[#allocation10 + $0x680] sm:$0xff]  ;;  %864 = vmatpush.msrb.mxu0 %v662_v34  ;;  %912 = vmatpush.msra.mxu2 %v583_v36  ;;  %v759_v23 = vld [vmem:[#allocation10 + $0x708] sm:$0xff]  ;;  %v660_v34 = vld [vmem:[#allocation10 + $0x3f0] sm:$0xff] }
  0x6a   :  { %v738_v41 = vld [vmem:[#allocation10 + $0x660] sm:$0xff]  ;;  %880 = vmatpush.msrb.mxu1 %v742_v37  ;;  %934 = vmatpush.msra.mxu3 %v639_v43  ;;  %v599_v24 = vld [vmem:[#allocation10 + $0x208] sm:$0xff]  ;;  %v588_v36 = vld [vmem:[#allocation10 + $0x1b0] sm:$0xff] }
  0x6b   :  { %v4477_v42 = vld [vmem:[%s5116_s6 + $0x10] sm:$0xff]  ;;  %949 = vmatpush.msra.mxu0 %v723_v39  ;;  %913 = vmatpush.msra.mxu2 %v579_v40  ;;  %v679_v25 = vld [vmem:[#allocation10 + $0x488] sm:$0xff]  ;;  %v584_v40 = vld [vmem:[#allocation10 + $0x190] sm:$0xff]  ;;  %s4325_s6 = smov 48  }
  0x6c   :  { %v734_v45 = vld [vmem:[#allocation10 + $0x640] sm:$0xff]  ;;  %881 = vmatpush.msrb.mxu1 %v738_v41  ;;  %865 = vmatmul.f32.vlgmr.msrb.gmra.mxu0 %v4477_v42  ;;  %v755_v27 = vld [vmem:[#allocation10 + $0x6e8] sm:$0xff]  ;;  %v652_v41 = vld [vmem:[#allocation10 + $0x3b0] sm:$0xff] }
  0x6d   :  { %950 = vmatpush.msra.mxu0 %v719_v44  ;;  %v730_v49 = vld [vmem:[#allocation10 + $0x620] sm:$0xff]  ;;  %3976 = vmatmul.msk.f32.vlgmr.msrb.gmra.mxu3 %vm412_vm2, %v4482_v46  ;;  %v535_v28 = vld [vmem:[#allocation10 + $0x8] sm:$0xff] }
  0x6e   :  { %882 = vmatpush.msrb.mxu1 %v734_v45  ;;  %914 = vmatpush.msra.mxu2 %v575_v47  ;;  %v726_v53 = vld [vmem:[#allocation10 + $0x600] sm:$0xff]  ;;  %v675_v29 = vld [vmem:[#allocation10 + $0x468] sm:$0xff]  ;;  %v580_v45 = vld [vmem:[#allocation10 + $0x170] sm:$0xff] }
  0x6f   :  { %935 = vmatpush.msra.mxu3 %v635_v48  ;;  %951 = vmatpush.msra.mxu0 %v715_v50  ;;  %v791_v30 = vld [vmem:[#allocation10 + $0x808] sm:$0x3]  ;;  %v648_v47 = vld [vmem:[#allocation10 + $0x390] sm:$0xff] }
  0x70   :  { %883 = vmatpush.msrb.mxu1 %v730_v49  ;;  %915 = vmatpush.msra.mxu2 %v571_v51  ;;  %v751_v31 = vld [vmem:[#allocation10 + $0x6c8] sm:$0xff]  ;;  %v724_v48 = vld [vmem:[#allocation10 + $0x5f0] sm:$0xff] }
  0x71   :  { %936 = vmatpush.msra.mxu3 %v631_v52  ;;  %952 = vmatpush.msra.mxu0 %v711_v54  ;;  %v671_v33 = vld [vmem:[#allocation10 + $0x448] sm:$0xff]  ;;  %v576_v50 = vld [vmem:[#allocation10 + $0x150] sm:$0xff] }
  0x72   :  { %884 = vmatpush.msrb.mxu1 %v726_v53  ;;  %916 = vmatpush.msra.mxu2 %v567_v56  ;;  %v747_v35 = vld [vmem:[#allocation10 + $0x6a8] sm:$0xff]  ;;  %v644_v51 = vld [vmem:[#allocation10 + $0x370] sm:$0xff] }
  0x73   :  { %885 = vmatmul.f32.vlgmr.msrb.gmra.mxu1 %v4490_v55  ;;  %937 = vmatpush.msra.mxu3 %v627_v58  ;;  %v667_v37 = vld [vmem:[#allocation10 + $0x428] sm:$0xff]  ;;  %v720_v52 = vld [vmem:[#allocation10 + $0x5d0] sm:$0xff] }
  0x74   :  { %969 = vmatpush.msra.mxu1 %v787_v57  ;;  %953 = vmatpush.msra.mxu0 %v707_v59  ;;  %v743_v39 = vld [vmem:[#allocation10 + $0x688] sm:$0xff]  ;;  %v572_v54 = vld [vmem:[#allocation10 + $0x130] sm:$0xff] }
  0x75   :  { %917 = vmatpush.msra.mxu2 %v563_v60  ;;  %938 = vmatpush.msra.mxu3 %v623_v62  ;;  %v663_v43 = vld [vmem:[#allocation10 + $0x408] sm:$0xff]  ;;  %v640_v56 = vld [vmem:[#allocation10 + $0x350] sm:$0xff] }
  0x76   :  { %970 = vmatpush.msra.mxu1 %v783_v61  ;;  %954 = vmatpush.msra.mxu0 %v703_v63  ;;  %v739_v44 = vld [vmem:[#allocation10 + $0x668] sm:$0xff]  ;;  %v716_v57 = vld [vmem:[#allocation10 + $0x5b0] sm:$0xff] }
  0x77   :  { %918 = vmatpush.msra.mxu2 %v559_v0  ;;  %939 = vmatpush.msra.mxu3 %v619_v2  ;;  %v735_v49 = vld [vmem:[#allocation10 + $0x648] sm:$0xff]  ;;  %v568_v59 = vld [vmem:[#allocation10 + $0x110] sm:$0xff] }
  0x78   :  { %971 = vmatpush.msra.mxu1 %v779_v1  ;;  %955 = vmatpush.msra.mxu0 %v699_v3  ;;  %v731_v53 = vld [vmem:[#allocation10 + $0x628] sm:$0xff]  ;;  %v636_v60 = vld [vmem:[#allocation10 + $0x330] sm:$0xff] }
  0x79   :  { %919 = vmatpush.msra.mxu2 %v555_v4  ;;  %940 = vmatpush.msra.mxu3 %v615_v6  ;;  %v727_v58 = vld [vmem:[#allocation10 + $0x608] sm:$0xff]  ;;  %v712_v61 = vld [vmem:[#allocation10 + $0x590] sm:$0xff] }
  0x7a   :  { %972 = vmatpush.msra.mxu1 %v775_v5  ;;  %956 = vmatpush.msra.mxu0 %v695_v7  ;;  %v788_v62 = vld [vmem:[#allocation10 + $0x7f0] sm:$0xff] }
  0x7b   :  { %920 = vmatpush.msra.mxu2 %v551_v8  ;;  %941 = vmatpush.msra.mxu3 %v611_v10  ;;  %v564_v63 = vld [vmem:[#allocation10 + $0xf0] sm:$0xff] }
  0x7c   :  { %973 = vmatpush.msra.mxu1 %v771_v9  ;;  %957 = vmatpush.msra.mxu0 %v691_v11  ;;  %v632_v0 = vld [vmem:[#allocation10 + $0x310] sm:$0xff] }
  0x7d   :  { %921 = vmatpush.msra.mxu2 %v547_v12  ;;  %942 = vmatpush.msra.mxu3 %v607_v15  ;;  %v708_v1 = vld [vmem:[#allocation10 + $0x570] sm:$0xff] }
  0x7e   :  { %974 = vmatpush.msra.mxu1 %v767_v13  ;;  %958 = vmatpush.msra.mxu0 %v687_v16  ;;  %v784_v2 = vld [vmem:[#allocation10 + $0x7d0] sm:$0xff] }
  0x7f   :  { %922 = vmatpush.msra.mxu2 %v543_v17  ;;  %943 = vmatpush.msra.mxu3 %v603_v19  ;;  %v560_v3 = vld [vmem:[#allocation10 + $0xd0] sm:$0xff] }
  0x80   :  { %975 = vmatpush.msra.mxu1 %v763_v18  ;;  %959 = vmatpush.msra.mxu0 %v683_v21  ;;  %v628_v4 = vld [vmem:[#allocation10 + $0x2f0] sm:$0xff] }
  0x81   :  { %923 = vmatpush.msra.mxu2 %v539_v22  ;;  %944 = vmatpush.msra.mxu3 %v599_v24  ;;  %v704_v5 = vld [vmem:[#allocation10 + $0x550] sm:$0xff] }
  0x82   :  { %976 = vmatpush.msra.mxu1 %v759_v23  ;;  %960 = vmatpush.msra.mxu0 %v679_v25  ;;  %v780_v6 = vld [vmem:[#allocation10 + $0x7b0] sm:$0xff] }
  0x83   :  { %1009 = vmatpush.msrb.mxu3 %v596_v26  ;;  %924 = vmatpush.msra.mxu2 %v535_v28  ;;  %v556_v7 = vld [vmem:[#allocation10 + $0xb0] sm:$0xff] }
  0x84   :  { %977 = vmatpush.msra.mxu1 %v755_v27  ;;  %961 = vmatpush.msra.mxu0 %v675_v29  ;;  %v624_v8 = vld [vmem:[#allocation10 + $0x2d0] sm:$0xff] }
  0x85   :  { %3977 = vmatpush.msk.msrb.mxu2 %vm186_vm0, %v791_v30  ;;  %1010 = vmatpush.msrb.mxu3 %v592_v32  ;;  %v700_v9 = vld [vmem:[#allocation10 + $0x530] sm:$0xff] }
  0x86   :  { %978 = vmatpush.msra.mxu1 %v751_v31  ;;  %925 = vmatmul.f32.vlgmr.msra.gmra.mxu2 %v4457_v14  ;;  %v776_v10 = vld [vmem:[#allocation10 + $0x790] sm:$0xff] }
  0x87   :  { %962 = vmatpush.msra.mxu0 %v671_v33  ;;  %1029 = vmatpush.msra.mxu2 %v660_v34  ;;  %v552_v11 = vld [vmem:[#allocation10 + $0x90] sm:$0xff] }
  0x88   :  { %979 = vmatpush.msra.mxu1 %v747_v35  ;;  %1011 = vmatpush.msrb.mxu3 %v588_v36  ;;  %v620_v12 = vld [vmem:[#allocation10 + $0x2b0] sm:$0xff]  ;;  %v661_v36 = vld [vmem:[#allocation10 + $0x3f8] sm:$0xff] }
  0x89   :  { %963 = vmatpush.msra.mxu0 %v667_v37  ;;  %1030 = vmatpush.msra.mxu2 %v656_v38  ;;  %v696_v13 = vld [vmem:[#allocation10 + $0x510] sm:$0xff] }
  0x8a   :  { %945 = vmatmul.f32.vlgmr.msra.gmra.mxu3 %v4467_v20  ;;  %980 = vmatpush.msra.mxu1 %v743_v39  ;;  %v772_v15 = vld [vmem:[#allocation10 + $0x770] sm:$0xff]  ;;  %v597_v39 = vld [vmem:[#allocation10 + $0x1f8] sm:$0xff] }
  0x8b   :  { %1012 = vmatpush.msrb.mxu3 %v584_v40  ;;  %1031 = vmatpush.msra.mxu2 %v652_v41  ;;  %v548_v16 = vld [vmem:[#allocation10 + $0x70] sm:$0xff]  ;;  %v657_v40 = vld [vmem:[#allocation10 + $0x3d8] sm:$0xff] }
  0x8c   :  { %964 = vmatpush.msra.mxu0 %v663_v43  ;;  %981 = vmatpush.msra.mxu1 %v739_v44  ;;  %v616_v17 = vld [vmem:[#allocation10 + $0x290] sm:$0xff]  ;;  %v593_v44 = vld [vmem:[#allocation10 + $0x1d8] sm:$0xff] }
  0x8d   :  { %1013 = vmatpush.msrb.mxu3 %v580_v45  ;;  %1032 = vmatpush.msra.mxu2 %v648_v47  ;;  %v692_v18 = vld [vmem:[#allocation10 + $0x4f0] sm:$0xff]  ;;  %v653_v45 = vld [vmem:[#allocation10 + $0x3b8] sm:$0xff] }
  0x8e   :  { %1049 = vmatpush.msrb.mxu0 %v724_v48  ;;  %982 = vmatpush.msra.mxu1 %v735_v49  ;;  %v768_v19 = vld [vmem:[#allocation10 + $0x750] sm:$0xff]  ;;  %v589_v49 = vld [vmem:[#allocation10 + $0x1b8] sm:$0xff] }
  0x8f   :  { %1014 = vmatpush.msrb.mxu3 %v576_v50  ;;  %1033 = vmatpush.msra.mxu2 %v644_v51  ;;  %v544_v21 = vld [vmem:[#allocation10 + $0x50] sm:$0xff]  ;;  %v649_v50 = vld [vmem:[#allocation10 + $0x398] sm:$0xff] }
  0x90   :  { %1050 = vmatpush.msrb.mxu0 %v720_v52  ;;  %983 = vmatpush.msra.mxu1 %v731_v53  ;;  %v612_v22 = vld [vmem:[#allocation10 + $0x270] sm:$0xff]  ;;  %v725_v52 = vld [vmem:[#allocation10 + $0x5f8] sm:$0xff] }
  0x91   :  { %3978 = vmatmul.msk.f32.vlgmr.msrb.gmra.mxu2 %vm412_vm2, %v4482_v46  ;;  %1015 = vmatpush.msrb.mxu3 %v572_v54  ;;  %v688_v23 = vld [vmem:[#allocation10 + $0x4d0] sm:$0xff]  ;;  %v585_v53 = vld [vmem:[#allocation10 + $0x198] sm:$0xff] }
  0x92   :  { %1034 = vmatpush.msra.mxu2 %v640_v56  ;;  %1051 = vmatpush.msrb.mxu0 %v716_v57  ;;  %v764_v24 = vld [vmem:[#allocation10 + $0x730] sm:$0xff]  ;;  %v645_v54 = vld [vmem:[#allocation10 + $0x378] sm:$0xff] }
  0x93   :  { %984 = vmatpush.msra.mxu1 %v727_v58  ;;  %965 = vmatmul.f32.vlgmr.msra.gmra.mxu0 %v4477_v42  ;;  %v540_v25 = vld [vmem:[#allocation10 + $0x30] sm:$0xff]  ;;  %v581_v57 = vld [vmem:[#allocation10 + $0x178] sm:$0xff] }
  0x94   :  { %1016 = vmatpush.msrb.mxu3 %v568_v59  ;;  %1035 = vmatpush.msra.mxu2 %v636_v60  ;;  %v608_v26 = vld [vmem:[#allocation10 + $0x250] sm:$0xff]  ;;  %v641_v58 = vld [vmem:[#allocation10 + $0x358] sm:$0xff] }
  0x95   :  { %1052 = vmatpush.msrb.mxu0 %v712_v61  ;;  %1069 = vmatpush.msrb.mxu1 %v788_v62  ;;  %v684_v27 = vld [vmem:[#allocation10 + $0x4b0] sm:$0xff]  ;;  %v721_v59 = vld [vmem:[#allocation10 + $0x5d8] sm:$0xff] }
  0x96   :  { %1017 = vmatpush.msrb.mxu3 %v564_v63  ;;  %985 = vmatmul.f32.vlgmr.msra.gmra.mxu1 %v4490_v55  ;;  %v760_v28 = vld [vmem:[#allocation10 + $0x710] sm:$0xff]  ;;  %v577_v61 = vld [vmem:[#allocation10 + $0x158] sm:$0xff] }
  0x97   :  { %1036 = vmatpush.msra.mxu2 %v632_v0  ;;  %1053 = vmatpush.msrb.mxu0 %v708_v1  ;;  %v536_v29 = vld [vmem:[#allocation10 + $0x10] sm:$0xff]  ;;  %v637_v62 = vld [vmem:[#allocation10 + $0x338] sm:$0xff] }
  0x98   :  { %1070 = vmatpush.msrb.mxu1 %v784_v2  ;;  %1018 = vmatpush.msrb.mxu3 %v560_v3  ;;  %v604_v30 = vld [vmem:[#allocation10 + $0x230] sm:$0xff]  ;;  %v717_v63 = vld [vmem:[#allocation10 + $0x5b8] sm:$0xff] }
  0x99   :  { %1037 = vmatpush.msra.mxu2 %v628_v4  ;;  %1054 = vmatpush.msrb.mxu0 %v704_v5  ;;  %v680_v31 = vld [vmem:[#allocation10 + $0x490] sm:$0xff]  ;;  %v573_v1 = vld [vmem:[#allocation10 + $0x138] sm:$0xff] }
  0x9a   :  { %1071 = vmatpush.msrb.mxu1 %v780_v6  ;;  %1019 = vmatpush.msrb.mxu3 %v556_v7  ;;  %v756_v32 = vld [vmem:[#allocation10 + $0x6f0] sm:$0xff]  ;;  %v633_v2 = vld [vmem:[#allocation10 + $0x318] sm:$0xff] }
  0x9b   :  { %1038 = vmatpush.msra.mxu2 %v624_v8  ;;  %1055 = vmatpush.msrb.mxu0 %v700_v9  ;;  %v792_v33 = vld [vmem:[#allocation10 + $0x810] sm:$0x3]  ;;  %v713_v3 = vld [vmem:[#allocation10 + $0x598] sm:$0xff] }
  0x9c   :  { %1072 = vmatpush.msrb.mxu1 %v776_v10  ;;  %1020 = vmatpush.msrb.mxu3 %v552_v11  ;;  %v600_v34 = vld [vmem:[#allocation10 + $0x210] sm:$0xff]  ;;  %v789_v4 = vld [vmem:[#allocation10 + $0x7f8] sm:$0xff] }
  0x9d   :  { %1039 = vmatpush.msra.mxu2 %v620_v12  ;;  %1056 = vmatpush.msrb.mxu0 %v696_v13  ;;  %v676_v35 = vld [vmem:[#allocation10 + $0x470] sm:$0xff]  ;;  %v569_v5 = vld [vmem:[#allocation10 + $0x118] sm:$0xff] }
  0x9e   :  { %1073 = vmatpush.msrb.mxu1 %v772_v15  ;;  %1021 = vmatpush.msrb.mxu3 %v548_v16  ;;  %v752_v37 = vld [vmem:[#allocation10 + $0x6d0] sm:$0xff]  ;;  %v629_v6 = vld [vmem:[#allocation10 + $0x2f8] sm:$0xff] }
  0x9f   :  { %1040 = vmatpush.msra.mxu2 %v616_v17  ;;  %1057 = vmatpush.msrb.mxu0 %v692_v18  ;;  %v672_v38 = vld [vmem:[#allocation10 + $0x450] sm:$0xff]  ;;  %v709_v7 = vld [vmem:[#allocation10 + $0x578] sm:$0xff] }
  0xa0   :  { %1074 = vmatpush.msrb.mxu1 %v768_v19  ;;  %1022 = vmatpush.msrb.mxu3 %v544_v21  ;;  %v748_v41 = vld [vmem:[#allocation10 + $0x6b0] sm:$0xff]  ;;  %v785_v8 = vld [vmem:[#allocation10 + $0x7d8] sm:$0xff] }
  0xa1   :  { %1041 = vmatpush.msra.mxu2 %v612_v22  ;;  %1058 = vmatpush.msrb.mxu0 %v688_v23  ;;  %v668_v43 = vld [vmem:[#allocation10 + $0x430] sm:$0xff]  ;;  %v565_v9 = vld [vmem:[#allocation10 + $0xf8] sm:$0xff] }
  0xa2   :  { %1075 = vmatpush.msrb.mxu1 %v764_v24  ;;  %1023 = vmatpush.msrb.mxu3 %v540_v25  ;;  %v744_v47 = vld [vmem:[#allocation10 + $0x690] sm:$0xff]  ;;  %v625_v10 = vld [vmem:[#allocation10 + $0x2d8] sm:$0xff] }
  0xa3   :  { %1042 = vmatpush.msra.mxu2 %v608_v26  ;;  %1059 = vmatpush.msrb.mxu0 %v684_v27  ;;  %v664_v48 = vld [vmem:[#allocation10 + $0x410] sm:$0xff]  ;;  %v705_v11 = vld [vmem:[#allocation10 + $0x558] sm:$0xff] }
  0xa4   :  { %1076 = vmatpush.msrb.mxu1 %v760_v28  ;;  %1024 = vmatpush.msrb.mxu3 %v536_v29  ;;  %v740_v51 = vld [vmem:[#allocation10 + $0x670] sm:$0xff]  ;;  %v781_v12 = vld [vmem:[#allocation10 + $0x7b8] sm:$0xff] }
  0xa5   :  { %1043 = vmatpush.msra.mxu2 %v604_v30  ;;  %1060 = vmatpush.msrb.mxu0 %v680_v31  ;;  %v736_v56 = vld [vmem:[#allocation10 + $0x650] sm:$0xff]  ;;  %v561_v13 = vld [vmem:[#allocation10 + $0xd8] sm:$0xff] }
  0xa6   :  { %1077 = vmatpush.msrb.mxu1 %v756_v32  ;;  %3979 = vmatpush.msk.msra.mxu3 %vm186_vm0, %v792_v33  ;;  %v732_v60 = vld [vmem:[#allocation10 + $0x630] sm:$0xff]  ;;  %v621_v15 = vld [vmem:[#allocation10 + $0x2b8] sm:$0xff] }
  0xa7   :  { %1044 = vmatpush.msra.mxu2 %v600_v34  ;;  %1025 = vmatmul.f32.vlgmr.msrb.gmra.mxu3 %v4457_v14  ;;  %v728_v0 = vld [vmem:[#allocation10 + $0x610] sm:$0xff]  ;;  %v701_v16 = vld [vmem:[#allocation10 + $0x538] sm:$0xff] }
  0xa8   :  { %1061 = vmatpush.msrb.mxu0 %v676_v35  ;;  %1129 = vmatpush.msrb.mxu3 %v661_v36  ;;  %v777_v17 = vld [vmem:[#allocation10 + $0x798] sm:$0xff] }
  0xa9   :  { %1078 = vmatpush.msrb.mxu1 %v752_v37  ;;  %1045 = vmatmul.f32.vlgmr.msra.gmra.mxu2 %v4467_v20  ;;  %v557_v18 = vld [vmem:[#allocation10 + $0xb8] sm:$0xff] }
  0xaa   :  { %1062 = vmatpush.msrb.mxu0 %v672_v38  ;;  %1109 = vmatpush.msrb.mxu2 %v597_v39  ;;  %v617_v19 = vld [vmem:[#allocation10 + $0x298] sm:$0xff]  ;;  %v1478_v39 = vld [vmem:[#allocation13 + $0x3c0] sm:$0xff] }
  0xab   :  { %1130 = vmatpush.msrb.mxu3 %v657_v40  ;;  %1079 = vmatpush.msrb.mxu1 %v748_v41  ;;  %v697_v21 = vld [vmem:[#allocation10 + $0x518] sm:$0xff] }
  0xac   :  { %1063 = vmatpush.msrb.mxu0 %v668_v43  ;;  %1110 = vmatpush.msrb.mxu2 %v593_v44  ;;  %v773_v22 = vld [vmem:[#allocation10 + $0x778] sm:$0xff] }
  0xad   :  { %1131 = vmatpush.msrb.mxu3 %v653_v45  ;;  %1080 = vmatpush.msrb.mxu1 %v744_v47  ;;  %v553_v23 = vld [vmem:[#allocation10 + $0x98] sm:$0xff]  ;;  %v1470_v45 = vld [vmem:[#allocation13 + $0x380] sm:$0xff] }
  0xae   :  { %1064 = vmatpush.msrb.mxu0 %v664_v48  ;;  %1111 = vmatpush.msrb.mxu2 %v589_v49  ;;  %v613_v24 = vld [vmem:[#allocation10 + $0x278] sm:$0xff] }
  0xaf   :  { %1132 = vmatpush.msrb.mxu3 %v649_v50  ;;  %1081 = vmatpush.msrb.mxu1 %v740_v51  ;;  %v693_v25 = vld [vmem:[#allocation10 + $0x4f8] sm:$0xff]  ;;  %v1462_v50 = vld [vmem:[#allocation13 + $0x340] sm:$0xff] }
  0xb0   :  { %1149 = vmatpush.msra.mxu0 %v725_v52  ;;  %1112 = vmatpush.msrb.mxu2 %v585_v53  ;;  %v769_v26 = vld [vmem:[#allocation10 + $0x758] sm:$0xff]  ;;  %v1734_v51 = vld [vmem:[#allocation13 + $0xbc0] sm:$0xff] }
  0xb1   :  { %1133 = vmatpush.msrb.mxu3 %v645_v54  ;;  %1082 = vmatpush.msrb.mxu1 %v736_v56  ;;  %v549_v27 = vld [vmem:[#allocation10 + $0x78] sm:$0xff] }
  0xb2   :  { %1065 = vmatmul.f32.vlgmr.msrb.gmra.mxu0 %v4477_v42  ;;  %3980 = vmatmul.msk.f32.vlgmr.msra.gmra.mxu3 %vm412_vm2, %v4482_v46  ;;  %v609_v28 = vld [vmem:[#allocation10 + $0x258] sm:$0xff] }
  0xb3   :  { %1113 = vmatpush.msrb.mxu2 %v581_v57  ;;  %1134 = vmatpush.msrb.mxu3 %v641_v58  ;;  %v689_v29 = vld [vmem:[#allocation10 + $0x4d8] sm:$0xff]  ;;  %v1454_v57 = vld [vmem:[#allocation13 + $0x300] sm:$0xff] }
  0xb4   :  { %1150 = vmatpush.msra.mxu0 %v721_v59  ;;  %1083 = vmatpush.msrb.mxu1 %v732_v60  ;;  %v765_v30 = vld [vmem:[#allocation10 + $0x738] sm:$0xff]  ;;  %v1726_v58 = vld [vmem:[#allocation13 + $0xb80] sm:$0xff] }
  0xb5   :  { %1114 = vmatpush.msrb.mxu2 %v577_v61  ;;  %1135 = vmatpush.msrb.mxu3 %v637_v62  ;;  %v545_v31 = vld [vmem:[#allocation10 + $0x58] sm:$0xff]  ;;  %v4507_v44 = vpop.f32.mrf.mxu0  ;;  %v1446_v61 = vld [vmem:[#allocation13 + $0x2c0] sm:$0xff] }
  0xb6   :  { %1151 = vmatpush.msra.mxu0 %v717_v63  ;;  %1084 = vmatpush.msrb.mxu1 %v728_v0  ;;  %v605_v32 = vld [vmem:[#allocation10 + $0x238] sm:$0xff]  ;;  %v237_v52 = vrot.slane %v4507_v44, 3  ;;  %v219_v53 = vrot.slane %v4507_v44, 1  ;;  %v228_v60 = vrot.slane %v4507_v44, 2  ;;  %v1718_v62 = vld [vmem:[#allocation13 + $0xb40] sm:$0xff] }
  0xb7   :  { %1115 = vmatpush.msrb.mxu2 %v573_v1  ;;  %1085 = vmatmul.f32.vlgmr.msrb.gmra.mxu1 %v4490_v55  ;;  %v685_v33 = vld [vmem:[#allocation10 + $0x4b8] sm:$0xff]  ;;  %v1438_v1 = vld [vmem:[#allocation13 + $0x280] sm:$0xff] }
  0xb8   :  { %1136 = vmatpush.msrb.mxu3 %v633_v2  ;;  %1152 = vmatpush.msra.mxu0 %v713_v3  ;;  %v761_v34 = vld [vmem:[#allocation10 + $0x718] sm:$0xff]  ;;  %v1598_v2 = vld [vmem:[#allocation13 + $0x780] sm:$0xff] }
  0xb9   :  { %1169 = vmatpush.msra.mxu1 %v789_v4  ;;  %1116 = vmatpush.msrb.mxu2 %v569_v5  ;;  %v541_v35 = vld [vmem:[#allocation10 + $0x38] sm:$0xff]  ;;  %v1710_v3 = vld [vmem:[#allocation13 + $0xb00] sm:$0xff] }
  0xba   :  { %1137 = vmatpush.msrb.mxu3 %v629_v6  ;;  %1153 = vmatpush.msra.mxu0 %v709_v7  ;;  %v601_v36 = vld [vmem:[#allocation10 + $0x218] sm:$0xff]  ;;  %v1430_v5 = vld [vmem:[#allocation13 + $0x240] sm:$0xff] }
  0xbb   :  { %1170 = vmatpush.msra.mxu1 %v785_v8  ;;  %1117 = vmatpush.msrb.mxu2 %v565_v9  ;;  %v681_v37 = vld [vmem:[#allocation10 + $0x498] sm:$0xff]  ;;  %v1590_v6 = vld [vmem:[#allocation13 + $0x740] sm:$0xff]  ;;  %v252_v8 = vrot.slane %v4507_v44, 5 }
  0xbc   :  { %1138 = vmatpush.msrb.mxu3 %v625_v10  ;;  %1154 = vmatpush.msra.mxu0 %v705_v11  ;;  %v757_v38 = vld [vmem:[#allocation10 + $0x6f8] sm:$0xff]  ;;  %v1702_v7 = vld [vmem:[#allocation13 + $0xac0] sm:$0xff] }
  0xbd   :  { %1171 = vmatpush.msra.mxu1 %v781_v12  ;;  %1118 = vmatpush.msrb.mxu2 %v561_v13  ;;  %v537_v40 = vld [vmem:[#allocation10 + $0x18] sm:$0xff]  ;;  %v4518_v0 = vpop.f32.mrf.mxu0  ;;  %v1422_v11 = vld [vmem:[#allocation13 + $0x200] sm:$0xff] }
  0xbe   :  { %1139 = vmatpush.msrb.mxu3 %v621_v15  ;;  %1155 = vmatpush.msra.mxu0 %v701_v16  ;;  %v677_v41 = vld [vmem:[#allocation10 + $0x478] sm:$0xff]  ;;  %v280_v9 = vrot.slane %v4518_v0, 2  ;;  %v1582_v12 = vld [vmem:[#allocation13 + $0x700] sm:$0xff]  ;;  %v246_v15 = vrot.slane %v4507_v44, 4 }
  0xbf   :  { %1172 = vmatpush.msra.mxu1 %v777_v17  ;;  %1119 = vmatpush.msrb.mxu2 %v557_v18  ;;  %v753_v43 = vld [vmem:[#allocation10 + $0x6d8] sm:$0xff]  ;;  %v1862_v13 = vld [vmem:[#allocation13 + $0xfc0] sm:$0xff] }
  0xc0   :  { %1140 = vmatpush.msrb.mxu3 %v617_v19  ;;  %1156 = vmatpush.msra.mxu0 %v697_v21  ;;  %v673_v47 = vld [vmem:[#allocation10 + $0x458] sm:$0xff]  ;;  %v1414_v16 = vld [vmem:[#allocation13 + $0x1c0] sm:$0xff] }
  0xc1   :  { %1173 = vmatpush.msra.mxu1 %v773_v22  ;;  %1120 = vmatpush.msrb.mxu2 %v553_v23  ;;  %v749_v48 = vld [vmem:[#allocation10 + $0x6b8] sm:$0xff]  ;;  %v1686_v17 = vld [vmem:[#allocation13 + $0xa40] sm:$0xff] }
  0xc2   :  { %1141 = vmatpush.msrb.mxu3 %v613_v24  ;;  %1157 = vmatpush.msra.mxu0 %v693_v25  ;;  %v793_v49 = vld [vmem:[#allocation10 + $0x818] sm:$0x3]  ;;  %v1854_v18 = vld [vmem:[#allocation13 + $0xf80] sm:$0xff] }
  0xc3   :  { %1174 = vmatpush.msra.mxu1 %v769_v26  ;;  %1121 = vmatpush.msrb.mxu2 %v549_v27  ;;  %v669_v54 = vld [vmem:[#allocation10 + $0x438] sm:$0xff]  ;;  %v1406_v19 = vld [vmem:[#allocation13 + $0x180] sm:$0xff]  ;;  %v305_v26 = vrot.slane %v4518_v0, 4 }
  0xc4   :  { %1142 = vmatpush.msrb.mxu3 %v609_v28  ;;  %1158 = vmatpush.msra.mxu0 %v689_v29  ;;  %v745_v56 = vld [vmem:[#allocation10 + $0x698] sm:$0xff]  ;;  %v1566_v21 = vld [vmem:[#allocation13 + $0x680] sm:$0xff]  ;;  %v294_v28 = vrot.slane %v4518_v0, 3 }
  0xc5   :  { %1175 = vmatpush.msra.mxu1 %v765_v30  ;;  %1122 = vmatpush.msrb.mxu2 %v545_v31  ;;  %v741_v59 = vld [vmem:[#allocation10 + $0x678] sm:$0xff]  ;;  %v1678_v22 = vld [vmem:[#allocation13 + $0xa00] sm:$0xff] }
  0xc6   :  { %1143 = vmatpush.msrb.mxu3 %v605_v32  ;;  %1159 = vmatpush.msra.mxu0 %v685_v33  ;;  %v737_v63 = vld [vmem:[#allocation10 + $0x658] sm:$0xff]  ;;  %v1846_v23 = vld [vmem:[#allocation13 + $0xf40] sm:$0xff]  ;;  %v316_v32 = vrot.slane %v4518_v0, 5 }
  0xc7   :  { %1176 = vmatpush.msra.mxu1 %v761_v34  ;;  %1123 = vmatpush.msrb.mxu2 %v541_v35  ;;  %v733_v4 = vld [vmem:[#allocation10 + $0x638] sm:$0xff]  ;;  %v1398_v24 = vld [vmem:[#allocation13 + $0x140] sm:$0xff] }
  0xc8   :  { %1144 = vmatpush.msrb.mxu3 %v601_v36  ;;  %1160 = vmatpush.msra.mxu0 %v681_v37  ;;  %v729_v10 = vld [vmem:[#allocation10 + $0x618] sm:$0xff]  ;;  %v1558_v25 = vld [vmem:[#allocation13 + $0x640] sm:$0xff] }
  0xc9   :  { %1177 = vmatpush.msra.mxu1 %v757_v38  ;;  %1124 = vmatpush.msrb.mxu2 %v537_v40  ;;  %v1838_v27 = vld [vmem:[#allocation13 + $0xf00] sm:$0xff] }
  0xca   :  { %2382 = vmatpush.msra.mxu3 %v1478_v39  ;;  %1161 = vmatpush.msra.mxu0 %v677_v41  ;;  %v1390_v29 = vld [vmem:[#allocation13 + $0x100] sm:$0xff] }
  0xcb   :  { %1178 = vmatpush.msra.mxu1 %v753_v43  ;;  %1125 = vmatmul.f32.vlgmr.msrb.gmra.mxu2 %v4457_v14  ;;  %v665_v14 = vld [vmem:[#allocation10 + $0x418] sm:$0xff]  ;;  %v1550_v30 = vld [vmem:[#allocation13 + $0x600] sm:$0xff] }
  0xcc   :  { %2383 = vmatpush.msra.mxu3 %v1470_v45  ;;  %1162 = vmatpush.msra.mxu0 %v673_v47  ;;  %v1662_v31 = vld [vmem:[#allocation13 + $0x980] sm:$0xff] }
  0xcd   :  { %1179 = vmatpush.msra.mxu1 %v749_v48  ;;  %3981 = vmatpush.msk.msra.mxu2 %vm186_vm0, %v793_v49  ;;  %v1830_v33 = vld [vmem:[#allocation13 + $0xec0] sm:$0xff]  ;;  %v326_v49 = vrot.slane %v4518_v0, 6 }
  0xce   :  { %1145 = vmatmul.f32.vlgmr.msrb.gmra.mxu3 %v4467_v20  ;;  %238 = vrot.lane.b32.xlu0 %v237_v52, %s4325_s6  ;;  %v1606_v20 = vld [vmem:[#allocation13 + $0x7c0] sm:$0xff] }
  0xcf   :  { %2384 = vmatpush.msra.mxu3 %v1462_v50  ;;  %2422 = vmatpush.msrb.mxu2 %v1734_v51  ;;  %v1382_v34 = vld [vmem:[#allocation13 + $0xc0] sm:$0xff]  ;;  %v340_v50 = vrot.slane %v4518_v0, 7 }
  0xd0   :  { %220 = vrot.lane.b32.xlu1 %v219_v53, %s4326_s21  ;;  %1163 = vmatpush.msra.mxu0 %v669_v54  ;;  %v1542_v35 = vld [vmem:[#allocation13 + $0x5c0] sm:$0xff] }
  0xd1   :  { %1180 = vmatpush.msra.mxu1 %v745_v56  ;;  %2385 = vmatpush.msra.mxu3 %v1454_v57  ;;  %v1654_v36 = vld [vmem:[#allocation13 + $0x940] sm:$0xff]  ;;  %v260_v56 = vrot.slane %v4507_v44, 6 }
  0xd2   :  { %2423 = vmatpush.msrb.mxu2 %v1726_v58  ;;  %1164 = vmatpush.msra.mxu0 %v665_v14  ;;  %v1822_v37 = vld [vmem:[#allocation13 + $0xe80] sm:$0xff] }
  0xd3   :  { %1181 = vmatpush.msra.mxu1 %v741_v59  ;;  %229 = vrot.lane.b32.xlu2 %v228_v60, %s4320_s16  ;;  %v1374_v38 = vld [vmem:[#allocation13 + $0x80] sm:$0xff] }
  0xd4   :  { %2386 = vmatpush.msra.mxu3 %v1446_v61  ;;  %2402 = vmatpush.msrb.mxu0 %v1606_v20  ;;  %v1534_v39 = vld [vmem:[#allocation13 + $0x580] sm:$0xff] }
  0xd5   :  { %2424 = vmatpush.msrb.mxu2 %v1718_v62  ;;  %1182 = vmatpush.msra.mxu1 %v737_v63  ;;  %v1646_v40 = vld [vmem:[#allocation13 + $0x900] sm:$0xff] }
  0xd6   :  { %3982 = vmatmul.msk.f32.vlgmr.msra.gmra.mxu2 %vm412_vm2, %v4482_v46  ;;  %2387 = vmatpush.msra.mxu3 %v1438_v1  ;;  %v1694_v46 = vld [vmem:[#allocation13 + $0xa80] sm:$0xff] }
  0xd7   :  { %2403 = vmatpush.msrb.mxu0 %v1598_v2  ;;  %2425 = vmatpush.msrb.mxu2 %v1710_v3  ;;  %v1814_v41 = vld [vmem:[#allocation13 + $0xe40] sm:$0xff]  ;;  %v268_v3 = vrot.slane %v4507_v44, 7 }
  0xd8   :  { %1183 = vmatpush.msra.mxu1 %v733_v4  ;;  %1165 = vmatmul.f32.vlgmr.msra.gmra.mxu0 %v4477_v42  ;;  %v1574_v42 = vld [vmem:[#allocation13 + $0x6c0] sm:$0xff] }
  0xd9   :  { %2388 = vmatpush.msra.mxu3 %v1430_v5  ;;  %2404 = vmatpush.msrb.mxu0 %v1590_v6  ;;  %v1366_v43 = vld [vmem:[#allocation13 + $0x40] sm:$0xff] }
  0xda   :  { %2426 = vmatpush.msrb.mxu2 %v1702_v7  ;;  %253 = vrot.lane.b32.xlu1 %v252_v8, %s4327_s8  ;;  %v1526_v45 = vld [vmem:[#allocation13 + $0x540] sm:$0xff]  ;;  %v436_v7 = vpop.f32.mrf.mxu1 }
  0xdb   :  { %281 = vrot.lane.b32.xlu0 %v280_v9, %s4326_s21  ;;  %1184 = vmatpush.msra.mxu1 %v729_v10  ;;  %v1638_v47 = vld [vmem:[#allocation13 + $0x8c0] sm:$0xff]  ;;  %v4543_v9 = vpop.f32.mrf.mxu0  ;;  %s3943_s21 = sshll.u32 %s5125_s15, 4  ;;  %s3944_s21 = int_to_ptr.hbm [resolvable:$true] %s3943_s21 }
  0xdc   :  { %2389 = vmatpush.msra.mxu3 %v1422_v11  ;;  %1185 = vmatmul.f32.vlgmr.msra.gmra.mxu1 %v4490_v55  ;;  %v1670_v55 = vld [vmem:[#allocation13 + $0x9c0] sm:$0xff] }
  0xdd   :  { %2405 = vmatpush.msrb.mxu0 %v1582_v12  ;;  %2427 = vmatpush.msrb.mxu2 %v1694_v46  ;;  %v1806_v48 = vld [vmem:[#allocation13 + $0xe00] sm:$0xff]  ;;  %v456_v12 = vpop.f32.mrf.mxu2 }
  0xde   :  { %2442 = vmatpush.msrb.mxu1 %v1862_v13  ;;  %247 = vrot.lane.b32.xlu2 %v246_v15, %s4323_s22  ;;  %v1358_v51 = vld [vmem:[#allocation13] sm:$0xff]  ;;  %v4007_v15 = vld [vmem:[#allocation5] ss:$0 sm:$0xff] }
  0xdf   :  { %2390 = vmatpush.msra.mxu3 %v1414_v16  ;;  %2406 = vmatpush.msrb.mxu0 %v1574_v42  ;;  %v1518_v52 = vld [vmem:[#allocation13 + $0x500] sm:$0xff]  ;;  %v4546_v16 = vadd.f32 %v456_v12, %v436_v7 }
  0xe0   :  { %2428 = vmatpush.msrb.mxu2 %v1686_v17  ;;  %2443 = vmatpush.msrb.mxu1 %v1854_v18  ;;  %v1630_v53 = vld [vmem:[#allocation13 + $0x880] sm:$0xff] }
  0xe1   :  { %2391 = vmatpush.msra.mxu3 %v1406_v19  ;;  %2407 = vmatpush.msrb.mxu0 %v1566_v21  ;;  %v1798_v54 = vld [vmem:[#allocation13 + $0xdc0] sm:$0xff] }
  0xe2   :  { %2429 = vmatpush.msrb.mxu2 %v1678_v22  ;;  %2444 = vmatpush.msrb.mxu1 %v1846_v23  ;;  %v1990_v57 = vld [vmem:[#allocation13 + $0x13c0] sm:$0xff] }
  0xe3   :  { %2392 = vmatpush.msra.mxu3 %v1398_v24  ;;  %2408 = vmatpush.msrb.mxu0 %v1558_v25  ;;  %v1510_v58 = vld [vmem:[#allocation13 + $0x4c0] sm:$0xff] }
  0xe4   :  { %2430 = vmatpush.msrb.mxu2 %v1670_v55  ;;  %2445 = vmatpush.msrb.mxu1 %v1838_v27  ;;  %v1622_v14 = vld [vmem:[#allocation13 + $0x840] sm:$0xff]  ;;  %v468_v55 = vrot.slane %v4546_v16, 2 }
  0xe5   :  { %306 = vrot.lane.b32.xlu1 %v305_v26, %s4325_s6  ;;  %295 = vrot.lane.b32.xlu0 %v294_v28, %s4320_s16  ;;  %v1790_v59 = vld [vmem:[#allocation13 + $0xd80] sm:$0xff]  ;;  %v460_v26 = vrot.slane %v4546_v16, 1 }
  0xe6   :  { %2393 = vmatpush.msra.mxu3 %v1390_v29  ;;  %2409 = vmatpush.msrb.mxu0 %v1550_v30  ;;  %v1982_v60 = vld [vmem:[#allocation13 + $0x1380] sm:$0xff] }
  0xe7   :  { %2431 = vmatpush.msrb.mxu2 %v1662_v31  ;;  %2446 = vmatpush.msrb.mxu1 %v1830_v33  ;;  %v1502_v61 = vld [vmem:[#allocation13 + $0x480] sm:$0xff] }
  0xe8   :  { %317 = vrot.lane.b32.xlu2 %v316_v32, %s4323_s22  ;;  %2394 = vmatpush.msra.mxu3 %v1382_v34  ;;  %v1614_v20 = vld [vmem:[#allocation13 + $0x800] sm:$0xff] }
  0xe9   :  { %2410 = vmatpush.msrb.mxu0 %v1542_v35  ;;  %2432 = vmatpush.msrb.mxu2 %v1654_v36  ;;  %v1782_v62 = vld [vmem:[#allocation13 + $0xd40] sm:$0xff]  ;;  %v476_v35 = vrot.slane %v4546_v16, 3 }
  0xea   :  { %2447 = vmatpush.msrb.mxu1 %v1822_v37  ;;  %2395 = vmatpush.msra.mxu3 %v1374_v38  ;;  %v1974_v63 = vld [vmem:[#allocation13 + $0x1340] sm:$0xff] }
  0xeb   :  { %2411 = vmatpush.msrb.mxu0 %v1534_v39  ;;  %2433 = vmatpush.msrb.mxu2 %v1646_v40  ;;  %v2246_v1 = vld [vmem:[#allocation13 + $0x1bc0] sm:$0xff] }
  0xec   :  { %2448 = vmatpush.msrb.mxu1 %v1814_v41  ;;  %2396 = vmatpush.msra.mxu3 %v1366_v43  ;;  %v1494_v2 = vld [vmem:[#allocation13 + $0x440] sm:$0xff] }
  0xed   :  { %2412 = vmatpush.msrb.mxu0 %v1526_v45  ;;  %2434 = vmatpush.msrb.mxu2 %v1638_v47  ;;  %v1774_v4 = vld [vmem:[#allocation13 + $0xd00] sm:$0xff]  ;;  %v497_v47 = vrot.slane %v4546_v16, 6 }
  0xee   :  { %2449 = vmatpush.msrb.mxu1 %v1806_v48  ;;  %327 = vrot.lane.b32.xlu1 %v326_v49, %s4327_s8  ;;  %v1966_v5 = vld [vmem:[#allocation13 + $0x1300] sm:$0xff]  ;;  %v488_v49 = vrot.slane %v4546_v16, 5 }
  0xef   :  { %341 = vrot.lane.b32.xlu0 %v340_v50, %s4328_s24  ;;  %2397 = vmatpush.msra.mxu3 %v1358_v51  ;;  %v2238_v6 = vld [vmem:[#allocation13 + $0x1b80] sm:$0xff] }
  0xf0   :  { %2413 = vmatpush.msrb.mxu0 %v1518_v52  ;;  %2435 = vmatpush.msrb.mxu2 %v1630_v53  ;;  %v1486_v8 = vld [vmem:[#allocation13 + $0x400] sm:$0xff] }
  0xf1   :  { %2450 = vmatpush.msrb.mxu1 %v1798_v54  ;;  %2462 = vmatpush.msrb.mxu3 %v1990_v57  ;;  %v1766_v10 = vld [vmem:[#allocation13 + $0xcc0] sm:$0xff] }
  0xf2   :  { %261 = vrot.lane.b32.xlu2 %v260_v56, %s4328_s24  ;;  %2414 = vmatpush.msrb.mxu0 %v1510_v58  ;;  %v1958_v11 = vld [vmem:[#allocation13 + $0x12c0] sm:$0xff] }
  0xf3   :  { %2436 = vmatpush.msrb.mxu2 %v1622_v14  ;;  %2451 = vmatpush.msrb.mxu1 %v1790_v59  ;;  %v2118_v46 = vld [vmem:[#allocation13 + $0x17c0] sm:$0xff] }
  0xf4   :  { %2463 = vmatpush.msrb.mxu3 %v1982_v60  ;;  %2415 = vmatpush.msrb.mxu0 %v1502_v61  ;;  %v2230_v13 = vld [vmem:[#allocation13 + $0x1b40] sm:$0xff] }
  0xf5   :  { %2437 = vmatpush.msrb.mxu2 %v1614_v20  ;;  %2452 = vmatpush.msrb.mxu1 %v1782_v62  ;;  %v1758_v42 = vld [vmem:[#allocation13 + $0xc80] sm:$0xff] }
  0xf6   :  { %2464 = vmatpush.msrb.mxu3 %v1974_v63  ;;  %2416 = vmatpush.msrb.mxu0 %v1494_v2  ;;  %v1950_v17 = vld [vmem:[#allocation13 + $0x1280] sm:$0xff] }
  0xf7   :  { %2502 = vmatpush.msra.mxu2 %v2246_v1  ;;  %2453 = vmatpush.msrb.mxu1 %v1774_v4  ;;  %v2110_v18 = vld [vmem:[#allocation13 + $0x1780] sm:$0xff] }
  0xf8   :  { %269 = vrot.lane.b32.xlu1 %v268_v3, %s4329_s10  ;;  %355 = vrot.lane.b32.xlu0 %v4543_v9, %s4329_s10  ;;  %v2222_v19 = vld [vmem:[#allocation13 + $0x1b00] sm:$0xff] }
  0xf9   :  { %2465 = vmatpush.msrb.mxu3 %v1966_v5  ;;  %2503 = vmatpush.msra.mxu2 %v2238_v6  ;;  %v1750_v21 = vld [vmem:[#allocation13 + $0xc40] sm:$0xff]  ;;  %v1479_v6 = vld [vmem:[#allocation13 + $0x3c8] sm:$0xff] }
  0xfa   :  { %2417 = vmatpush.msrb.mxu0 %v1486_v8  ;;  %2454 = vmatpush.msrb.mxu1 %v1766_v10  ;;  %v1942_v22 = vld [vmem:[#allocation13 + $0x1240] sm:$0xff] }
  0xfb   :  { %2466 = vmatpush.msrb.mxu3 %v1958_v11  ;;  %2504 = vmatpush.msra.mxu2 %v2230_v13  ;;  %v2102_v23 = vld [vmem:[#allocation13 + $0x1740] sm:$0xff]  ;;  %v1471_v11 = vld [vmem:[#allocation13 + $0x388] sm:$0xff] }
  0xfc   :  { %2482 = vmatpush.msra.mxu0 %v2118_v46  ;;  %379 = vrot.lane.b32.xlu2 %v4007_v15, %s4320_s16  ;;  %v2214_v24 = vld [vmem:[#allocation13 + $0x1ac0] sm:$0xff]  ;;  %v4568_v15 = vld [vmem:[%s5119_s9 + $0x10] sm:$0x3f] }
  0xfd   :  { %2455 = vmatpush.msrb.mxu1 %v1758_v42  ;;  %2467 = vmatpush.msrb.mxu3 %v1950_v17  ;;  %v1742_v25 = vld [vmem:[#allocation13 + $0xc00] sm:$0xff]  ;;  %v1463_v42 = vld [vmem:[#allocation13 + $0x348] sm:$0xff] }
  0xfe   :  { %2483 = vmatpush.msra.mxu0 %v2110_v18  ;;  %2505 = vmatpush.msra.mxu2 %v2222_v19  ;;  %v1934_v27 = vld [vmem:[#allocation13 + $0x1200] sm:$0xff]  ;;  %v1735_v17 = vld [vmem:[#allocation13 + $0xbc8] sm:$0xff] }
  0xff   :  { %2456 = vmatpush.msrb.mxu1 %v1750_v21  ;;  %2468 = vmatpush.msrb.mxu3 %v1942_v22  ;;  %v2094_v28 = vld [vmem:[#allocation13 + $0x1700] sm:$0xff]  ;;  %v1455_v21 = vld [vmem:[#allocation13 + $0x308] sm:$0xff] }
 0x100   :  { %2484 = vmatpush.msra.mxu0 %v2102_v23  ;;  %2506 = vmatpush.msra.mxu2 %v2214_v24  ;;  %v2206_v29 = vld [vmem:[#allocation13 + $0x1a80] sm:$0xff]  ;;  %v1727_v22 = vld [vmem:[#allocation13 + $0xb88] sm:$0xff] }
 0x101   :  { %2457 = vmatpush.msrb.mxu1 %v1742_v25  ;;  %v2374_v30 = vld [vmem:[#allocation13 + $0x1fc0] sm:$0xff]  ;;  %469 = vrot.lane.b32.xlu1 %v468_v55, %s4323_s22  ;;  %v4574_v25 = vld [vmem:[%s5119_s9 + $0x8] sm:$0x3f] }
 0x102   :  { %461 = vrot.lane.b32.xlu0 %v460_v26, %s4320_s16  ;;  %v1926_v31 = vld [vmem:[#allocation13 + $0x11c0] sm:$0xff]  ;;  %2469 = vmatpush.msrb.mxu3 %v1934_v27  ;;  %v1607_v26 = vld [vmem:[#allocation13 + $0x7c8] sm:$0xff] }
 0x103   :  { %v2086_v32 = vld [vmem:[#allocation13 + $0x16c0] sm:$0xff]  ;;  %2485 = vmatpush.msra.mxu0 %v2094_v28  ;;  %2507 = vmatpush.msra.mxu2 %v2206_v29  ;;  %v1447_v27 = vld [vmem:[#allocation13 + $0x2c8] sm:$0xff] }
 0x104   :  { %v2198_v33 = vld [vmem:[#allocation13 + $0x1a40] sm:$0xff]  ;;  %2522 = vmatpush.msra.mxu1 %v2374_v30  ;;  %2470 = vmatpush.msrb.mxu3 %v1926_v31  ;;  %v1719_v28 = vld [vmem:[#allocation13 + $0xb48] sm:$0xff] }
 0x105   :  { %v2366_v34 = vld [vmem:[#allocation13 + $0x1f80] sm:$0xff]  ;;  %2486 = vmatpush.msra.mxu0 %v2086_v32  ;;  %2508 = vmatpush.msra.mxu2 %v2198_v33  ;;  %v1599_v30 = vld [vmem:[#allocation13 + $0x788] sm:$0xff] }
 0x106   :  { %v1918_v36 = vld [vmem:[#allocation13 + $0x1180] sm:$0xff]  ;;  %2523 = vmatpush.msra.mxu1 %v2366_v34  ;;  %477 = vrot.lane.b32.xlu2 %v476_v35, %s4328_s24  ;;  %v1439_v31 = vld [vmem:[#allocation13 + $0x288] sm:$0xff]  ;;  %v4586_v34 = vld [vmem:[%s5119_s9 + $0x30] sm:$0x3f] }
 0x107   :  { %v2078_v37 = vld [vmem:[#allocation13 + $0x1680] sm:$0xff]  ;;  %2471 = vmatpush.msrb.mxu3 %v1918_v36  ;;  %2438 = vmatmul.f32.vlgmr.msrb.gmra.mxu2 %v4568_v15  ;;  %v1711_v32 = vld [vmem:[#allocation13 + $0xb08] sm:$0xff]  ;;  %v4591_v35 = vld [vmem:[%s5119_s9 + $0x18] sm:$0x3f] }
 0x108   :  { %v2190_v38 = vld [vmem:[#allocation13 + $0x1a00] sm:$0xff]  ;;  %2487 = vmatpush.msra.mxu0 %v2078_v37  ;;  %v1431_v36 = vld [vmem:[#allocation13 + $0x248] sm:$0xff]  ;;  %2458 = vmatmul.f32.vlgmr.msrb.gmra.mxu1 %v4591_v35 }
 0x109   :  { %v2358_v39 = vld [vmem:[#allocation13 + $0x1f40] sm:$0xff]  ;;  %2509 = vmatpush.msra.mxu2 %v2190_v38  ;;  %498 = vrot.lane.b32.xlu1 %v497_v47, %s4323_s22  ;;  %v1591_v37 = vld [vmem:[#allocation13 + $0x748] sm:$0xff] }
 0x10a   :  { %v1910_v40 = vld [vmem:[#allocation13 + $0x1140] sm:$0xff]  ;;  %2524 = vmatpush.msra.mxu1 %v2358_v39  ;;  %489 = vrot.lane.b32.xlu0 %v488_v49, %s4320_s16  ;;  %v1703_v38 = vld [vmem:[#allocation13 + $0xac8] sm:$0xff] }
 0x10b   :  { %v2070_v41 = vld [vmem:[#allocation13 + $0x1640] sm:$0xff]  ;;  %2472 = vmatpush.msrb.mxu3 %v1910_v40  ;;  %2418 = vmatmul.f32.vlgmr.msrb.gmra.mxu0 %v4574_v25  ;;  %v1423_v40 = vld [vmem:[#allocation13 + $0x208] sm:$0xff] }
 0x10c   :  { %v2182_v43 = vld [vmem:[#allocation13 + $0x19c0] sm:$0xff]  ;;  %2488 = vmatpush.msra.mxu0 %v2070_v41  ;;  %v1583_v41 = vld [vmem:[#allocation13 + $0x708] sm:$0xff] }
 0x10d   :  { %v2350_v45 = vld [vmem:[#allocation13 + $0x1f00] sm:$0xff]  ;;  %2510 = vmatpush.msra.mxu2 %v2182_v43  ;;  %v1695_v43 = vld [vmem:[#allocation13 + $0xa88] sm:$0xff] }
 0x10e   :  { %v1902_v48 = vld [vmem:[#allocation13 + $0x1100] sm:$0xff]  ;;  %2525 = vmatpush.msra.mxu1 %v2350_v45  ;;  %v1863_v45 = vld [vmem:[#allocation13 + $0xfc8] sm:$0xff] }
 0x10f   :  { %v2062_v50 = vld [vmem:[#allocation13 + $0x1600] sm:$0xff]  ;;  %2473 = vmatpush.msrb.mxu3 %v1902_v48  ;;  %v4598_v47 = vld [vmem:[%s5119_s9 + $0x28] sm:$0x3f] }
 0x110   :  { %v2174_v51 = vld [vmem:[#allocation13 + $0x1980] sm:$0xff]  ;;  %2489 = vmatpush.msra.mxu0 %v2062_v50  ;;  %v1415_v48 = vld [vmem:[#allocation13 + $0x1c8] sm:$0xff] }
 0x111   :  { %v2342_v52 = vld [vmem:[#allocation13 + $0x1ec0] sm:$0xff]  ;;  %2511 = vmatpush.msra.mxu2 %v2174_v51  ;;  %v1575_v49 = vld [vmem:[#allocation13 + $0x6c8] sm:$0xff] }
 0x112   :  { %v1894_v53 = vld [vmem:[#allocation13 + $0x10c0] sm:$0xff]  ;;  %2526 = vmatpush.msra.mxu1 %v2342_v52  ;;  %v1687_v50 = vld [vmem:[#allocation13 + $0xa48] sm:$0xff] }
 0x113   :  { %v2054_v54 = vld [vmem:[#allocation13 + $0x15c0] sm:$0xff]  ;;  %2474 = vmatpush.msrb.mxu3 %v1894_v53  ;;  %v1855_v51 = vld [vmem:[#allocation13 + $0xf88] sm:$0xff] }
 0x114   :  { %v2166_v56 = vld [vmem:[#allocation13 + $0x1940] sm:$0xff]  ;;  %2490 = vmatpush.msra.mxu0 %v2054_v54  ;;  %v1407_v52 = vld [vmem:[#allocation13 + $0x188] sm:$0xff] }
 0x115   :  { %v2334_v57 = vld [vmem:[#allocation13 + $0x1e80] sm:$0xff]  ;;  %2512 = vmatpush.msra.mxu2 %v2166_v56  ;;  %v1567_v53 = vld [vmem:[#allocation13 + $0x688] sm:$0xff] }
 0x116   :  { %v1886_v58 = vld [vmem:[#allocation13 + $0x1080] sm:$0xff]  ;;  %2527 = vmatpush.msra.mxu1 %v2334_v57  ;;  %v1679_v54 = vld [vmem:[#allocation13 + $0xa08] sm:$0xff]  ;;  %v4604_v57 = vld [vmem:[%s5119_s9 + $0x38] sm:$0x3f] }
 0x117   :  { %v2046_v14 = vld [vmem:[#allocation13 + $0x1580] sm:$0xff]  ;;  %2475 = vmatpush.msrb.mxu3 %v1886_v58  ;;  %v1847_v56 = vld [vmem:[#allocation13 + $0xf48] sm:$0xff] }
 0x118   :  { %v2158_v59 = vld [vmem:[#allocation13 + $0x1900] sm:$0xff]  ;;  %2491 = vmatpush.msra.mxu0 %v2046_v14  ;;  %v1399_v58 = vld [vmem:[#allocation13 + $0x148] sm:$0xff] }
 0x119   :  { %v2326_v60 = vld [vmem:[#allocation13 + $0x1e40] sm:$0xff]  ;;  %2513 = vmatpush.msra.mxu2 %v2158_v59  ;;  %v1559_v14 = vld [vmem:[#allocation13 + $0x648] sm:$0xff] }
 0x11a   :  { %v1878_v61 = vld [vmem:[#allocation13 + $0x1040] sm:$0xff]  ;;  %2528 = vmatpush.msra.mxu1 %v2326_v60  ;;  %v1671_v59 = vld [vmem:[#allocation13 + $0x9c8] sm:$0xff]  ;;  %v4606_v60 = vpop.f32.mrf.mxu3 }
 0x11b   :  { %v2038_v20 = vld [vmem:[#allocation13 + $0x1540] sm:$0xff]  ;;  %2476 = vmatpush.msrb.mxu3 %v1878_v61  ;;  %v1839_v61 = vld [vmem:[#allocation13 + $0xf08] sm:$0xff] }
 0x11c   :  { %v2150_v62 = vld [vmem:[#allocation13 + $0x18c0] sm:$0xff]  ;;  %2492 = vmatpush.msra.mxu0 %v2038_v20  ;;  %v1391_v20 = vld [vmem:[#allocation13 + $0x108] sm:$0xff] }
 0x11d   :  { %v2318_v63 = vld [vmem:[#allocation13 + $0x1e00] sm:$0xff]  ;;  %2514 = vmatpush.msra.mxu2 %v2150_v62  ;;  %v1551_v62 = vld [vmem:[#allocation13 + $0x608] sm:$0xff] }
 0x11e   :  { %v1870_v1 = vld [vmem:[#allocation13 + $0x1000] sm:$0xff]  ;;  %2529 = vmatpush.msra.mxu1 %v2318_v63  ;;  %v1663_v63 = vld [vmem:[#allocation13 + $0x988] sm:$0xff] }
 0x11f   :  { %v2030_v2 = vld [vmem:[#allocation13 + $0x1500] sm:$0xff]  ;;  %2477 = vmatpush.msrb.mxu3 %v1870_v1  ;;  %v1831_v1 = vld [vmem:[#allocation13 + $0xec8] sm:$0xff] }
 0x120   :  { %v2142_v3 = vld [vmem:[#allocation13 + $0x1880] sm:$0xff]  ;;  %2493 = vmatpush.msra.mxu0 %v2030_v2  ;;  %v1383_v2 = vld [vmem:[#allocation13 + $0xc8] sm:$0xff] }
 0x121   :  { %v2310_v4 = vld [vmem:[#allocation13 + $0x1dc0] sm:$0xff]  ;;  %2515 = vmatpush.msra.mxu2 %v2142_v3  ;;  %v1543_v3 = vld [vmem:[#allocation13 + $0x5c8] sm:$0xff] }
 0x122   :  { %v4562_v5 = vld [vmem:[%s5119_s9] sm:$0x3f]  ;;  %2530 = vmatpush.msra.mxu1 %v2310_v4  ;;  %v1655_v4 = vld [vmem:[#allocation13 + $0x948] sm:$0xff] }
 0x123   :  { %v2022_v7 = vld [vmem:[#allocation13 + $0x14c0] sm:$0xff]  ;;  %2398 = vmatmul.f32.vlgmr.msra.gmra.mxu3 %v4562_v5 }
 0x124   :  { %v2134_v8 = vld [vmem:[#allocation13 + $0x1840] sm:$0xff]  ;;  %2542 = vmatpush.msra.mxu3 %v1479_v6  ;;  %2494 = vmatpush.msra.mxu0 %v2022_v7  ;;  %v1823_v6 = vld [vmem:[#allocation13 + $0xe88] sm:$0xff] }
 0x125   :  { %v2302_v10 = vld [vmem:[#allocation13 + $0x1d80] sm:$0xff]  ;;  %2516 = vmatpush.msra.mxu2 %v2134_v8  ;;  %v1375_v7 = vld [vmem:[#allocation13 + $0x88] sm:$0xff] }
 0x126   :  { %v2014_v12 = vld [vmem:[#allocation13 + $0x1480] sm:$0xff]  ;;  %2531 = vmatpush.msra.mxu1 %v2302_v10  ;;  %2543 = vmatpush.msra.mxu3 %v1471_v11  ;;  %v1535_v8 = vld [vmem:[#allocation13 + $0x588] sm:$0xff] }
 0x127   :  { %v2126_v46 = vld [vmem:[#allocation13 + $0x1800] sm:$0xff]  ;;  %2495 = vmatpush.msra.mxu0 %v2014_v12  ;;  %v1647_v10 = vld [vmem:[#allocation13 + $0x908] sm:$0xff] }
 0x128   :  { %v2294_v13 = vld [vmem:[#allocation13 + $0x1d40] sm:$0xff]  ;;  %2517 = vmatpush.msra.mxu2 %v2126_v46  ;;  %2544 = vmatpush.msra.mxu3 %v1463_v42  ;;  %v1815_v11 = vld [vmem:[#allocation13 + $0xe48] sm:$0xff] }
 0x129   :  { %v2006_v18 = vld [vmem:[#allocation13 + $0x1440] sm:$0xff]  ;;  %2532 = vmatpush.msra.mxu1 %v2294_v13  ;;  %2518 = vmatmul.f32.vlgmr.msra.gmra.mxu2 %v4586_v34  ;;  %v1367_v12 = vld [vmem:[#allocation13 + $0x48] sm:$0xff] }
 0x12a   :  { %v2286_v19 = vld [vmem:[#allocation13 + $0x1d00] sm:$0xff]  ;;  %2582 = vmatpush.msrb.mxu2 %v1735_v17  ;;  %2496 = vmatpush.msra.mxu0 %v2006_v18  ;;  %v1527_v46 = vld [vmem:[#allocation13 + $0x548] sm:$0xff] }
 0x12b   :  { %v1998_v23 = vld [vmem:[#allocation13 + $0x1400] sm:$0xff]  ;;  %2533 = vmatpush.msra.mxu1 %v2286_v19  ;;  %2545 = vmatpush.msra.mxu3 %v1455_v21  ;;  %v1639_v13 = vld [vmem:[#allocation13 + $0x8c8] sm:$0xff]  ;;  %v4609_v21 = vpop.f32.mrf.mxu3 }
 0x12c   :  { %v2278_v24 = vld [vmem:[#allocation13 + $0x1cc0] sm:$0xff]  ;;  %2583 = vmatpush.msrb.mxu2 %v1727_v22  ;;  %2497 = vmatpush.msra.mxu0 %v1998_v23  ;;  %v1807_v42 = vld [vmem:[#allocation13 + $0xe08] sm:$0xff] }
 0x12d   :  { %v4579_v55 = vld [vmem:[%s5119_s9 + $0x20] sm:$0x3f]  ;;  %2534 = vmatpush.msra.mxu1 %v2278_v24  ;;  %2546 = vmatpush.msra.mxu3 %v1447_v27  ;;  %v1359_v17 = vld [vmem:[#allocation13 + $0x8] sm:$0xff]  ;;  %v4611_v27 = vpop.f32.mrf.mxu2 }
 0x12e   :  { %v2270_v29 = vld [vmem:[#allocation13 + $0x1c80] sm:$0xff]  ;;  %2478 = vmatmul.f32.vlgmr.msrb.gmra.mxu3 %v4579_v55  ;;  %2562 = vmatpush.msrb.mxu0 %v1607_v26  ;;  %v1519_v18 = vld [vmem:[#allocation13 + $0x508] sm:$0xff] }
 0x12f   :  { %2584 = vmatpush.msrb.mxu2 %v1719_v28  ;;  %v2262_v33 = vld [vmem:[#allocation13 + $0x1c40] sm:$0xff]  ;;  %2535 = vmatpush.msra.mxu1 %v2270_v29  ;;  %v1631_v19 = vld [vmem:[#allocation13 + $0x888] sm:$0xff] }
 0x130   :  { %2563 = vmatpush.msrb.mxu0 %v1599_v30  ;;  %2547 = vmatpush.msra.mxu3 %v1439_v31  ;;  %v2254_v39 = vld [vmem:[#allocation13 + $0x1c00] sm:$0xff]  ;;  %v1799_v22 = vld [vmem:[#allocation13 + $0xdc8] sm:$0xff] }
 0x131   :  { %2585 = vmatpush.msrb.mxu2 %v1711_v32  ;;  %2536 = vmatpush.msra.mxu1 %v2262_v33  ;;  %v1991_v23 = vld [vmem:[#allocation13 + $0x13c8] sm:$0xff] }
 0x132   :  { %2548 = vmatpush.msra.mxu3 %v1431_v36  ;;  %2564 = vmatpush.msrb.mxu0 %v1591_v37  ;;  %v1511_v24 = vld [vmem:[#allocation13 + $0x4c8] sm:$0xff] }
 0x133   :  { %2586 = vmatpush.msrb.mxu2 %v1703_v38  ;;  %2537 = vmatpush.msra.mxu1 %v2254_v39  ;;  %v1623_v26 = vld [vmem:[#allocation13 + $0x848] sm:$0xff] }
 0x134   :  { %2549 = vmatpush.msra.mxu3 %v1423_v40  ;;  %2565 = vmatpush.msrb.mxu0 %v1583_v41  ;;  %v1791_v28 = vld [vmem:[#allocation13 + $0xd88] sm:$0xff] }
 0x135   :  { %2587 = vmatpush.msrb.mxu2 %v1695_v43  ;;  %2602 = vmatpush.msrb.mxu1 %v1863_v45  ;;  %v1983_v29 = vld [vmem:[#allocation13 + $0x1388] sm:$0xff]  ;;  %v4613_v43 = vpop.f32.mrf.mxu3 }
 0x136   :  { %2498 = vmatmul.f32.vlgmr.msra.gmra.mxu0 %v4598_v47  ;;  %2550 = vmatpush.msra.mxu3 %v1415_v48  ;;  %v1503_v30 = vld [vmem:[#allocation13 + $0x488] sm:$0xff] }
 0x137   :  { %2566 = vmatpush.msrb.mxu0 %v1575_v49  ;;  %2588 = vmatpush.msrb.mxu2 %v1687_v50  ;;  %v1615_v31 = vld [vmem:[#allocation13 + $0x808] sm:$0xff] }
 0x138   :  { %2603 = vmatpush.msrb.mxu1 %v1855_v51  ;;  %2551 = vmatpush.msra.mxu3 %v1407_v52  ;;  %v1783_v32 = vld [vmem:[#allocation13 + $0xd48] sm:$0xff]  ;;  %v4615_v51 = vpop.f32.mrf.mxu2 }
 0x139   :  { %2567 = vmatpush.msrb.mxu0 %v1567_v53  ;;  %2589 = vmatpush.msrb.mxu2 %v1679_v54  ;;  %v1975_v33 = vld [vmem:[#allocation13 + $0x1348] sm:$0xff] }
 0x13a   :  { %2604 = vmatpush.msrb.mxu1 %v1847_v56  ;;  %2552 = vmatpush.msra.mxu3 %v1399_v58  ;;  %v2247_v36 = vld [vmem:[#allocation13 + $0x1bc8] sm:$0xff] }
 0x13b   :  { %2538 = vmatmul.f32.vlgmr.msra.gmra.mxu1 %v4604_v57  ;;  %2568 = vmatpush.msrb.mxu0 %v1559_v14  ;;  %v1495_v37 = vld [vmem:[#allocation13 + $0x448] sm:$0xff] }
 0x13c   :  { %2590 = vmatpush.msrb.mxu2 %v1671_v59  ;;  %2605 = vmatpush.msrb.mxu1 %v1839_v61  ;;  %v1775_v38 = vld [vmem:[#allocation13 + $0xd08] sm:$0xff] }
 0x13d   :  { %2553 = vmatpush.msra.mxu3 %v1391_v20  ;;  %2569 = vmatpush.msrb.mxu0 %v1551_v62  ;;  %v1967_v39 = vld [vmem:[#allocation13 + $0x1308] sm:$0xff] }
 0x13e   :  { %2591 = vmatpush.msrb.mxu2 %v1663_v63  ;;  %2606 = vmatpush.msrb.mxu1 %v1831_v1  ;;  %v2239_v40 = vld [vmem:[#allocation13 + $0x1b88] sm:$0xff]  ;;  %v4621_v63 = vpop.f32.mrf.mxu0 }
 0x13f   :  { %2554 = vmatpush.msra.mxu3 %v1383_v2  ;;  %2570 = vmatpush.msrb.mxu0 %v1543_v3  ;;  %v1487_v41 = vld [vmem:[#allocation13 + $0x408] sm:$0xff] }
 0x140   :  { %2592 = vmatpush.msrb.mxu2 %v1655_v4  ;;  %2607 = vmatpush.msrb.mxu1 %v1823_v6  ;;  %v1767_v45 = vld [vmem:[#allocation13 + $0xcc8] sm:$0xff]  ;;  %v4617_v20 = vpop.permute.xlu0 %238  ;;  %v4623_v6 = vpop.f32.mrf.mxu3 }
 0x141   :  { %2555 = vmatpush.msra.mxu3 %v1375_v7  ;;  %2571 = vmatpush.msrb.mxu0 %v1535_v8  ;;  %v1959_v48 = vld [vmem:[#allocation13 + $0x12c8] sm:$0xff] }
 0x142   :  { %2593 = vmatpush.msrb.mxu2 %v1647_v10  ;;  %2608 = vmatpush.msrb.mxu1 %v1815_v11  ;;  %v2119_v49 = vld [vmem:[#allocation13 + $0x17c8] sm:$0xff]  ;;  %v4619_v62 = vpop.permute.xlu1 %220 }
 0x143   :  { %2556 = vmatpush.msra.mxu3 %v1367_v12  ;;  %2572 = vmatpush.msrb.mxu0 %v1527_v46  ;;  %v2231_v50 = vld [vmem:[#allocation13 + $0x1b48] sm:$0xff]  ;;  %v4625_v12 = vpop.f32.mrf.mxu1 }
 0x144   :  { %2594 = vmatpush.msrb.mxu2 %v1639_v13  ;;  %2609 = vmatpush.msrb.mxu1 %v1807_v42  ;;  %v1759_v52 = vld [vmem:[#allocation13 + $0xc88] sm:$0xff]  ;;  %v4627_v42 = vpop.permute.xlu2 %229 }
 0x145   :  { %2557 = vmatpush.msra.mxu3 %v1359_v17  ;;  %2573 = vmatpush.msrb.mxu0 %v1519_v18  ;;  %v1951_v53 = vld [vmem:[#allocation13 + $0x1288] sm:$0xff] }
 0x146   :  { %2595 = vmatpush.msrb.mxu2 %v1631_v19  ;;  %2610 = vmatpush.msrb.mxu1 %v1799_v22  ;;  %v2111_v54 = vld [vmem:[#allocation13 + $0x1788] sm:$0xff]  ;;  %v4629_v19 = vpop.f32.mrf.mxu2 }
 0x147   :  { %2622 = vmatpush.msrb.mxu3 %v1991_v23  ;;  %2574 = vmatpush.msrb.mxu0 %v1511_v24  ;;  %v2223_v56 = vld [vmem:[#allocation13 + $0x1b08] sm:$0xff] }
 0x148   :  { %2596 = vmatpush.msrb.mxu2 %v1623_v26  ;;  %2611 = vmatpush.msrb.mxu1 %v1791_v28  ;;  %v1751_v58 = vld [vmem:[#allocation13 + $0xc48] sm:$0xff]  ;;  %v4631_v28 = vpop.f32.mrf.mxu0 }
 0x149   :  { %2623 = vmatpush.msrb.mxu3 %v1983_v29  ;;  %2575 = vmatpush.msrb.mxu0 %v1503_v30  ;;  %v1943_v14 = vld [vmem:[#allocation13 + $0x1248] sm:$0xff] }
 0x14a   :  { %2597 = vmatpush.msrb.mxu2 %v1615_v31  ;;  %2612 = vmatpush.msrb.mxu1 %v1783_v32  ;;  %v2103_v59 = vld [vmem:[#allocation13 + $0x1748] sm:$0xff] }
 0x14b   :  { %2624 = vmatpush.msrb.mxu3 %v1975_v33  ;;  %2576 = vmatpush.msrb.mxu0 %v1495_v37  ;;  %v2215_v61 = vld [vmem:[#allocation13 + $0x1ac8] sm:$0xff] }
 0x14c   :  { %2662 = vmatpush.msra.mxu2 %v2247_v36  ;;  %2613 = vmatpush.msrb.mxu1 %v1775_v38  ;;  %v1743_v1 = vld [vmem:[#allocation13 + $0xc08] sm:$0xff]  ;;  %v4633_v33 = vpop.permute.xlu1 %253 }
 0x14d   :  { %2625 = vmatpush.msrb.mxu3 %v1967_v39  ;;  %2577 = vmatpush.msrb.mxu0 %v1487_v41  ;;  %v1935_v2 = vld [vmem:[#allocation13 + $0x1208] sm:$0xff]  ;;  %v282_v36 = vpop.permute.xlu0 %281  ;;  %v4635_v41 = vpop.f32.mrf.mxu1 }
 0x14e   :  { %2663 = vmatpush.msra.mxu2 %v2239_v40  ;;  %2614 = vmatpush.msrb.mxu1 %v1767_v45  ;;  %v2095_v3 = vld [vmem:[#allocation13 + $0x1708] sm:$0xff]  ;;  %v4637_v45 = vpop.f32.mrf.mxu3 }
 0x14f   :  { %2626 = vmatpush.msrb.mxu3 %v1959_v48  ;;  %2642 = vmatpush.msra.mxu0 %v2119_v49  ;;  %v2207_v4 = vld [vmem:[#allocation13 + $0x1a88] sm:$0xff] }
 0x150   :  { %2664 = vmatpush.msra.mxu2 %v2231_v50  ;;  %2615 = vmatpush.msrb.mxu1 %v1759_v52  ;;  %v2375_v7 = vld [vmem:[#allocation13 + $0x1fc8] sm:$0xff]  ;;  %v1046_v52 = vpop.f32.mrf.mxu2 }
 0x151   :  { %2627 = vmatpush.msrb.mxu3 %v1951_v53  ;;  %2643 = vmatpush.msra.mxu0 %v2111_v54  ;;  %v1927_v8 = vld [vmem:[#allocation13 + $0x11c8] sm:$0xff] }
 0x152   :  { %2665 = vmatpush.msra.mxu2 %v2223_v56  ;;  %2616 = vmatpush.msrb.mxu1 %v1751_v58  ;;  %v2087_v10 = vld [vmem:[#allocation13 + $0x16c8] sm:$0xff]  ;;  %v4639_v56 = vpop.permute.xlu2 %247 }
 0x153   :  { %2628 = vmatpush.msrb.mxu3 %v1943_v14  ;;  %2644 = vmatpush.msra.mxu0 %v2103_v59  ;;  %v2199_v11 = vld [vmem:[#allocation13 + $0x1a48] sm:$0xff]  ;;  %v4642_v59 = vpop.f32.mrf.mxu0 }
 0x154   :  { %2666 = vmatpush.msra.mxu2 %v2215_v61  ;;  %2617 = vmatpush.msrb.mxu1 %v1743_v1  ;;  %v2367_v46 = vld [vmem:[#allocation13 + $0x1f88] sm:$0xff] }
 0x155   :  { %2629 = vmatpush.msrb.mxu3 %v1935_v2  ;;  %2645 = vmatpush.msra.mxu0 %v2095_v3  ;;  %v1919_v13 = vld [vmem:[#allocation13 + $0x1188] sm:$0xff]  ;;  %v847_v2 = vadd.f32 %v4611_v27, %v4606_v60  ;;  %v4649_v27 = vpop.f32.mrf.mxu1 }
 0x156   :  { %2667 = vmatpush.msra.mxu2 %v2207_v4  ;;  %2682 = vmatpush.msra.mxu1 %v2375_v7  ;;  %v2079_v17 = vld [vmem:[#allocation13 + $0x1688] sm:$0xff]  ;;  %v947_v4 = vadd.f32 %v4613_v43, %v4615_v51 }
 0x157   :  { %2630 = vmatpush.msrb.mxu3 %v1927_v8  ;;  %v2191_v18 = vld [vmem:[#allocation13 + $0x1a08] sm:$0xff]  ;;  %2646 = vmatpush.msra.mxu0 %v2087_v10  ;;  %v284_v8 = vsel %vm223_vm3, 0.0, %v282_v36  ;;  %v296_v60 = vpop.permute.xlu0 %295 }
 0x158   :  { %2668 = vmatpush.msra.mxu2 %v2199_v11  ;;  %v2359_v22 = vld [vmem:[#allocation13 + $0x1f48] sm:$0xff]  ;;  %2683 = vmatpush.msra.mxu1 %v2367_v46  ;;  %v1480_v11 = vld [vmem:[#allocation13 + $0x3d0] sm:$0xff]  ;;  %v307_v46 = vpop.permute.xlu1 %306 }
 0x159   :  { %v1911_v23 = vld [vmem:[#allocation13 + $0x1148] sm:$0xff]  ;;  %2631 = vmatpush.msrb.mxu3 %v1919_v13  ;;  %2647 = vmatpush.msra.mxu0 %v2079_v17  ;;  %v298_v13 = vsel %vm232_vm4, 0.0, %v296_v60  ;;  %v1146_v17 = vpop.f32.mrf.mxu3 }
 0x15a   :  { %v2071_v24 = vld [vmem:[#allocation13 + $0x1648] sm:$0xff]  ;;  %2669 = vmatpush.msra.mxu2 %v2191_v18  ;;  %2684 = vmatpush.msra.mxu1 %v2359_v22  ;;  %v867_v18 = vadd.f32 %v4621_v63, %v847_v2  ;;  %v1047_v63 = vadd.f32 %v1046_v52, %v4623_v6  ;;  %v318_v6 = vpop.permute.xlu2 %317 }
 0x15b   :  { %v2183_v26 = vld [vmem:[#allocation13 + $0x19c8] sm:$0xff]  ;;  %2632 = vmatpush.msrb.mxu3 %v1911_v23  ;;  %2648 = vmatpush.msra.mxu0 %v2071_v24  ;;  %v285_v23 = vsel %vm225_vm5, %v284_v8, 0.0  ;;  %v967_v24 = vadd.f32 %v4631_v28, %v947_v4  ;;  %v299_v28 = vsel %vm234_vm7, %v298_v13, 0.0  ;;  %v1720_v13 = vld [vmem:[#allocation13 + $0xb50] sm:$0xff] }
 0x15c   :  { %v2351_v29 = vld [vmem:[#allocation13 + $0x1f08] sm:$0xff]  ;;  %2670 = vmatpush.msra.mxu2 %v2183_v26  ;;  %2558 = vmatmul.f32.vlgmr.msra.gmra.mxu3 %v4562_v5 }
 0x15d   :  { %v1903_v30 = vld [vmem:[#allocation13 + $0x1108] sm:$0xff]  ;;  %2685 = vmatpush.msra.mxu1 %v2351_v29  ;;  %2598 = vmatmul.f32.vlgmr.msrb.gmra.mxu2 %v4568_v15  ;;  %v224_v15 = vsel %vm223_vm3, 0.0, %v4619_v62  ;;  %v1126_v29 = vpop.f32.mrf.mxu2  ;;  %v288_v62 = vrot.slane %v285_v23, 7 }
 0x15e   :  { %v2063_v31 = vld [vmem:[#allocation13 + $0x1608] sm:$0xff]  ;;  %2633 = vmatpush.msrb.mxu3 %v1903_v30  ;;  %v4330_v30 = vmov 0.0   ;;  %2578 = vmatmul.f32.vlgmr.msrb.gmra.mxu0 %v4574_v25  ;;  %v226_v52 = vsel %vm225_vm5, %v224_v15, 0.0 }
 0x15f   :  { %v2175_v32 = vld [vmem:[#allocation13 + $0x1988] sm:$0xff]  ;;  %2649 = vmatpush.msra.mxu0 %v2063_v31  ;;  %v4658_v31 = vrot.slane %v4330_v30, 7  ;;  %2618 = vmatmul.f32.vlgmr.msrb.gmra.mxu1 %v4591_v35  ;;  %v1440_v30 = vld [vmem:[#allocation13 + $0x290] sm:$0xff] }
 0x160   :  { %v2343_v37 = vld [vmem:[#allocation13 + $0x1ec8] sm:$0xff]  ;;  %2671 = vmatpush.msra.mxu2 %v2175_v32  ;;  %v1472_v32 = vld [vmem:[#allocation13 + $0x390] sm:$0xff]  ;;  %v328_v60 = vpop.permute.xlu1 %327 }
 0x161   :  { %v1895_v38 = vld [vmem:[#allocation13 + $0x10c8] sm:$0xff]  ;;  %2686 = vmatpush.msra.mxu1 %v2343_v37  ;;  %v1147_v37 = vadd.f32 %v1146_v17, %v1126_v29 }
 0x162   :  { %v2055_v39 = vld [vmem:[#allocation13 + $0x15c8] sm:$0xff]  ;;  %2634 = vmatpush.msrb.mxu3 %v1895_v38  ;;  %v887_v38 = vadd.f32 %v4625_v12, %v867_v18  ;;  %v278_v12 = vsel %vm216_vm6, %v4518_v0, 0.0 }
 0x163   :  { %v2167_v40 = vld [vmem:[#allocation13 + $0x1948] sm:$0xff]  ;;  %2650 = vmatpush.msra.mxu0 %v2055_v39 }
 0x164   :  { %v2335_v48 = vld [vmem:[#allocation13 + $0x1e88] sm:$0xff]  ;;  %2672 = vmatpush.msra.mxu2 %v2167_v40  ;;  %v1736_v40 = vld [vmem:[#allocation13 + $0xbd0] sm:$0xff] }
 0x165   :  { %v1887_v49 = vld [vmem:[#allocation13 + $0x1088] sm:$0xff]  ;;  %2687 = vmatpush.msra.mxu1 %v2335_v48  ;;  %v309_v48 = vsel %vm241_vm8, 0.0, %v307_v46  ;;  %v1448_v46 = vld [vmem:[#allocation13 + $0x2d0] sm:$0xff] }
 0x166   :  { %v2047_v50 = vld [vmem:[#allocation13 + $0x1588] sm:$0xff]  ;;  %2635 = vmatpush.msrb.mxu3 %v1887_v49  ;;  %v1166_v49 = vpop.f32.mrf.mxu0  ;;  %v310_v2 = vsel %vm243_vm9, %v309_v48, 0.0  ;;  %v1432_v48 = vld [vmem:[#allocation13 + $0x250] sm:$0xff] }
 0x167   :  { %v2159_v53 = vld [vmem:[#allocation13 + $0x1908] sm:$0xff]  ;;  %2651 = vmatpush.msra.mxu0 %v2047_v50  ;;  %v217_v50 = vsel %vm216_vm6, %v4507_v44, 0.0  ;;  %v304_v44 = vadd.f32 %v4658_v31, %v4658_v31  ;;  %v312_v17 = vrot.slane %v310_v2, 7 }
 0x168   :  { %v2327_v54 = vld [vmem:[#allocation13 + $0x1e48] sm:$0xff]  ;;  %2673 = vmatpush.msra.mxu2 %v2159_v53  ;;  %v1464_v53 = vld [vmem:[#allocation13 + $0x350] sm:$0xff]  ;;  %v227_v4 = vadd.f32 %v226_v52, %v217_v50 }
 0x169   :  { %v1879_v58 = vld [vmem:[#allocation13 + $0x1048] sm:$0xff]  ;;  %2688 = vmatpush.msra.mxu1 %v2327_v54  ;;  %v233_v54 = vsel %vm232_vm4, 0.0, %v4627_v42  ;;  %v4679_v42 = vadd.f32 %v4609_v21, %v887_v38  ;;  %v242_v21 = vsel %vm241_vm8, 0.0, %v4617_v20  ;;  %v331_v20 = vsel %vm223_vm3, %v328_v60, 0.0  ;;  %v1712_v38 = vld [vmem:[#allocation13 + $0xb10] sm:$0xff] }
 0x16a   :  { %v2039_v14 = vld [vmem:[#allocation13 + $0x1548] sm:$0xff]  ;;  %2636 = vmatpush.msrb.mxu3 %v1879_v58  ;;  %v335_v50 = vrot.slane %v331_v20, 7  ;;  %v1856_v20 = vld [vmem:[#allocation13 + $0xf90] sm:$0xff] }
 0x16b   :  { %v2151_v61 = vld [vmem:[#allocation13 + $0x18c8] sm:$0xff]  ;;  %2652 = vmatpush.msra.mxu0 %v2039_v14  ;;  %v301_v14 = vrot.slane %v299_v28, 7  ;;  %v1222_v35 = vrot.slane %v4679_v42, 2  ;;  %v1234_v15 = vrot.slane %v4679_v42, 3 }
 0x16c   :  { %v2319_v1 = vld [vmem:[#allocation13 + $0x1e08] sm:$0xff]  ;;  %2674 = vmatpush.msra.mxu2 %v2151_v61  ;;  %v987_v61 = vadd.f32 %v4635_v41, %v967_v24  ;;  %v235_v41 = vsel %vm234_vm7, %v233_v54, 0.0  ;;  %v330_v54 = vsel %vm225_vm5, 0.0, %v328_v60  ;;  %v1576_v60 = vld [vmem:[#allocation13 + $0x6d0] sm:$0xff] }
 0x16d   :  { %v1871_v3 = vld [vmem:[#allocation13 + $0x1008] sm:$0xff]  ;;  %2689 = vmatpush.msra.mxu1 %v2319_v1  ;;  %v1456_v1 = vld [vmem:[#allocation13 + $0x310] sm:$0xff]  ;;  %v236_v29 = vadd.f32 %v235_v41, %v227_v4 }
 0x16e   :  { %v2031_v5 = vld [vmem:[#allocation13 + $0x1508] sm:$0xff]  ;;  %2637 = vmatpush.msrb.mxu3 %v1871_v3  ;;  %v1167_v3 = vadd.f32 %v1166_v49, %v1147_v37  ;;  %v244_v37 = vsel %vm243_vm9, %v242_v21, 0.0  ;;  %v1592_v49 = vld [vmem:[#allocation13 + $0x750] sm:$0xff] }
 0x16f   :  { %v2143_v7 = vld [vmem:[#allocation13 + $0x1888] sm:$0xff]  ;;  %2653 = vmatpush.msra.mxu0 %v2031_v5  ;;  %2638 = vmatmul.f32.vlgmr.msrb.gmra.mxu3 %v4579_v55  ;;  %v1067_v55 = vadd.f32 %v4642_v59, %v1047_v63  ;;  %v292_v5 = vadd.f32 %v288_v62, %v278_v12  ;;  %v1206_v63 = vpop.f32.mrf.mxu2  ;;  %v1704_v12 = vld [vmem:[#allocation13 + $0xad0] sm:$0xff] }
 0x170   :  { %v2311_v10 = vld [vmem:[#allocation13 + $0x1dc8] sm:$0xff]  ;;  %2675 = vmatpush.msra.mxu2 %v2143_v7  ;;  %2702 = vmatpush.msra.mxu3 %v1480_v11  ;;  %v1728_v7 = vld [vmem:[#allocation13 + $0xb90] sm:$0xff] }
 0x171   :  { %v2023_v43 = vld [vmem:[#allocation13 + $0x14c8] sm:$0xff]  ;;  %2690 = vmatpush.msra.mxu1 %v2311_v10  ;;  %v1186_v10 = vpop.f32.mrf.mxu1  ;;  %v1087_v59 = vadd.f32 %v4649_v27, %v1067_v55  ;;  %v303_v18 = vadd.f32 %v301_v14, %v292_v5  ;;  %v315_v27 = vadd.f32 %v304_v44, %v4658_v31  ;;  %v1424_v14 = vld [vmem:[#allocation13 + $0x210] sm:$0xff] }
 0x172   :  { %v2135_v51 = vld [vmem:[#allocation13 + $0x1848] sm:$0xff]  ;;  %2654 = vmatpush.msra.mxu0 %v2023_v43  ;;  %2703 = vmatpush.msra.mxu3 %v1472_v32  ;;  %v4684_v43 = vpop.permute.xlu0 %341  ;;  %v1187_v24 = vadd.f32 %v1186_v10, %v1167_v3  ;;  %v1261_v32 = vrot.slane %v4679_v42, 5  ;;  %v1584_v3 = vld [vmem:[#allocation13 + $0x710] sm:$0xff] }
 0x173   :  { %v2303_v22 = vld [vmem:[#allocation13 + $0x1d88] sm:$0xff]  ;;  %2676 = vmatpush.msra.mxu2 %v2135_v51  ;;  %v1608_v51 = vld [vmem:[#allocation13 + $0x7d0] sm:$0xff]  ;;  %v4701_v28 = vadd.f32 %v4637_v45, %v1087_v59  ;;  %v4707_v45 = vpop.permute.xlu2 %261  ;;  %v334_v59 = vrot.slane %v330_v54, 7 }
 0x174   :  { %v2015_v26 = vld [vmem:[#allocation13 + $0x1488] sm:$0xff]  ;;  %2691 = vmatpush.msra.mxu1 %v2303_v22  ;;  %2704 = vmatpush.msra.mxu3 %v1464_v53  ;;  %v4691_v22 = vadd.f32 %v4629_v19, %v987_v61  ;;  %v1600_v19 = vld [vmem:[#allocation13 + $0x790] sm:$0xff] }
 0x175   :  { %v2127_v36 = vld [vmem:[#allocation13 + $0x1808] sm:$0xff]  ;;  %2655 = vmatpush.msra.mxu0 %v2015_v26  ;;  %v1247_v26 = vrot.slane %v4679_v42, 4  ;;  %v1696_v4 = vld [vmem:[#allocation13 + $0xa90] sm:$0xff]  ;;  %v1213_v5 = vrot.slane %v4701_v28, 1 }
 0x176   :  { %v2295_v39 = vld [vmem:[#allocation13 + $0x1d48] sm:$0xff]  ;;  %2677 = vmatpush.msra.mxu2 %v2127_v36  ;;  %2705 = vmatpush.msra.mxu3 %v1456_v1  ;;  %v1276_v36 = vrot.slane %v4679_v42, 6  ;;  %v1212_v52 = vrot.slane %v4691_v22, 1  ;;  %v1223_v44 = vrot.slane %v4691_v22, 2  ;;  %v1235_v61 = vrot.slane %v4691_v22, 3  ;;  %v1416_v10 = vld [vmem:[#allocation13 + $0x1d0] sm:$0xff] }
 0x177   :  { %v2007_v25 = vld [vmem:[#allocation13 + $0x1448] sm:$0xff]  ;;  %2692 = vmatpush.msra.mxu1 %v2295_v39  ;;  %2678 = vmatmul.f32.vlgmr.msra.gmra.mxu2 %v4586_v34  ;;  %v320_v34 = vsel %vm216_vm6, 0.0, %v318_v6  ;;  %v325_v6 = vadd.f32 %v315_v27, %v4658_v31  ;;  %v1248_v55 = vrot.slane %v4691_v22, 4  ;;  %v250_v1 = vsel %vm216_vm6, 0.0, %v4639_v56  ;;  %v1688_v21 = vld [vmem:[#allocation13 + $0xa50] sm:$0xff] }
 0x178   :  { %v2287_v58 = vld [vmem:[#allocation13 + $0x1d08] sm:$0xff]  ;;  %2742 = vmatpush.msrb.mxu2 %v1736_v40  ;;  %2656 = vmatpush.msra.mxu0 %v2007_v25  ;;  %v322_v39 = vrot.slane %v320_v34, 7  ;;  %v314_v40 = vadd.f32 %v312_v17, %v303_v18  ;;  %v4709_v25 = vadd.f32 %v1206_v63, %v1187_v24  ;;  %v4720_v2 = vadd.f32 %v1212_v52, %v4701_v28  ;;  %v4729_v18 = vpop.permute.xlu1 %269  ;;  %v1568_v63 = vld [vmem:[#allocation13 + $0x690] sm:$0xff] }
 0x179   :  { %v1999_v8 = vld [vmem:[#allocation13 + $0x1408] sm:$0xff]  ;;  %2693 = vmatpush.msra.mxu1 %v2287_v58  ;;  %2706 = vmatpush.msra.mxu3 %v1448_v46  ;;  %v245_v58 = vadd.f32 %v244_v37, %v236_v29  ;;  %v344_v17 = vsel %vm234_vm7, 0.0, %v4684_v43  ;;  %v265_v34 = vsel %vm232_vm4, %v4707_v45, 0.0  ;;  %v257_v24 = vsel %vm223_vm3, %v4633_v33, 0.0  ;;  %v1408_v29 = vld [vmem:[#allocation13 + $0x190] sm:$0xff] }
 0x17a   :  { %v2279_v11 = vld [vmem:[#allocation13 + $0x1cc8] sm:$0xff]  ;;  %2743 = vmatpush.msrb.mxu2 %v1728_v7  ;;  %2657 = vmatpush.msra.mxu0 %v1999_v8  ;;  %v1224_v7 = vrot.slane %v4701_v28, 2  ;;  %v1864_v8 = vld [vmem:[#allocation13 + $0xfd0] sm:$0xff]  ;;  %v324_v41 = vadd.f32 %v322_v39, %v314_v40  ;;  %v356_v56 = vpop.permute.xlu0 %355  ;;  %v348_v39 = vrot.slane %v344_v17, 7  ;;  %v1249_v52 = vrot.slane %v4701_v28, 4 }
 0x17b   :  { %v2271_v23 = vld [vmem:[#allocation13 + $0x1c88] sm:$0xff]  ;;  %2694 = vmatpush.msra.mxu1 %v2279_v11  ;;  %2658 = vmatmul.f32.vlgmr.msra.gmra.mxu0 %v4598_v47  ;;  %v345_v47 = vsel %vm232_vm4, %v4684_v43, 0.0  ;;  %v339_v11 = vadd.f32 %v335_v50, %v325_v6  ;;  %v359_v27 = vsel %vm241_vm8, %v356_v56, 0.0  ;;  %v1225_v43 = vrot.slane %v4709_v25, 2  ;;  %v1680_v37 = vld [vmem:[#allocation13 + $0xa10] sm:$0xff] }
 0x17c   :  { %2722 = vmatpush.msrb.mxu0 %v1608_v51  ;;  %2744 = vmatpush.msrb.mxu2 %v1720_v13  ;;  %v2263_v62 = vld [vmem:[#allocation13 + $0x1c48] sm:$0xff]  ;;  %v349_v46 = vrot.slane %v345_v47, 7  ;;  %v1214_v51 = vrot.slane %v4709_v25, 1  ;;  %v1236_v13 = vrot.slane %v4701_v28, 3  ;;  %v1219_v6 = vadd.f32 %v1213_v5, %v4709_v25  ;;  %v1672_v54 = vld [vmem:[#allocation13 + $0x9d0] sm:$0xff]  ;;  %v4747_v5 = vpop.permute.xlu2 %379 }
 0x17d   :  { %2695 = vmatpush.msra.mxu1 %v2271_v23  ;;  %2707 = vmatpush.msra.mxu3 %v1440_v30  ;;  %v2255_v53 = vld [vmem:[#allocation13 + $0x1c08] sm:$0xff]  ;;  %v251_v23 = vadd.f32 %v250_v1, %v245_v58  ;;  %v1237_v30 = vrot.slane %v4709_v25, 3  ;;  %v1263_v58 = vrot.slane %v4701_v28, 5  ;;  %v1840_v1 = vld [vmem:[#allocation13 + $0xf10] sm:$0xff]  ;;  %v1262_v17 = vrot.slane %v4691_v22, 5 }
 0x17e   :  { %2723 = vmatpush.msrb.mxu0 %v1600_v19  ;;  %2745 = vmatpush.msrb.mxu2 %v1712_v38  ;;  %v1250_v19 = vrot.slane %v4709_v25, 4  ;;  %v358_v38 = vsel %vm243_vm9, 0.0, %v356_v56  ;;  %v353_v40 = vadd.f32 %v349_v46, %v339_v11  ;;  %v1232_v50 = vadd.f32 %v1224_v7, %v1214_v51  ;;  %v1832_v56 = vld [vmem:[#allocation13 + $0xed0] sm:$0xff] }
 0x17f   :  { %2696 = vmatpush.msra.mxu1 %v2263_v62  ;;  %2708 = vmatpush.msra.mxu3 %v1432_v48  ;;  %v1848_v62 = vld [vmem:[#allocation13 + $0xf50] sm:$0xff]  ;;  %v1245_v7 = vadd.f32 %v1236_v13, %v1225_v43  ;;  %v1231_v51 = vadd.f32 %v1223_v44, %v1219_v6 }
 0x180   :  { %2724 = vmatpush.msrb.mxu0 %v1592_v49  ;;  %2746 = vmatpush.msrb.mxu2 %v1704_v12  ;;  %v1400_v48 = vld [vmem:[#allocation13 + $0x150] sm:$0xff]  ;;  %v363_v49 = vrot.slane %v359_v27, 7  ;;  %v1264_v12 = vrot.slane %v4709_v25, 5  ;;  %v1274_v11 = vadd.f32 %v1263_v58, %v1250_v19  ;;  %v1244_v13 = vadd.f32 %v1235_v61, %v1232_v50 }
 0x181   :  { %2697 = vmatpush.msra.mxu1 %v2255_v53  ;;  %2709 = vmatpush.msra.mxu3 %v1424_v14  ;;  %v1560_v53 = vld [vmem:[#allocation13 + $0x650] sm:$0xff]  ;;  %v1278_v14 = vrot.slane %v4701_v28, 6  ;;  %v264_v28 = vsel %vm234_vm7, 0.0, %v4707_v45  ;;  %v1258_v61 = vadd.f32 %v1248_v55, %v1245_v7  ;;  %v1290_v19 = vrot.slane %v4691_v22, 7 }
 0x182   :  { %2698 = vmatmul.f32.vlgmr.msra.gmra.mxu1 %v4604_v57  ;;  %v256_v57 = vsel %vm225_vm5, 0.0, %v4633_v33  ;;  %2725 = vmatpush.msrb.mxu0 %v1584_v3  ;;  %v338_v33 = vadd.f32 %v334_v59, %v324_v41  ;;  %v1392_v3 = vld [vmem:[#allocation13 + $0x110] sm:$0xff]  ;;  %v273_v59 = vsel %vm241_vm8, %v4729_v18, 0.0  ;;  %v4771_v55 = vadd.f32 %v1222_v35, %v4720_v2 }
 0x183   :  { %2747 = vmatpush.msrb.mxu2 %v1696_v4  ;;  %2762 = vmatpush.msrb.mxu1 %v1864_v8  ;;  %v258_v47 = vadd.f32 %v256_v57, %v251_v23  ;;  %v362_v4 = vrot.slane %v358_v38, 7  ;;  %v267_v8 = vadd.f32 %v265_v34, %v257_v24  ;;  %v1552_v25 = vld [vmem:[#allocation13 + $0x610] sm:$0xff]  ;;  %v1288_v27 = vadd.f32 %v1278_v14, %v1264_v12  ;;  %v4758_v23 = vpop.permute.xlu0 %461  ;;  %v1300_v12 = vld [vmem:[#allocation11] sm:$0xff] }
 0x184   :  { %2710 = vmatpush.msra.mxu3 %v1416_v10  ;;  %2726 = vmatpush.msrb.mxu0 %v1576_v60  ;;  %v1259_v10 = vadd.f32 %v1249_v52, %v1237_v30  ;;  %v1664_v41 = vld [vmem:[#allocation13 + $0x990] sm:$0xff]  ;;  %v352_v46 = vadd.f32 %v348_v39, %v338_v33  ;;  %v1289_v57 = vrot.slane %v4679_v42, 7  ;;  %v1277_v24 = vrot.slane %v4691_v22, 6 }
 0x185   :  { %2748 = vmatpush.msrb.mxu2 %v1688_v21  ;;  %2763 = vmatpush.msrb.mxu1 %v1856_v20  ;;  %v1384_v60 = vld [vmem:[#allocation13 + $0xd0] sm:$0xff]  ;;  %v367_v21 = vadd.f32 %v363_v49, %v353_v40  ;;  %v266_v38 = vadd.f32 %v264_v28, %v258_v47  ;;  %v1243_v22 = vadd.f32 %v1234_v15, %v1231_v51  ;;  %v272_v50 = vsel %vm243_vm9, 0.0, %v4729_v18 }
 0x186   :  { %2711 = vmatpush.msra.mxu3 %v1408_v29  ;;  %2727 = vmatpush.msrb.mxu0 %v1568_v63  ;;  %v1544_v34 = vld [vmem:[#allocation13 + $0x5d0] sm:$0xff]  ;;  %v275_v29 = vadd.f32 %v273_v59, %v267_v8  ;;  %v366_v43 = vadd.f32 %v362_v4, %v352_v46  ;;  %v1273_v30 = vadd.f32 %v1262_v17, %v1259_v10  ;;  %v1303_v14 = vperm.slane %v1300_v12, 1 }
 0x187   :  { %2749 = vmatpush.msrb.mxu2 %v1680_v37  ;;  %2764 = vmatpush.msrb.mxu1 %v1848_v62  ;;  %v1656_v45 = vld [vmem:[#allocation13 + $0x950] sm:$0xff]  ;;  %v4765_v62 = vpop.permute.xlu1 %469  ;;  %v1287_v33 = vadd.f32 %v1277_v24, %v1274_v11  ;;  %v372_v40 = vadd.f32 %v367_v21, %v4543_v9  ;;  %v1257_v49 = vadd.f32 %v1247_v26, %v1244_v13  ;;  %v1302_v10 = vperm.slane %v1300_v12, 0 }
 0x188   :  { %2712 = vmatpush.msra.mxu3 %v1400_v48  ;;  %2728 = vmatpush.msrb.mxu0 %v1560_v53  ;;  %v1824_v20 = vld [vmem:[#allocation13 + $0xe90] sm:$0xff]  ;;  %v1299_v6 = vadd.f32 %v1290_v19, %v1288_v27  ;;  %v277_v35 = vadd.f32 %v275_v29, %v4518_v0  ;;  %v371_v2 = vadd.f32 %v366_v43, %v4658_v31  ;;  %v473_v26 = vsel %vm216_vm6, %v4765_v62, 0.0 }
 0x189   :  { %2750 = vmatpush.msrb.mxu2 %v1672_v54  ;;  %2765 = vmatpush.msrb.mxu1 %v1840_v1  ;;  %v1376_v44 = vld [vmem:[#allocation13 + $0x90] sm:$0xff]  ;;  %v465_v54 = vsel %vm232_vm4, %v4758_v23, 0.0  ;;  %v1272_v18 = vadd.f32 %v1261_v32, %v1258_v61  ;;  %v1286_v47 = vadd.f32 %v1276_v36, %v1273_v30  ;;  %v1308_v31 = vperm.slane %v1300_v12, 6 }
 0x18a   :  { %2713 = vmatpush.msra.mxu3 %v1392_v3  ;;  %2729 = vmatpush.msrb.mxu0 %v1552_v25  ;;  %v1536_v63 = vld [vmem:[#allocation13 + $0x590] sm:$0xff]  ;;  %v1298_v1 = vadd.f32 %v1289_v57, %v1287_v33  ;;  %v274_v3 = vadd.f32 %v272_v50, %v266_v38  ;;  %v375_v7 = vsel %vm373_vm10, %v277_v35, %v372_v40  ;;  %v4790_v25 = vpop.permute.xlu2 %477  ;;  %v1305_v59 = vperm.slane %v1300_v12, 3 }
 0x18b   :  { %2751 = vmatpush.msrb.mxu2 %v1664_v41  ;;  %2766 = vmatpush.msrb.mxu1 %v1832_v56  ;;  %v1648_v37 = vld [vmem:[#allocation13 + $0x910] sm:$0xff]  ;;  %v475_v36 = vadd.f32 %v473_v26, %v465_v54  ;;  %v1304_v41 = vperm.slane %v1300_v12, 2  ;;  %v1306_v28 = vperm.slane %v1300_v12, 4  ;;  %v1317_v21 = vmul.f32 %v1303_v14, %v1243_v22 }
 0x18c   :  { %2714 = vmatpush.msra.mxu3 %v1384_v60  ;;  %2730 = vmatpush.msrb.mxu0 %v1544_v34  ;;  %v1816_v39 = vld [vmem:[#allocation13 + $0xe50] sm:$0xff]  ;;  %v374_v56 = vsel %vm373_vm10, %v274_v3, %v371_v2  ;;  %v1307_v60 = vperm.slane %v1300_v12, 5  ;;  %v1322_v51 = vmul.f32 %v1308_v31, %v1299_v6  ;;  %v484_v27 = vrot.slane %v4546_v16, 4  ;;  %v4794_v34 = vpop.permute.xlu0 %489 }
 0x18d   :  { %2752 = vmatpush.msrb.mxu2 %v1656_v45  ;;  %v1368_v48 = vld [vmem:[#allocation13 + $0x50] sm:$0xff]  ;;  %2767 = vmatpush.msrb.mxu1 %v1824_v20  ;;  %v1318_v45 = vmul.f32 %v1304_v41, %v1257_v49  ;;  %v1319_v57 = vmul.f32 %v1305_v59, %v1272_v18  ;;  %v1320_v24 = vmul.f32 %v1306_v28, %v1286_v47  ;;  %v481_v20 = vsel %vm234_vm7, %v4790_v25, 0.0 }
 0x18e   :  { %2715 = vmatpush.msra.mxu3 %v1376_v44  ;;  %v1528_v9 = vld [vmem:[#allocation13 + $0x550] sm:$0xff]  ;;  %2731 = vmatpush.msrb.mxu0 %v1536_v63  ;;  %v1316_v43 = vmul.f32 %v1302_v10, %v4771_v55  ;;  %v1321_v61 = vmul.f32 %v1307_v60, %v1298_v1  ;;  %v1330_v30 = vrot.slane %v1317_v21, 7  ;;  %v483_v19 = vadd.f32 %v481_v20, %v475_v36 }
 0x18f   :  { %v1640_v52 = vld [vmem:[#allocation13 + $0x8d0] sm:$0xff]  ;;  %2753 = vmatpush.msrb.mxu2 %v1648_v37  ;;  %2768 = vmatpush.msrb.mxu1 %v1816_v39  ;;  %v383_v38 = vmul.f32 %v4747_v5, %v375_v7  ;;  %v1331_v33 = vrot.slane %v1318_v45, 6  ;;  %v1332_v39 = vrot.slane %v1319_v57, 5  ;;  %v382_v22 = vmul.f32 %v4747_v5, %v374_v56  ;;  %v499_v1 = vpop.permute.xlu1 %498 }
 0x190   :  { %v1808_v53 = vld [vmem:[#allocation13 + $0xe10] sm:$0xff]  ;;  %2716 = vmatpush.msra.mxu3 %v1368_v48  ;;  %2732 = vmatpush.msrb.mxu0 %v1528_v9  ;;  %v492_v55 = vsel %vm232_vm4, 0.0, %v4794_v34  ;;  %v1333_v49 = vrot.slane %v1320_v24, 4  ;;  %v1334_v6 = vrot.slane %v1321_v61, 3  ;;  %v524_v9 = vlaneseq }
 0x191   :  { %v1360_v15 = vld [vmem:[#allocation13 + $0x10] sm:$0xff]  ;;  %2754 = vmatpush.msrb.mxu2 %v1640_v52  ;;  %2769 = vmatpush.msrb.mxu1 %v1808_v53  ;;  %v1335_v52 = vrot.slane %v1322_v51, 2  ;;  %v1336_v12 = vsel %vm373_vm10, %v1316_v43, %v1330_v30  ;;  %v1338_v2 = vsel %vm1337_vm11, %v1331_v33, %v1332_v39  ;;  %v464_v18 = vsel %vm232_vm4, 0.0, %v4758_v23 }
 0x192   :  { %v1520_v58 = vld [vmem:[#allocation13 + $0x510] sm:$0xff]  ;;  %2717 = vmatpush.msra.mxu3 %v1360_v15  ;;  %v487_v15 = vadd.f32 %v484_v27, %v483_v19  ;;  %v1339_v26 = vsel %vm186_vm0, %v1336_v12, %v1338_v2  ;;  %v1341_v54 = vsel %vm1340_vm12, %v1333_v49, %v1334_v6  ;;  %388 = vrot.lane.b32.xlu0 %v383_v38, %s4328_s24  ;;  %vm1347_vm15 = vcmp.lt.s32.totalorder %v524_v9, 896 }
 0x193   :  { %v1632_v0 = vld [vmem:[#allocation13 + $0x890] sm:$0xff]  ;;  %2733 = vmatpush.msrb.mxu0 %v1520_v58  ;;  %386 = vrot.lane.b32.xlu2 %v382_v22, %s4328_s24  ;;  %v466_v7 = vadd.f32 %v464_v18, %v4546_v16  ;;  %v501_v41 = vsel %vm216_vm6, 0.0, %v499_v1  ;;  %v493_v16 = vsel %vm232_vm4, %v4794_v34, 0.0  ;;  %vm526_vm1 = vcmp.lt.s32.totalorder %v524_v9, 320 }
 0x194   :  { %v1800_v4 = vld [vmem:[#allocation13 + $0xdd0] sm:$0xff]  ;;  %2755 = vmatpush.msrb.mxu2 %v1632_v0  ;;  %v1343_v0 = vsel %vm1342_vm13, %v1341_v54, %v1335_v52  ;;  %v495_v3 = vadd.f32 %v492_v55, %v487_v15  ;;  %v504_v45 = vadd.f32 %v499_v1, %v493_v16  ;;  %v1473_v16 = vld [vmem:[#allocation13 + $0x398] sm:$0xff] }
 0x195   :  { %v1992_v8 = vld [vmem:[#allocation13 + $0x13d0] sm:$0xff]  ;;  %2770 = vmatpush.msrb.mxu1 %v1800_v4  ;;  %v1345_v4 = vsel %vm1344_vm14, %v1339_v26, %v1343_v0 }
 0x196   :  { %v1512_v42 = vld [vmem:[#allocation13 + $0x4d0] sm:$0xff]  ;;  %2782 = vmatpush.msrb.mxu3 %v1992_v8  ;;  %1349 = vst.msk [vmem:[%s5124_s14] sm:$0x7f] %vm1347_vm15, %v1345_v4 }
 0x197   :  { %v1624_v32 = vld [vmem:[#allocation13 + $0x850] sm:$0xff]  ;;  %2734 = vmatpush.msrb.mxu0 %v1512_v42 }
 0x198   :  { %v1792_v11 = vld [vmem:[#allocation13 + $0xd90] sm:$0xff]  ;;  %2756 = vmatpush.msrb.mxu2 %v1624_v32  ;;  %v472_v32 = vsel %vm216_vm6, 0.0, %v4765_v62 }
 0x199   :  { %v1984_v46 = vld [vmem:[#allocation13 + $0x1390] sm:$0xff]  ;;  %2771 = vmatpush.msrb.mxu1 %v1792_v11  ;;  %v474_v51 = vadd.f32 %v472_v32, %v466_v7  ;;  %v1481_v7 = vld [vmem:[#allocation13 + $0x3d8] sm:$0xff] }
 0x19a   :  { %v1504_v13 = vld [vmem:[#allocation13 + $0x490] sm:$0xff]  ;;  %2783 = vmatpush.msrb.mxu3 %v1984_v46  ;;  %v503_v46 = vadd.f32 %v501_v41, %v495_v3  ;;  %v2439_v41 = vpop.f32.mrf.mxu2 }
 0x19b   :  { %v1616_v17 = vld [vmem:[#allocation13 + $0x810] sm:$0xff]  ;;  %2735 = vmatpush.msrb.mxu0 %v1504_v13 }
 0x19c   :  { %v1784_v44 = vld [vmem:[#allocation13 + $0xd50] sm:$0xff]  ;;  %2757 = vmatpush.msrb.mxu2 %v1616_v17 }
 0x19d   :  { %v1976_v29 = vld [vmem:[#allocation13 + $0x1350] sm:$0xff]  ;;  %2772 = vmatpush.msrb.mxu1 %v1784_v44 }
 0x19e   :  { %v2248_v63 = vld [vmem:[#allocation13 + $0x1bd0] sm:$0xff]  ;;  %2784 = vmatpush.msrb.mxu3 %v1976_v29  ;;  %v480_v29 = vsel %vm234_vm7, 0.0, %v4790_v25 }
 0x19f   :  { %v1496_v37 = vld [vmem:[#allocation13 + $0x450] sm:$0xff]  ;;  %2822 = vmatpush.msra.mxu2 %v2248_v63  ;;  %v482_v19 = vadd.f32 %v480_v29, %v474_v51  ;;  %v4847_v51 = vld [vmem:[%s5119_s9 + $0x20] sm:$0x3f] }
 0x1a0   :  { %v1776_v40 = vld [vmem:[#allocation13 + $0xd10] sm:$0xff]  ;;  %2736 = vmatpush.msrb.mxu0 %v1496_v37 }
 0x1a1   :  { %v1968_v48 = vld [vmem:[#allocation13 + $0x1310] sm:$0xff]  ;;  %2773 = vmatpush.msrb.mxu1 %v1776_v40 }
 0x1a2   :  { %v2240_v50 = vld [vmem:[#allocation13 + $0x1b90] sm:$0xff]  ;;  %2785 = vmatpush.msrb.mxu3 %v1968_v48 }
 0x1a3   :  { %v1488_v35 = vld [vmem:[#allocation13 + $0x410] sm:$0xff]  ;;  %2823 = vmatpush.msra.mxu2 %v2240_v50 }
 0x1a4   :  { %v1768_v5 = vld [vmem:[#allocation13 + $0xcd0] sm:$0xff]  ;;  %2737 = vmatpush.msrb.mxu0 %v1488_v35 }
 0x1a5   :  { %v1960_v53 = vld [vmem:[#allocation13 + $0x12d0] sm:$0xff]  ;;  %2774 = vmatpush.msrb.mxu1 %v1768_v5 }
 0x1a6   :  { %v2120_v47 = vld [vmem:[#allocation13 + $0x17d0] sm:$0xff]  ;;  %2786 = vmatpush.msrb.mxu3 %v1960_v53 }
 0x1a7   :  { %v2232_v58 = vld [vmem:[#allocation13 + $0x1b50] sm:$0xff]  ;;  %2802 = vmatpush.msra.mxu0 %v2120_v47  ;;  %v4829_v47 = vld [vmem:[%s5119_s9] sm:$0x3f] }
 0x1a8   :  { %v1760_v14 = vld [vmem:[#allocation13 + $0xc90] sm:$0xff]  ;;  %2824 = vmatpush.msra.mxu2 %v2232_v58  ;;  %2718 = vmatmul.f32.vlgmr.msra.gmra.mxu3 %v4829_v47 }
 0x1a9   :  { %v1952_v31 = vld [vmem:[#allocation13 + $0x1290] sm:$0xff]  ;;  %2775 = vmatpush.msrb.mxu1 %v1760_v14  ;;  %v2399_v14 = vpop.f32.mrf.mxu3 }
 0x1aa   :  { %v2112_v23 = vld [vmem:[#allocation13 + $0x1790] sm:$0xff]  ;;  %2787 = vmatpush.msrb.mxu3 %v1952_v31 }
 0x1ab   :  { %v2224_v8 = vld [vmem:[#allocation13 + $0x1b10] sm:$0xff]  ;;  %2803 = vmatpush.msra.mxu0 %v2112_v23  ;;  %v2419_v23 = vpop.f32.mrf.mxu0 }
 0x1ac   :  { %v1752_v10 = vld [vmem:[#allocation13 + $0xc50] sm:$0xff]  ;;  %2825 = vmatpush.msra.mxu2 %v2224_v8 }
 0x1ad   :  { %v1944_v42 = vld [vmem:[#allocation13 + $0x1250] sm:$0xff]  ;;  %2776 = vmatpush.msrb.mxu1 %v1752_v10  ;;  %v2420_v10 = vadd.f32 %v2419_v23, %v2399_v14  ;;  %v1857_v14 = vld [vmem:[#allocation13 + $0xf98] sm:$0xff] }
 0x1ae   :  { %v505_v36 = vld [vmem:[#allocation8] sm:$0x7]  ;;  %2788 = vmatpush.msrb.mxu3 %v1944_v42  ;;  %v1561_v23 = vld [vmem:[#allocation13 + $0x658] sm:$0xff] }
 0x1af   :  { %v2104_v59 = vld [vmem:[#allocation13 + $0x1750] sm:$0xff]  ;;  %v508_v11 = vperm.slane %v505_v36, 1  ;;  %v509_v27 = vperm.slane %v505_v36, 2  ;;  %v507_v30 = vperm.slane %v505_v36, 0 }
 0x1b0   :  { %v2216_v28 = vld [vmem:[#allocation13 + $0x1ad0] sm:$0xff]  ;;  %2804 = vmatpush.msra.mxu0 %v2104_v59 }
 0x1b1   :  { %v1744_v56 = vld [vmem:[#allocation13 + $0xc10] sm:$0xff]  ;;  %2826 = vmatpush.msra.mxu2 %v2216_v28  ;;  %v514_v20 = vmul.f32 %v508_v11, %v503_v46  ;;  %v515_v38 = vmul.f32 %v509_v27, %v504_v45  ;;  %v513_v49 = vmul.f32 %v507_v30, %v482_v19  ;;  %v2440_v28 = vadd.f32 %v2439_v41, %v2420_v10  ;;  %v2479_v45 = vpop.f32.mrf.mxu3  ;;  %v1449_v30 = vld [vmem:[#allocation13 + $0x2d8] sm:$0xff] }
 0x1b2   :  { %v1936_v60 = vld [vmem:[#allocation13 + $0x1210] sm:$0xff]  ;;  %2777 = vmatpush.msrb.mxu1 %v1744_v56  ;;  %v4841_v56 = vld [vmem:[%s5119_s9 + $0x8] sm:$0x3f]  ;;  %v1393_v10 = vld [vmem:[#allocation13 + $0x118] sm:$0xff] }
 0x1b3   :  { %v2096_v21 = vld [vmem:[#allocation13 + $0x1710] sm:$0xff]  ;;  %2789 = vmatpush.msrb.mxu3 %v1936_v60  ;;  %v519_v40 = vrot.slane %v514_v20, 7  ;;  %v520_v52 = vrot.slane %v515_v38, 6  ;;  %2738 = vmatmul.f32.vlgmr.msrb.gmra.mxu0 %v4841_v56  ;;  %v2499_v29 = vpop.f32.mrf.mxu0  ;;  %v1609_v38 = vld [vmem:[#allocation13 + $0x7d8] sm:$0xff] }
 0x1b4   :  { %v2208_v62 = vld [vmem:[#allocation13 + $0x1a90] sm:$0xff]  ;;  %2805 = vmatpush.msra.mxu0 %v2096_v21  ;;  %v1737_v21 = vld [vmem:[#allocation13 + $0xbd8] sm:$0xff] }
 0x1b5   :  { %v2376_v13 = vld [vmem:[#allocation13 + $0x1fd0] sm:$0xff]  ;;  %2827 = vmatpush.msra.mxu2 %v2208_v62  ;;  %v521_v5 = vsel %vm373_vm10, %v513_v49, %v519_v40  ;;  %v2459_v62 = vpop.f32.mrf.mxu1  ;;  %v1833_v41 = vld [vmem:[#allocation13 + $0xed8] sm:$0xff] }
 0x1b6   :  { %v1928_v17 = vld [vmem:[#allocation13 + $0x11d0] sm:$0xff]  ;;  %2842 = vmatpush.msra.mxu1 %v2376_v13  ;;  %v522_v26 = vsel %vm186_vm0, %v521_v5, %v520_v52  ;;  %v1465_v13 = vld [vmem:[#allocation13 + $0x358] sm:$0xff]  ;;  %v2460_v27 = vadd.f32 %v2459_v62, %v2440_v28 }
 0x1b7   :  { %v2088_v57 = vld [vmem:[#allocation13 + $0x16d0] sm:$0xff]  ;;  %2790 = vmatpush.msrb.mxu3 %v1928_v17  ;;  %528 = vst.msk [vmem:[#allocation17] sm:$0x7] %vm526_vm1, %v522_v26  ;;  %v1593_v52 = vld [vmem:[#allocation13 + $0x758] sm:$0xff] }
 0x1b8   :  { %v2200_v24 = vld [vmem:[#allocation13 + $0x1a50] sm:$0xff]  ;;  %2806 = vmatpush.msra.mxu0 %v2088_v57  ;;  %v2480_v20 = vadd.f32 %v2479_v45, %v2460_v27  ;;  %v1425_v5 = vld [vmem:[#allocation13 + $0x218] sm:$0xff]  ;;  %3933 = dma.vmem_to_hbm [thread:$0]  %s3929_s19, 48, %s3931_s0, [#allocation18]  }
 0x1b9   :  { %v2368_v34 = vld [vmem:[#allocation13 + $0x1f90] sm:$0xff]  ;;  %2828 = vmatpush.msra.mxu2 %v2200_v24  ;;  %v1457_v24 = vld [vmem:[#allocation13 + $0x318] sm:$0xff] }
 0x1ba   :  { %v1920_v44 = vld [vmem:[#allocation13 + $0x1190] sm:$0xff]  ;;  %2843 = vmatpush.msra.mxu1 %v2368_v34  ;;  %v1729_v34 = vld [vmem:[#allocation13 + $0xb98] sm:$0xff]  ;;  %v2500_v19 = vadd.f32 %v2499_v29, %v2480_v20 }
 0x1bb   :  { %v2080_v43 = vld [vmem:[#allocation13 + $0x1690] sm:$0xff]  ;;  %2791 = vmatpush.msrb.mxu3 %v1920_v44  ;;  %v1865_v26 = vld [vmem:[#allocation13 + $0xfd8] sm:$0xff] }
 0x1bc   :  { %v2192_v61 = vld [vmem:[#allocation13 + $0x1a10] sm:$0xff]  ;;  %2807 = vmatpush.msra.mxu0 %v2080_v43  ;;  %v1545_v28 = vld [vmem:[#allocation13 + $0x5d8] sm:$0xff] }
 0x1bd   :  { %v2360_v63 = vld [vmem:[#allocation13 + $0x1f50] sm:$0xff]  ;;  %2829 = vmatpush.msra.mxu2 %v2192_v61  ;;  %v2539_v49 = vpop.f32.mrf.mxu1  ;;  %v1817_v62 = vld [vmem:[#allocation13 + $0xe58] sm:$0xff] }
 0x1be   :  { %v1912_v37 = vld [vmem:[#allocation13 + $0x1150] sm:$0xff]  ;;  %2844 = vmatpush.msra.mxu1 %v2360_v63  ;;  %v2519_v63 = vpop.f32.mrf.mxu2  ;;  %v1641_v27 = vld [vmem:[#allocation13 + $0x8d8] sm:$0xff] }
 0x1bf   :  { %v2072_v33 = vld [vmem:[#allocation13 + $0x1650] sm:$0xff]  ;;  %2792 = vmatpush.msrb.mxu3 %v1912_v37  ;;  %v4859_v37 = vld [vmem:[%s5119_s9 + $0x18] sm:$0x3f]  ;;  %v2520_v40 = vadd.f32 %v2519_v63, %v2500_v19 }
 0x1c0   :  { %v2184_v39 = vld [vmem:[#allocation13 + $0x19d0] sm:$0xff]  ;;  %2808 = vmatpush.msra.mxu0 %v2072_v33  ;;  %2778 = vmatmul.f32.vlgmr.msrb.gmra.mxu1 %v4859_v37  ;;  %v1721_v33 = vld [vmem:[#allocation13 + $0xb58] sm:$0xff] }
 0x1c1   :  { %v2352_v48 = vld [vmem:[#allocation13 + $0x1f10] sm:$0xff]  ;;  %2830 = vmatpush.msra.mxu2 %v2184_v39  ;;  %v1809_v45 = vld [vmem:[#allocation13 + $0xe18] sm:$0xff] }
 0x1c2   :  { %v1904_v25 = vld [vmem:[#allocation13 + $0x1110] sm:$0xff]  ;;  %2845 = vmatpush.msra.mxu1 %v2352_v48  ;;  %v1441_v48 = vld [vmem:[#allocation13 + $0x298] sm:$0xff] }
 0x1c3   :  { %v2064_v22 = vld [vmem:[#allocation13 + $0x1610] sm:$0xff]  ;;  %2793 = vmatpush.msrb.mxu3 %v1904_v25  ;;  %v1601_v25 = vld [vmem:[#allocation13 + $0x798] sm:$0xff] }
 0x1c4   :  { %v2176_v55 = vld [vmem:[#allocation13 + $0x1990] sm:$0xff]  ;;  %2809 = vmatpush.msra.mxu0 %v2064_v22  ;;  %v1713_v22 = vld [vmem:[#allocation13 + $0xb18] sm:$0xff] }
 0x1c5   :  { %v2344_v6 = vld [vmem:[#allocation13 + $0x1ed0] sm:$0xff]  ;;  %2831 = vmatpush.msra.mxu2 %v2176_v55  ;;  %v1633_v20 = vld [vmem:[#allocation13 + $0x898] sm:$0xff] }
 0x1c6   :  { %v1896_v50 = vld [vmem:[#allocation13 + $0x10d0] sm:$0xff]  ;;  %2846 = vmatpush.msra.mxu1 %v2344_v6  ;;  %v4865_v6 = vld [vmem:[%s5119_s9 + $0x28] sm:$0x3f]  ;;  %v1513_v29 = vld [vmem:[#allocation13 + $0x4d8] sm:$0xff] }
 0x1c7   :  { %v2056_v12 = vld [vmem:[#allocation13 + $0x15d0] sm:$0xff]  ;;  %2794 = vmatpush.msrb.mxu3 %v1896_v50  ;;  %v1433_v50 = vld [vmem:[#allocation13 + $0x258] sm:$0xff] }
 0x1c8   :  { %v2168_v35 = vld [vmem:[#allocation13 + $0x1950] sm:$0xff]  ;;  %2810 = vmatpush.msra.mxu0 %v2056_v12  ;;  %v4868_v12 = vadd.f32 %v2539_v49, %v2520_v40  ;;  %v1985_v19 = vld [vmem:[#allocation13 + $0x1398] sm:$0xff] }
 0x1c9   :  { %v2336_v2 = vld [vmem:[#allocation13 + $0x1e90] sm:$0xff]  ;;  %2832 = vmatpush.msra.mxu2 %v2168_v35  ;;  %v1705_v35 = vld [vmem:[#allocation13 + $0xad8] sm:$0xff] }
 0x1ca   :  { %v1888_v53 = vld [vmem:[#allocation13 + $0x1090] sm:$0xff]  ;;  %2847 = vmatpush.msra.mxu1 %v2336_v2  ;;  %v1505_v63 = vld [vmem:[#allocation13 + $0x498] sm:$0xff] }
 0x1cb   :  { %v2048_v15 = vld [vmem:[#allocation13 + $0x1590] sm:$0xff]  ;;  %2795 = vmatpush.msrb.mxu3 %v1888_v53  ;;  %v1585_v53 = vld [vmem:[#allocation13 + $0x718] sm:$0xff] }
 0x1cc   :  { %v2160_v54 = vld [vmem:[#allocation13 + $0x1910] sm:$0xff]  ;;  %2811 = vmatpush.msra.mxu0 %v2048_v15  ;;  %v1697_v15 = vld [vmem:[#allocation13 + $0xa98] sm:$0xff] }
 0x1cd   :  { %v2328_v18 = vld [vmem:[#allocation13 + $0x1e50] sm:$0xff]  ;;  %2833 = vmatpush.msra.mxu2 %v2160_v54  ;;  %v1417_v54 = vld [vmem:[#allocation13 + $0x1d8] sm:$0xff] }
 0x1ce   :  { %v1880_v58 = vld [vmem:[#allocation13 + $0x1050] sm:$0xff]  ;;  %2848 = vmatpush.msra.mxu1 %v2328_v18  ;;  %v4873_v18 = vld [vmem:[%s5119_s9 + $0x38] sm:$0x3f] }
 0x1cf   :  { %v2040_v0 = vld [vmem:[#allocation13 + $0x1550] sm:$0xff]  ;;  %2796 = vmatpush.msrb.mxu3 %v1880_v58  ;;  %v1577_v58 = vld [vmem:[#allocation13 + $0x6d8] sm:$0xff] }
 0x1d0   :  { %v2152_v31 = vld [vmem:[#allocation13 + $0x18d0] sm:$0xff]  ;;  %2812 = vmatpush.msra.mxu0 %v2040_v0  ;;  %v1689_v0 = vld [vmem:[#allocation13 + $0xa58] sm:$0xff] }
 0x1d1   :  { %v2320_v9 = vld [vmem:[#allocation13 + $0x1e10] sm:$0xff]  ;;  %2834 = vmatpush.msra.mxu2 %v2152_v31  ;;  %v1409_v31 = vld [vmem:[#allocation13 + $0x198] sm:$0xff] }
 0x1d2   :  { %v1872_v1 = vld [vmem:[#allocation13 + $0x1010] sm:$0xff]  ;;  %2849 = vmatpush.msra.mxu1 %v2320_v9  ;;  %v1569_v9 = vld [vmem:[#allocation13 + $0x698] sm:$0xff] }
 0x1d3   :  { %v2032_v3 = vld [vmem:[#allocation13 + $0x1510] sm:$0xff]  ;;  %2797 = vmatpush.msrb.mxu3 %v1872_v1  ;;  %v1681_v1 = vld [vmem:[#allocation13 + $0xa18] sm:$0xff] }
 0x1d4   :  { %v2144_v4 = vld [vmem:[#allocation13 + $0x1890] sm:$0xff]  ;;  %2813 = vmatpush.msra.mxu0 %v2032_v3  ;;  %2798 = vmatmul.f32.vlgmr.msrb.gmra.mxu3 %v4847_v51  ;;  %v1849_v3 = vld [vmem:[#allocation13 + $0xf58] sm:$0xff] }
 0x1d5   :  { %v2312_v8 = vld [vmem:[#allocation13 + $0x1dd0] sm:$0xff]  ;;  %2835 = vmatpush.msra.mxu2 %v2144_v4  ;;  %2862 = vmatpush.msra.mxu3 %v1481_v7  ;;  %v1401_v4 = vld [vmem:[#allocation13 + $0x158] sm:$0xff] }
 0x1d6   :  { %v4835_v42 = vld [vmem:[%s5119_s9 + $0x10] sm:$0x3f]  ;;  %2850 = vmatpush.msra.mxu1 %v2312_v8  ;;  %v1673_v8 = vld [vmem:[#allocation13 + $0x9d8] sm:$0xff] }
 0x1d7   :  { %2758 = vmatmul.f32.vlgmr.msrb.gmra.mxu2 %v4835_v42  ;;  %v2024_v32 = vld [vmem:[#allocation13 + $0x14d0] sm:$0xff]  ;;  %2863 = vmatpush.msra.mxu3 %v1473_v16  ;;  %v1841_v7 = vld [vmem:[#allocation13 + $0xf18] sm:$0xff] }
 0x1d8   :  { %v2136_v36 = vld [vmem:[#allocation13 + $0x1850] sm:$0xff]  ;;  %2814 = vmatpush.msra.mxu0 %v2024_v32  ;;  %v1553_v32 = vld [vmem:[#allocation13 + $0x618] sm:$0xff] }
 0x1d9   :  { %v2304_v59 = vld [vmem:[#allocation13 + $0x1d90] sm:$0xff]  ;;  %2836 = vmatpush.msra.mxu2 %v2136_v36  ;;  %2864 = vmatpush.msra.mxu3 %v1465_v13  ;;  %v1665_v36 = vld [vmem:[#allocation13 + $0x998] sm:$0xff] }
 0x1da   :  { %v2016_v11 = vld [vmem:[#allocation13 + $0x1490] sm:$0xff]  ;;  %2851 = vmatpush.msra.mxu1 %v2304_v59  ;;  %v1385_v59 = vld [vmem:[#allocation13 + $0xd8] sm:$0xff] }
 0x1db   :  { %v2128_v46 = vld [vmem:[#allocation13 + $0x1810] sm:$0xff]  ;;  %2815 = vmatpush.msra.mxu0 %v2016_v11  ;;  %2865 = vmatpush.msra.mxu3 %v1457_v24  ;;  %v1657_v11 = vld [vmem:[#allocation13 + $0x958] sm:$0xff] }
 0x1dc   :  { %v2296_v60 = vld [vmem:[#allocation13 + $0x1d50] sm:$0xff]  ;;  %2837 = vmatpush.msra.mxu2 %v2128_v46  ;;  %v1825_v16 = vld [vmem:[#allocation13 + $0xe98] sm:$0xff] }
 0x1dd   :  { %v2008_v17 = vld [vmem:[#allocation13 + $0x1450] sm:$0xff]  ;;  %2852 = vmatpush.msra.mxu1 %v2296_v60  ;;  %2866 = vmatpush.msra.mxu3 %v1449_v30  ;;  %v1377_v46 = vld [vmem:[#allocation13 + $0x98] sm:$0xff] }
 0x1de   :  { %v2288_v57 = vld [vmem:[#allocation13 + $0x1d10] sm:$0xff]  ;;  %2902 = vmatpush.msrb.mxu2 %v1737_v21  ;;  %2816 = vmatpush.msra.mxu0 %v2008_v17  ;;  %v1537_v60 = vld [vmem:[#allocation13 + $0x598] sm:$0xff] }
 0x1df   :  { %v2000_v44 = vld [vmem:[#allocation13 + $0x1410] sm:$0xff]  ;;  %2853 = vmatpush.msra.mxu1 %v2288_v57  ;;  %2867 = vmatpush.msra.mxu3 %v1441_v48  ;;  %v1649_v21 = vld [vmem:[#allocation13 + $0x918] sm:$0xff] }
 0x1e0   :  { %v4853_v43 = vld [vmem:[%s5119_s9 + $0x30] sm:$0x3f]  ;;  %2903 = vmatpush.msrb.mxu2 %v1729_v34  ;;  %2817 = vmatpush.msra.mxu0 %v2000_v44  ;;  %v1369_v13 = vld [vmem:[#allocation13 + $0x58] sm:$0xff] }
 0x1e1   :  { %2838 = vmatmul.f32.vlgmr.msra.gmra.mxu2 %v4853_v43  ;;  %v2280_v61 = vld [vmem:[#allocation13 + $0x1cd0] sm:$0xff]  ;;  %2818 = vmatmul.f32.vlgmr.msra.gmra.mxu0 %v4865_v6  ;;  %v1529_v17 = vld [vmem:[#allocation13 + $0x558] sm:$0xff] }
 0x1e2   :  { %v2272_v39 = vld [vmem:[#allocation13 + $0x1c90] sm:$0xff]  ;;  %2854 = vmatpush.msra.mxu1 %v2280_v61  ;;  %2882 = vmatpush.msrb.mxu0 %v1609_v38  ;;  %v1361_v57 = vld [vmem:[#allocation13 + $0x18] sm:$0xff] }
 0x1e3   :  { %2904 = vmatpush.msrb.mxu2 %v1721_v33  ;;  %v2264_v55 = vld [vmem:[#allocation13 + $0x1c50] sm:$0xff]  ;;  %2868 = vmatpush.msra.mxu3 %v1433_v50  ;;  %v1521_v24 = vld [vmem:[#allocation13 + $0x518] sm:$0xff] }
 0x1e4   :  { %2855 = vmatpush.msra.mxu1 %v2272_v39  ;;  %2883 = vmatpush.msrb.mxu0 %v1601_v25  ;;  %v2256_v2 = vld [vmem:[#allocation13 + $0x1c10] sm:$0xff]  ;;  %v1801_v34 = vld [vmem:[#allocation13 + $0xdd8] sm:$0xff] }
 0x1e5   :  { %2905 = vmatpush.msrb.mxu2 %v1713_v22  ;;  %2869 = vmatpush.msra.mxu3 %v1425_v5  ;;  %v1993_v44 = vld [vmem:[#allocation13 + $0x13d8] sm:$0xff] }
 0x1e6   :  { %2856 = vmatpush.msra.mxu1 %v2264_v55  ;;  %2884 = vmatpush.msrb.mxu0 %v1593_v52  ;;  %v1625_v61 = vld [vmem:[#allocation13 + $0x858] sm:$0xff] }
 0x1e7   :  { %2906 = vmatpush.msrb.mxu2 %v1705_v35  ;;  %2870 = vmatpush.msra.mxu3 %v1417_v54  ;;  %v1793_v30 = vld [vmem:[#allocation13 + $0xd98] sm:$0xff] }
 0x1e8   :  { %2857 = vmatpush.msra.mxu1 %v2256_v2  ;;  %2885 = vmatpush.msrb.mxu0 %v1585_v53  ;;  %v1617_v38 = vld [vmem:[#allocation13 + $0x818] sm:$0xff] }
 0x1e9   :  { %2858 = vmatmul.f32.vlgmr.msra.gmra.mxu1 %v4873_v18  ;;  %2907 = vmatpush.msrb.mxu2 %v1697_v15  ;;  %v1785_v33 = vld [vmem:[#allocation13 + $0xd58] sm:$0xff] }
 0x1ea   :  { %2922 = vmatpush.msrb.mxu1 %v1865_v26  ;;  %2886 = vmatpush.msrb.mxu0 %v1577_v58  ;;  %v1977_v39 = vld [vmem:[#allocation13 + $0x1358] sm:$0xff] }
 0x1eb   :  { %2908 = vmatpush.msrb.mxu2 %v1689_v0  ;;  %2871 = vmatpush.msra.mxu3 %v1409_v31  ;;  %v2249_v40 = vld [vmem:[#allocation13 + $0x1bd8] sm:$0xff] }
 0x1ec   :  { %2923 = vmatpush.msrb.mxu1 %v1857_v14  ;;  %2887 = vmatpush.msrb.mxu0 %v1569_v9  ;;  %v1497_v48 = vld [vmem:[#allocation13 + $0x458] sm:$0xff] }
 0x1ed   :  { %2909 = vmatpush.msrb.mxu2 %v1681_v1  ;;  %2872 = vmatpush.msra.mxu3 %v1401_v4  ;;  %v1777_v25 = vld [vmem:[#allocation13 + $0xd18] sm:$0xff] }
 0x1ee   :  { %2924 = vmatpush.msrb.mxu1 %v1849_v3  ;;  %2888 = vmatpush.msrb.mxu0 %v1561_v23  ;;  %v1969_v22 = vld [vmem:[#allocation13 + $0x1318] sm:$0xff] }
 0x1ef   :  { %2910 = vmatpush.msrb.mxu2 %v1673_v8  ;;  %2873 = vmatpush.msra.mxu3 %v1393_v10  ;;  %v2241_v55 = vld [vmem:[#allocation13 + $0x1b98] sm:$0xff] }
 0x1f0   :  { %2925 = vmatpush.msrb.mxu1 %v1841_v7  ;;  %2889 = vmatpush.msrb.mxu0 %v1553_v32  ;;  %v1489_v49 = vld [vmem:[#allocation13 + $0x418] sm:$0xff] }
 0x1f1   :  { %2911 = vmatpush.msrb.mxu2 %v1665_v36  ;;  %2874 = vmatpush.msra.mxu3 %v1385_v59  ;;  %v1769_v50 = vld [vmem:[#allocation13 + $0xcd8] sm:$0xff] }
 0x1f2   :  { %2926 = vmatpush.msrb.mxu1 %v1833_v41  ;;  %2890 = vmatpush.msrb.mxu0 %v1545_v28  ;;  %v1961_v52 = vld [vmem:[#allocation13 + $0x12d8] sm:$0xff] }
 0x1f3   :  { %2912 = vmatpush.msrb.mxu2 %v1657_v11  ;;  %2875 = vmatpush.msra.mxu3 %v1377_v46  ;;  %v2121_v35 = vld [vmem:[#allocation13 + $0x17d8] sm:$0xff] }
 0x1f4   :  { %2927 = vmatpush.msrb.mxu1 %v1825_v16  ;;  %2891 = vmatpush.msrb.mxu0 %v1537_v60  ;;  %v2233_v2 = vld [vmem:[#allocation13 + $0x1b58] sm:$0xff] }
 0x1f5   :  { %2913 = vmatpush.msrb.mxu2 %v1649_v21  ;;  %2876 = vmatpush.msra.mxu3 %v1369_v13  ;;  %v1761_v5 = vld [vmem:[#allocation13 + $0xc98] sm:$0xff]  ;;  %v2559_v13 = vpop.f32.mrf.mxu3 }
 0x1f6   :  { %2928 = vmatpush.msrb.mxu1 %v1817_v62  ;;  %2892 = vmatpush.msrb.mxu0 %v1529_v17  ;;  %v1953_v53 = vld [vmem:[#allocation13 + $0x1298] sm:$0xff] }
 0x1f7   :  { %2914 = vmatpush.msrb.mxu2 %v1641_v27  ;;  %2877 = vmatpush.msra.mxu3 %v1361_v57  ;;  %v2113_v15 = vld [vmem:[#allocation13 + $0x1798] sm:$0xff] }
 0x1f8   :  { %2929 = vmatpush.msrb.mxu1 %v1809_v45  ;;  %2893 = vmatpush.msrb.mxu0 %v1521_v24  ;;  %v2225_v26 = vld [vmem:[#allocation13 + $0x1b18] sm:$0xff] }
 0x1f9   :  { %2915 = vmatpush.msrb.mxu2 %v1633_v20  ;;  %2942 = vmatpush.msrb.mxu3 %v1993_v44  ;;  %v1753_v54 = vld [vmem:[#allocation13 + $0xc58] sm:$0xff]  ;;  %v2579_v20 = vpop.f32.mrf.mxu0 }
 0x1fa   :  { %2930 = vmatpush.msrb.mxu1 %v1801_v34  ;;  %2894 = vmatpush.msrb.mxu0 %v1513_v29  ;;  %v1945_v58 = vld [vmem:[#allocation13 + $0x1258] sm:$0xff]  ;;  %v2580_v29 = vadd.f32 %v2579_v20, %v2559_v13  ;;  %v1690_v20 = vld [vmem:[#allocation13 + $0xa60] sm:$0xff] }
 0x1fb   :  { %2916 = vmatpush.msrb.mxu2 %v1625_v61  ;;  %2943 = vmatpush.msrb.mxu3 %v1985_v19  ;;  %v2105_v0 = vld [vmem:[#allocation13 + $0x1758] sm:$0xff]  ;;  %v2599_v19 = vpop.f32.mrf.mxu2 }
 0x1fc   :  { %2931 = vmatpush.msrb.mxu1 %v1793_v30  ;;  %2895 = vmatpush.msrb.mxu0 %v1505_v63  ;;  %v2217_v14 = vld [vmem:[#allocation13 + $0x1ad8] sm:$0xff] }
 0x1fd   :  { %2917 = vmatpush.msrb.mxu2 %v1617_v38  ;;  %2944 = vmatpush.msrb.mxu3 %v1977_v39  ;;  %v1745_v31 = vld [vmem:[#allocation13 + $0xc18] sm:$0xff] }
 0x1fe   :  { %2932 = vmatpush.msrb.mxu1 %v1785_v33  ;;  %2896 = vmatpush.msrb.mxu0 %v1497_v48  ;;  %v1937_v9 = vld [vmem:[#allocation13 + $0x1218] sm:$0xff]  ;;  %v2600_v33 = vadd.f32 %v2599_v19, %v2580_v29  ;;  %v387_v29 = vpop.permute.xlu2 %386 }
 0x1ff   :  { %2982 = vmatpush.msra.mxu2 %v2249_v40  ;;  %2945 = vmatpush.msrb.mxu3 %v1969_v22  ;;  %v2097_v1 = vld [vmem:[#allocation13 + $0x1718] sm:$0xff] }
 0x200   :  { %2933 = vmatpush.msrb.mxu1 %v1777_v25  ;;  %2897 = vmatpush.msrb.mxu0 %v1489_v49  ;;  %v2209_v3 = vld [vmem:[#allocation13 + $0x1a98] sm:$0xff] }
 0x201   :  { %2983 = vmatpush.msra.mxu2 %v2241_v55  ;;  %2946 = vmatpush.msrb.mxu3 %v1961_v52  ;;  %v2377_v4 = vld [vmem:[#allocation13 + $0x1fd8] sm:$0xff]  ;;  %v2619_v55 = vpop.f32.mrf.mxu1  ;;  %v2639_v52 = vpop.f32.mrf.mxu3 }
 0x202   :  { %2934 = vmatpush.msrb.mxu1 %v1769_v50  ;;  %2962 = vmatpush.msra.mxu0 %v2121_v35  ;;  %v1929_v23 = vld [vmem:[#allocation13 + $0x11d8] sm:$0xff]  ;;  %v1482_v50 = vld [vmem:[#allocation13 + $0x3e0] sm:$0xff] }
 0x203   :  { %2984 = vmatpush.msra.mxu2 %v2233_v2  ;;  %2947 = vmatpush.msrb.mxu3 %v1953_v53  ;;  %v2089_v8 = vld [vmem:[#allocation13 + $0x16d8] sm:$0xff] }
 0x204   :  { %2935 = vmatpush.msrb.mxu1 %v1761_v5  ;;  %2963 = vmatpush.msra.mxu0 %v2113_v15  ;;  %v2201_v7 = vld [vmem:[#allocation13 + $0x1a58] sm:$0xff]  ;;  %v389_v19 = vpop.permute.xlu0 %388 }
 0x205   :  { %2985 = vmatpush.msra.mxu2 %v2225_v26  ;;  %2948 = vmatpush.msrb.mxu3 %v1945_v58  ;;  %v2369_v10 = vld [vmem:[#allocation13 + $0x1f98] sm:$0xff]  ;;  %v2659_v26 = vpop.f32.mrf.mxu0 }
 0x206   :  { %2936 = vmatpush.msrb.mxu1 %v1753_v54  ;;  %2964 = vmatpush.msra.mxu0 %v2105_v0  ;;  %v1921_v32 = vld [vmem:[#allocation13 + $0x1198] sm:$0xff]  ;;  %v1474_v54 = vld [vmem:[#allocation13 + $0x3a0] sm:$0xff] }
 0x207   :  { %2986 = vmatpush.msra.mxu2 %v2217_v14  ;;  %2949 = vmatpush.msrb.mxu3 %v1937_v9  ;;  %v2081_v36 = vld [vmem:[#allocation13 + $0x1698] sm:$0xff]  ;;  %v2679_v14 = vpop.f32.mrf.mxu2  ;;  %v1466_v9 = vld [vmem:[#allocation13 + $0x360] sm:$0xff] }
 0x208   :  { %2937 = vmatpush.msrb.mxu1 %v1745_v31  ;;  %2965 = vmatpush.msra.mxu0 %v2097_v1  ;;  %v2193_v41 = vld [vmem:[#allocation13 + $0x1a18] sm:$0xff]  ;;  %v1738_v31 = vld [vmem:[#allocation13 + $0xbe0] sm:$0xff] }
 0x209   :  { %2987 = vmatpush.msra.mxu2 %v2209_v3  ;;  %2950 = vmatpush.msrb.mxu3 %v1929_v23  ;;  %v2361_v59 = vld [vmem:[#allocation13 + $0x1f58] sm:$0xff]  ;;  %v1458_v23 = vld [vmem:[#allocation13 + $0x320] sm:$0xff] }
 0x20a   :  { %3002 = vmatpush.msra.mxu1 %v2377_v4  ;;  %2966 = vmatpush.msra.mxu0 %v2089_v8  ;;  %v1913_v28 = vld [vmem:[#allocation13 + $0x1158] sm:$0xff]  ;;  %v2699_v8 = vpop.f32.mrf.mxu1 }
 0x20b   :  { %2988 = vmatpush.msra.mxu2 %v2201_v7  ;;  %2951 = vmatpush.msrb.mxu3 %v1921_v32  ;;  %v2073_v11 = vld [vmem:[#allocation13 + $0x1658] sm:$0xff]  ;;  %v3666_v7 = vrot.slane %v4868_v12, 1 }
 0x20c   :  { %3003 = vmatpush.msra.mxu1 %v2369_v10  ;;  %v2185_v16 = vld [vmem:[#allocation13 + $0x19d8] sm:$0xff]  ;;  %2967 = vmatpush.msra.mxu0 %v2081_v36  ;;  %v1450_v36 = vld [vmem:[#allocation13 + $0x2e0] sm:$0xff] }
 0x20d   :  { %2989 = vmatpush.msra.mxu2 %v2193_v41  ;;  %v2353_v46 = vld [vmem:[#allocation13 + $0x1f18] sm:$0xff]  ;;  %2952 = vmatpush.msrb.mxu3 %v1913_v28  ;;  %v1610_v41 = vld [vmem:[#allocation13 + $0x7e0] sm:$0xff] }
 0x20e   :  { %v1905_v60 = vld [vmem:[#allocation13 + $0x1118] sm:$0xff]  ;;  %3004 = vmatpush.msra.mxu1 %v2361_v59  ;;  %2968 = vmatpush.msra.mxu0 %v2073_v11  ;;  %v1722_v59 = vld [vmem:[#allocation13 + $0xb60] sm:$0xff] }
 0x20f   :  { %v2065_v21 = vld [vmem:[#allocation13 + $0x1618] sm:$0xff]  ;;  %2990 = vmatpush.msra.mxu2 %v2185_v16  ;;  %2953 = vmatpush.msrb.mxu3 %v1905_v60  ;;  %v1442_v16 = vld [vmem:[#allocation13 + $0x2a0] sm:$0xff] }
 0x210   :  { %v2177_v62 = vld [vmem:[#allocation13 + $0x1998] sm:$0xff]  ;;  %3005 = vmatpush.msra.mxu1 %v2353_v46  ;;  %2969 = vmatpush.msra.mxu0 %v2065_v21  ;;  %v1602_v46 = vld [vmem:[#allocation13 + $0x7a0] sm:$0xff] }
 0x211   :  { %v2345_v17 = vld [vmem:[#allocation13 + $0x1ed8] sm:$0xff]  ;;  %2991 = vmatpush.msra.mxu2 %v2177_v62  ;;  %2878 = vmatmul.f32.vlgmr.msra.gmra.mxu3 %v4829_v47  ;;  %v2620_v47 = vadd.f32 %v2619_v55, %v2600_v33  ;;  %v1594_v21 = vld [vmem:[#allocation13 + $0x760] sm:$0xff]  ;;  %v390_v33 = vsel %vm234_vm7, %v387_v29, %v389_v19 }
 0x212   :  { %v1897_v27 = vld [vmem:[#allocation13 + $0x10d8] sm:$0xff]  ;;  %3006 = vmatpush.msra.mxu1 %v2345_v17  ;;  %2918 = vmatmul.f32.vlgmr.msrb.gmra.mxu2 %v4835_v42  ;;  %v1706_v62 = vld [vmem:[#allocation13 + $0xae0] sm:$0xff]  ;;  %392 = vst [vmem:[#allocation16] sm:$0x3] %v390_v33 }
 0x213   :  { %v2057_v45 = vld [vmem:[#allocation13 + $0x15d8] sm:$0xff]  ;;  %2954 = vmatpush.msrb.mxu3 %v1897_v27  ;;  %v2640_v53 = vadd.f32 %v2639_v52, %v2620_v47  ;;  %2898 = vmatmul.f32.vlgmr.msrb.gmra.mxu0 %v4841_v56  ;;  %v1730_v56 = vld [vmem:[#allocation13 + $0xba0] sm:$0xff]  ;;  %3922 = dma.vmem_to_hbm [thread:$0]  %s3918_s3, 32, %s3920_s23, [#allocation4]  }
 0x214   :  { %v2169_v57 = vld [vmem:[#allocation13 + $0x1958] sm:$0xff]  ;;  %2970 = vmatpush.msra.mxu0 %v2057_v45  ;;  %2938 = vmatmul.f32.vlgmr.msrb.gmra.mxu1 %v4859_v37  ;;  %v1434_v37 = vld [vmem:[#allocation13 + $0x260] sm:$0xff] }
 0x215   :  { %v2337_v24 = vld [vmem:[#allocation13 + $0x1e98] sm:$0xff]  ;;  %2992 = vmatpush.msra.mxu2 %v2169_v57  ;;  %v2660_v0 = vadd.f32 %v2659_v26, %v2640_v53  ;;  %v1426_v17 = vld [vmem:[#allocation13 + $0x220] sm:$0xff] }
 0x216   :  { %v1889_v34 = vld [vmem:[#allocation13 + $0x1098] sm:$0xff]  ;;  %3007 = vmatpush.msra.mxu1 %v2337_v24  ;;  %v1586_v27 = vld [vmem:[#allocation13 + $0x720] sm:$0xff] }
 0x217   :  { %v2049_v44 = vld [vmem:[#allocation13 + $0x1598] sm:$0xff]  ;;  %2955 = vmatpush.msrb.mxu3 %v1889_v34  ;;  %v2680_v3 = vadd.f32 %v2679_v14, %v2660_v0  ;;  %v1698_v45 = vld [vmem:[#allocation13 + $0xaa0] sm:$0xff] }
 0x218   :  { %v2161_v61 = vld [vmem:[#allocation13 + $0x1918] sm:$0xff]  ;;  %2971 = vmatpush.msra.mxu0 %v2049_v44  ;;  %v1866_v57 = vld [vmem:[#allocation13 + $0xfe0] sm:$0xff] }
 0x219   :  { %v2329_v30 = vld [vmem:[#allocation13 + $0x1e58] sm:$0xff]  ;;  %2993 = vmatpush.msra.mxu2 %v2161_v61  ;;  %v4881_v32 = vadd.f32 %v2699_v8, %v2680_v3  ;;  %v1418_v24 = vld [vmem:[#allocation13 + $0x1e0] sm:$0xff] }
 0x21a   :  { %v1881_v63 = vld [vmem:[#allocation13 + $0x1058] sm:$0xff]  ;;  %3008 = vmatpush.msra.mxu1 %v2329_v30  ;;  %v1858_v34 = vld [vmem:[#allocation13 + $0xfa0] sm:$0xff] }
 0x21b   :  { %v2041_v38 = vld [vmem:[#allocation13 + $0x1558] sm:$0xff]  ;;  %2956 = vmatpush.msrb.mxu3 %v1881_v63  ;;  %v4886_v28 = vadd.f32 %v3666_v7, %v4881_v32  ;;  %v1410_v44 = vld [vmem:[#allocation13 + $0x1a0] sm:$0xff] }
 0x21c   :  { %v2153_v39 = vld [vmem:[#allocation13 + $0x18d8] sm:$0xff]  ;;  %2972 = vmatpush.msra.mxu0 %v2041_v38  ;;  %v1570_v61 = vld [vmem:[#allocation13 + $0x6a0] sm:$0xff] }
 0x21d   :  { %v2321_v40 = vld [vmem:[#allocation13 + $0x1e18] sm:$0xff]  ;;  %2994 = vmatpush.msra.mxu2 %v2153_v39  ;;  %v1682_v30 = vld [vmem:[#allocation13 + $0xa20] sm:$0xff] }
 0x21e   :  { %v1873_v48 = vld [vmem:[#allocation13 + $0x1018] sm:$0xff]  ;;  %3009 = vmatpush.msra.mxu1 %v2321_v40  ;;  %v1850_v63 = vld [vmem:[#allocation13 + $0xf60] sm:$0xff] }
 0x21f   :  { %v2033_v25 = vld [vmem:[#allocation13 + $0x1518] sm:$0xff]  ;;  %2957 = vmatpush.msrb.mxu3 %v1873_v48  ;;  %v1402_v38 = vld [vmem:[#allocation13 + $0x160] sm:$0xff] }
 0x220   :  { %v2145_v22 = vld [vmem:[#allocation13 + $0x1898] sm:$0xff]  ;;  %2973 = vmatpush.msra.mxu0 %v2033_v25  ;;  %2958 = vmatmul.f32.vlgmr.msrb.gmra.mxu3 %v4847_v51  ;;  %v1674_v39 = vld [vmem:[#allocation13 + $0x9e0] sm:$0xff] }
 0x221   :  { %v2313_v49 = vld [vmem:[#allocation13 + $0x1dd8] sm:$0xff]  ;;  %2995 = vmatpush.msra.mxu2 %v2145_v22  ;;  %3022 = vmatpush.msra.mxu3 %v1482_v50  ;;  %v1842_v40 = vld [vmem:[#allocation13 + $0xf20] sm:$0xff] }
 0x222   :  { %v2025_v35 = vld [vmem:[#allocation13 + $0x14d8] sm:$0xff]  ;;  %3010 = vmatpush.msra.mxu1 %v2313_v49  ;;  %v1394_v48 = vld [vmem:[#allocation13 + $0x120] sm:$0xff] }
 0x223   :  { %v2137_v2 = vld [vmem:[#allocation13 + $0x1858] sm:$0xff]  ;;  %2974 = vmatpush.msra.mxu0 %v2025_v35  ;;  %3023 = vmatpush.msra.mxu3 %v1474_v54  ;;  %v1554_v25 = vld [vmem:[#allocation13 + $0x620] sm:$0xff] }
 0x224   :  { %v2305_v5 = vld [vmem:[#allocation13 + $0x1d98] sm:$0xff]  ;;  %2996 = vmatpush.msra.mxu2 %v2137_v2  ;;  %v1666_v22 = vld [vmem:[#allocation13 + $0x9a0] sm:$0xff] }
 0x225   :  { %v2017_v15 = vld [vmem:[#allocation13 + $0x1498] sm:$0xff]  ;;  %3011 = vmatpush.msra.mxu1 %v2305_v5  ;;  %3024 = vmatpush.msra.mxu3 %v1466_v9  ;;  %v1834_v55 = vld [vmem:[#allocation13 + $0xee0] sm:$0xff] }
 0x226   :  { %v2129_v58 = vld [vmem:[#allocation13 + $0x1818] sm:$0xff]  ;;  %2975 = vmatpush.msra.mxu0 %v2017_v15  ;;  %v1386_v49 = vld [vmem:[#allocation13 + $0xe0] sm:$0xff] }
 0x227   :  { %v2297_v42 = vld [vmem:[#allocation13 + $0x1d58] sm:$0xff]  ;;  %2997 = vmatpush.msra.mxu2 %v2129_v58  ;;  %3025 = vmatpush.msra.mxu3 %v1458_v23  ;;  %v1546_v50 = vld [vmem:[#allocation13 + $0x5e0] sm:$0xff] }
 0x228   :  { %v2009_v1 = vld [vmem:[#allocation13 + $0x1458] sm:$0xff]  ;;  %3012 = vmatpush.msra.mxu1 %v2297_v42  ;;  %2998 = vmatmul.f32.vlgmr.msra.gmra.mxu2 %v4853_v43  ;;  %v1714_v43 = vld [vmem:[#allocation13 + $0xb20] sm:$0xff] }
 0x229   :  { %v2289_v4 = vld [vmem:[#allocation13 + $0x1d18] sm:$0xff]  ;;  %3062 = vmatpush.msrb.mxu2 %v1738_v31  ;;  %2976 = vmatpush.msra.mxu0 %v2009_v1  ;;  %v1658_v47 = vld [vmem:[#allocation13 + $0x960] sm:$0xff] }
 0x22a   :  { %v2001_v10 = vld [vmem:[#allocation13 + $0x1418] sm:$0xff]  ;;  %3013 = vmatpush.msra.mxu1 %v2289_v4  ;;  %3026 = vmatpush.msra.mxu3 %v1450_v36  ;;  %v1826_v52 = vld [vmem:[#allocation13 + $0xea0] sm:$0xff] }
 0x22b   :  { %v2281_v51 = vld [vmem:[#allocation13 + $0x1cd8] sm:$0xff]  ;;  %3063 = vmatpush.msrb.mxu2 %v1730_v56  ;;  %2977 = vmatpush.msra.mxu0 %v2001_v10  ;;  %v1378_v35 = vld [vmem:[#allocation13 + $0xa0] sm:$0xff] }
 0x22c   :  { %v2273_v11 = vld [vmem:[#allocation13 + $0x1c98] sm:$0xff]  ;;  %3014 = vmatpush.msra.mxu1 %v2281_v51  ;;  %2978 = vmatmul.f32.vlgmr.msra.gmra.mxu0 %v4865_v6  ;;  %v1578_v6 = vld [vmem:[#allocation13 + $0x6e0] sm:$0xff] }
 0x22d   :  { %3042 = vmatpush.msrb.mxu0 %v1610_v41  ;;  %3064 = vmatpush.msrb.mxu2 %v1722_v59  ;;  %v2265_v60 = vld [vmem:[#allocation13 + $0x1c58] sm:$0xff]  ;;  %v1538_v2 = vld [vmem:[#allocation13 + $0x5a0] sm:$0xff] }
 0x22e   :  { %3015 = vmatpush.msra.mxu1 %v2273_v11  ;;  %3027 = vmatpush.msra.mxu3 %v1442_v16  ;;  %v2257_v13 = vld [vmem:[#allocation13 + $0x1c18] sm:$0xff]  ;;  %v1650_v5 = vld [vmem:[#allocation13 + $0x920] sm:$0xff] }
 0x22f   :  { %3043 = vmatpush.msrb.mxu0 %v1602_v46  ;;  %3065 = vmatpush.msrb.mxu2 %v1714_v43  ;;  %v1818_v53 = vld [vmem:[#allocation13 + $0xe60] sm:$0xff] }
 0x230   :  { %3016 = vmatpush.msra.mxu1 %v2265_v60  ;;  %3028 = vmatpush.msra.mxu3 %v1434_v37  ;;  %v1370_v15 = vld [vmem:[#allocation13 + $0x60] sm:$0xff] }
 0x231   :  { %3044 = vmatpush.msrb.mxu0 %v1594_v21  ;;  %3066 = vmatpush.msrb.mxu2 %v1706_v62  ;;  %v1530_v26 = vld [vmem:[#allocation13 + $0x560] sm:$0xff] }
 0x232   :  { %3017 = vmatpush.msra.mxu1 %v2257_v13  ;;  %3029 = vmatpush.msra.mxu3 %v1426_v17  ;;  %v1642_v54 = vld [vmem:[#allocation13 + $0x8e0] sm:$0xff] }
 0x233   :  { %3018 = vmatmul.f32.vlgmr.msra.gmra.mxu1 %v4873_v18  ;;  %3045 = vmatpush.msrb.mxu0 %v1586_v27  ;;  %v1562_v18 = vld [vmem:[#allocation13 + $0x660] sm:$0xff] }
 0x234   :  { %3067 = vmatpush.msrb.mxu2 %v1698_v45  ;;  %3082 = vmatpush.msrb.mxu1 %v1866_v57  ;;  %v1810_v58 = vld [vmem:[#allocation13 + $0xe20] sm:$0xff] }
 0x235   :  { %3030 = vmatpush.msra.mxu3 %v1418_v24  ;;  %3046 = vmatpush.msrb.mxu0 %v1578_v6  ;;  %v1362_v0 = vld [vmem:[#allocation13 + $0x20] sm:$0xff] }
 0x236   :  { %3068 = vmatpush.msrb.mxu2 %v1690_v20  ;;  %3083 = vmatpush.msrb.mxu1 %v1858_v34  ;;  %v1522_v14 = vld [vmem:[#allocation13 + $0x520] sm:$0xff] }
 0x237   :  { %3031 = vmatpush.msra.mxu3 %v1410_v44  ;;  %3047 = vmatpush.msrb.mxu0 %v1570_v61  ;;  %v1634_v42 = vld [vmem:[#allocation13 + $0x8a0] sm:$0xff] }
 0x238   :  { %3069 = vmatpush.msrb.mxu2 %v1682_v30  ;;  %3084 = vmatpush.msrb.mxu1 %v1850_v63  ;;  %v1802_v31 = vld [vmem:[#allocation13 + $0xde0] sm:$0xff] }
 0x239   :  { %3032 = vmatpush.msra.mxu3 %v1402_v38  ;;  %3048 = vmatpush.msrb.mxu0 %v1562_v18  ;;  %v1994_v9 = vld [vmem:[#allocation13 + $0x13e0] sm:$0xff] }
 0x23a   :  { %3070 = vmatpush.msrb.mxu2 %v1674_v39  ;;  %3085 = vmatpush.msrb.mxu1 %v1842_v40  ;;  %v1514_v1 = vld [vmem:[#allocation13 + $0x4e0] sm:$0xff] }
 0x23b   :  { %3033 = vmatpush.msra.mxu3 %v1394_v48  ;;  %3049 = vmatpush.msrb.mxu0 %v1554_v25  ;;  %v1626_v3 = vld [vmem:[#allocation13 + $0x860] sm:$0xff] }
 0x23c   :  { %3071 = vmatpush.msrb.mxu2 %v1666_v22  ;;  %3086 = vmatpush.msrb.mxu1 %v1834_v55  ;;  %v1794_v4 = vld [vmem:[#allocation13 + $0xda0] sm:$0xff] }
 0x23d   :  { %3034 = vmatpush.msra.mxu3 %v1386_v49  ;;  %3050 = vmatpush.msrb.mxu0 %v1546_v50  ;;  %v1986_v23 = vld [vmem:[#allocation13 + $0x13a0] sm:$0xff] }
 0x23e   :  { %3072 = vmatpush.msrb.mxu2 %v1658_v47  ;;  %3087 = vmatpush.msrb.mxu1 %v1826_v52  ;;  %v1506_v8 = vld [vmem:[#allocation13 + $0x4a0] sm:$0xff] }
 0x23f   :  { %3035 = vmatpush.msra.mxu3 %v1378_v35  ;;  %3051 = vmatpush.msrb.mxu0 %v1538_v2  ;;  %v1618_v7 = vld [vmem:[#allocation13 + $0x820] sm:$0xff]  ;;  %v2719_v35 = vpop.f32.mrf.mxu3 }
 0x240   :  { %3073 = vmatpush.msrb.mxu2 %v1650_v5  ;;  %3088 = vmatpush.msrb.mxu1 %v1818_v53  ;;  %v1786_v56 = vld [vmem:[#allocation13 + $0xd60] sm:$0xff] }
 0x241   :  { %3036 = vmatpush.msra.mxu3 %v1370_v15  ;;  %3052 = vmatpush.msrb.mxu0 %v1530_v26  ;;  %v1978_v10 = vld [vmem:[#allocation13 + $0x1360] sm:$0xff] }
 0x242   :  { %3074 = vmatpush.msrb.mxu2 %v1642_v54  ;;  %3089 = vmatpush.msrb.mxu1 %v1810_v58  ;;  %v2250_v51 = vld [vmem:[#allocation13 + $0x1be0] sm:$0xff]  ;;  %v2739_v54 = vpop.f32.mrf.mxu0 }
 0x243   :  { %3037 = vmatpush.msra.mxu3 %v1362_v0  ;;  %3053 = vmatpush.msrb.mxu0 %v1522_v14  ;;  %v1498_v36 = vld [vmem:[#allocation13 + $0x460] sm:$0xff]  ;;  %v2740_v14 = vadd.f32 %v2739_v54, %v2719_v35  ;;  %v1715_v35 = vld [vmem:[#allocation13 + $0xb28] sm:$0xff] }
 0x244   :  { %3075 = vmatpush.msrb.mxu2 %v1634_v42  ;;  %3090 = vmatpush.msrb.mxu1 %v1802_v31  ;;  %v1778_v41 = vld [vmem:[#allocation13 + $0xd20] sm:$0xff]  ;;  %v1707_v54 = vld [vmem:[#allocation13 + $0xae8] sm:$0xff] }
 0x245   :  { %3102 = vmatpush.msrb.mxu3 %v1994_v9  ;;  %3054 = vmatpush.msrb.mxu0 %v1514_v1  ;;  %v1970_v59 = vld [vmem:[#allocation13 + $0x1320] sm:$0xff] }
 0x246   :  { %3076 = vmatpush.msrb.mxu2 %v1626_v3  ;;  %3091 = vmatpush.msrb.mxu1 %v1794_v4  ;;  %v2242_v11 = vld [vmem:[#allocation13 + $0x1ba0] sm:$0xff] }
 0x247   :  { %3103 = vmatpush.msrb.mxu3 %v1986_v23  ;;  %3055 = vmatpush.msrb.mxu0 %v1506_v8  ;;  %v1490_v16 = vld [vmem:[#allocation13 + $0x420] sm:$0xff] }
 0x248   :  { %3077 = vmatpush.msrb.mxu2 %v1618_v7  ;;  %3092 = vmatpush.msrb.mxu1 %v1786_v56  ;;  %v1770_v46 = vld [vmem:[#allocation13 + $0xce0] sm:$0xff] }
 0x249   :  { %3104 = vmatpush.msrb.mxu3 %v1978_v10  ;;  %3056 = vmatpush.msrb.mxu0 %v1498_v36  ;;  %v1962_v43 = vld [vmem:[#allocation13 + $0x12e0] sm:$0xff]  ;;  %v2779_v36 = vpop.f32.mrf.mxu1 }
 0x24a   :  { %3142 = vmatpush.msra.mxu2 %v2250_v51  ;;  %3093 = vmatpush.msrb.mxu1 %v1778_v41  ;;  %v2122_v60 = vld [vmem:[#allocation13 + $0x17e0] sm:$0xff]  ;;  %v1483_v51 = vld [vmem:[#allocation13 + $0x3e8] sm:$0xff]  ;;  %v4900_v41 = vld [vmem:[%s5119_s9 + $0x10] sm:$0x3f] }
 0x24b   :  { %3105 = vmatpush.msrb.mxu3 %v1970_v59  ;;  %v2234_v37 = vld [vmem:[#allocation13 + $0x1b60] sm:$0xff]  ;;  %3057 = vmatpush.msrb.mxu0 %v1490_v16 }
 0x24c   :  { %3143 = vmatpush.msra.mxu2 %v2242_v11  ;;  %v1762_v21 = vld [vmem:[#allocation13 + $0xca0] sm:$0xff]  ;;  %3094 = vmatpush.msrb.mxu1 %v1770_v46 }
 0x24d   :  { %v1954_v62 = vld [vmem:[#allocation13 + $0x12a0] sm:$0xff]  ;;  %3106 = vmatpush.msrb.mxu3 %v1962_v43  ;;  %3122 = vmatpush.msra.mxu0 %v2122_v60 }
 0x24e   :  { %v2114_v13 = vld [vmem:[#allocation13 + $0x17a0] sm:$0xff]  ;;  %3144 = vmatpush.msra.mxu2 %v2234_v37  ;;  %3095 = vmatpush.msrb.mxu1 %v1762_v21  ;;  %v1475_v21 = vld [vmem:[#allocation13 + $0x3a8] sm:$0xff] }
 0x24f   :  { %v2226_v17 = vld [vmem:[#allocation13 + $0x1b20] sm:$0xff]  ;;  %3107 = vmatpush.msrb.mxu3 %v1954_v62  ;;  %3123 = vmatpush.msra.mxu0 %v2114_v13 }
 0x250   :  { %v1754_v27 = vld [vmem:[#allocation13 + $0xc60] sm:$0xff]  ;;  %3145 = vmatpush.msra.mxu2 %v2226_v17  ;;  %v4906_v17 = vld [vmem:[%s5119_s9 + $0x8] sm:$0x3f] }
 0x251   :  { %v1946_v45 = vld [vmem:[#allocation13 + $0x1260] sm:$0xff]  ;;  %3096 = vmatpush.msrb.mxu1 %v1754_v27  ;;  %3078 = vmatmul.f32.vlgmr.msrb.gmra.mxu2 %v4900_v41 }
 0x252   :  { %v2106_v57 = vld [vmem:[#allocation13 + $0x1760] sm:$0xff]  ;;  %3108 = vmatpush.msrb.mxu3 %v1946_v45  ;;  %3058 = vmatmul.f32.vlgmr.msrb.gmra.mxu0 %v4906_v17  ;;  %v1739_v45 = vld [vmem:[#allocation13 + $0xbe8] sm:$0xff] }
 0x253   :  { %v2218_v24 = vld [vmem:[#allocation13 + $0x1ae0] sm:$0xff]  ;;  %3124 = vmatpush.msra.mxu0 %v2106_v57 }
 0x254   :  { %v1746_v6 = vld [vmem:[#allocation13 + $0xc20] sm:$0xff]  ;;  %3146 = vmatpush.msra.mxu2 %v2218_v24 }
 0x255   :  { %v1938_v20 = vld [vmem:[#allocation13 + $0x1220] sm:$0xff]  ;;  %3097 = vmatpush.msrb.mxu1 %v1746_v6 }
 0x256   :  { %v2098_v34 = vld [vmem:[#allocation13 + $0x1720] sm:$0xff]  ;;  %3109 = vmatpush.msrb.mxu3 %v1938_v20  ;;  %v1467_v20 = vld [vmem:[#allocation13 + $0x368] sm:$0xff] }
 0x257   :  { %v2210_v44 = vld [vmem:[#allocation13 + $0x1aa0] sm:$0xff]  ;;  %3125 = vmatpush.msra.mxu0 %v2098_v34  ;;  %v2799_v46 = vpop.f32.mrf.mxu3 }
 0x258   :  { %v2378_v29 = vld [vmem:[#allocation13 + $0x1fe0] sm:$0xff]  ;;  %3147 = vmatpush.msra.mxu2 %v2210_v44 }
 0x259   :  { %v1930_v61 = vld [vmem:[#allocation13 + $0x11e0] sm:$0xff]  ;;  %3162 = vmatpush.msra.mxu1 %v2378_v29 }
 0x25a   :  { %v2090_v30 = vld [vmem:[#allocation13 + $0x16e0] sm:$0xff]  ;;  %3110 = vmatpush.msrb.mxu3 %v1930_v61  ;;  %v2759_v1 = vpop.f32.mrf.mxu2  ;;  %v1459_v61 = vld [vmem:[#allocation13 + $0x328] sm:$0xff] }
 0x25b   :  { %v2202_v19 = vld [vmem:[#allocation13 + $0x1a60] sm:$0xff]  ;;  %3126 = vmatpush.msra.mxu0 %v2090_v30  ;;  %v2760_v23 = vadd.f32 %v2759_v1, %v2740_v14  ;;  %v1731_v30 = vld [vmem:[#allocation13 + $0xba8] sm:$0xff] }
 0x25c   :  { %v2370_v63 = vld [vmem:[#allocation13 + $0x1fa0] sm:$0xff]  ;;  %3148 = vmatpush.msra.mxu2 %v2202_v19  ;;  %v1587_v14 = vld [vmem:[#allocation13 + $0x728] sm:$0xff] }
 0x25d   :  { %v1922_v38 = vld [vmem:[#allocation13 + $0x11a0] sm:$0xff]  ;;  %3163 = vmatpush.msra.mxu1 %v2370_v63  ;;  %v2780_v16 = vadd.f32 %v2779_v36, %v2760_v23  ;;  %v1419_v1 = vld [vmem:[#allocation13 + $0x1e8] sm:$0xff] }
 0x25e   :  { %v2082_v33 = vld [vmem:[#allocation13 + $0x16a0] sm:$0xff]  ;;  %3111 = vmatpush.msrb.mxu3 %v1922_v38  ;;  %v2819_v13 = vpop.f32.mrf.mxu0  ;;  %v3667_v38 = vrot.slane %v4881_v32, 1  ;;  %v1691_v23 = vld [vmem:[#allocation13 + $0xa68] sm:$0xff] }
 0x25f   :  { %v2194_v18 = vld [vmem:[#allocation13 + $0x1a20] sm:$0xff]  ;;  %3127 = vmatpush.msra.mxu0 %v2082_v33  ;;  %v2800_v37 = vadd.f32 %v2799_v46, %v2780_v16  ;;  %v4919_v33 = vld [vmem:[%s5119_s9 + $0x30] sm:$0x3f]  ;;  %v1403_v36 = vld [vmem:[#allocation13 + $0x168] sm:$0xff] }
 0x260   :  { %v2362_v39 = vld [vmem:[#allocation13 + $0x1f60] sm:$0xff]  ;;  %3149 = vmatpush.msra.mxu2 %v2194_v18  ;;  %v1843_v16 = vld [vmem:[#allocation13 + $0xf28] sm:$0xff] }
 0x261   :  { %v1914_v40 = vld [vmem:[#allocation13 + $0x1160] sm:$0xff]  ;;  %3164 = vmatpush.msra.mxu1 %v2362_v39  ;;  %v2820_v57 = vadd.f32 %v2819_v13, %v2800_v37  ;;  %v1451_v39 = vld [vmem:[#allocation13 + $0x2e8] sm:$0xff] }
 0x262   :  { %v2074_v48 = vld [vmem:[#allocation13 + $0x1660] sm:$0xff]  ;;  %3112 = vmatpush.msrb.mxu3 %v1914_v40  ;;  %v1395_v46 = vld [vmem:[#allocation13 + $0x128] sm:$0xff] }
 0x263   :  { %v2186_v25 = vld [vmem:[#allocation13 + $0x19e0] sm:$0xff]  ;;  %3128 = vmatpush.msra.mxu0 %v2074_v48  ;;  %v4927_v48 = vld [vmem:[%s5119_s9 + $0x18] sm:$0x3f]  ;;  %v1835_v37 = vld [vmem:[#allocation13 + $0xee8] sm:$0xff] }
 0x264   :  { %v2354_v22 = vld [vmem:[#allocation13 + $0x1f20] sm:$0xff]  ;;  %3150 = vmatpush.msra.mxu2 %v2186_v25  ;;  %v2839_v24 = vpop.f32.mrf.mxu2  ;;  %3098 = vmatmul.f32.vlgmr.msrb.gmra.mxu1 %v4927_v48  ;;  %v1611_v25 = vld [vmem:[#allocation13 + $0x7e8] sm:$0xff] }
 0x265   :  { %v1906_v55 = vld [vmem:[#allocation13 + $0x1120] sm:$0xff]  ;;  %3165 = vmatpush.msra.mxu1 %v2354_v22  ;;  %v2840_v29 = vadd.f32 %v2839_v24, %v2820_v57  ;;  %v1723_v22 = vld [vmem:[#allocation13 + $0xb68] sm:$0xff] }
 0x266   :  { %v2066_v49 = vld [vmem:[#allocation13 + $0x1620] sm:$0xff]  ;;  %3113 = vmatpush.msrb.mxu3 %v1906_v55  ;;  %v2859_v63 = vpop.f32.mrf.mxu1  ;;  %v3679_v55 = vrot.slane %v4868_v12, 2  ;;  %v1659_v13 = vld [vmem:[#allocation13 + $0x968] sm:$0xff] }
 0x267   :  { %v2178_v50 = vld [vmem:[#allocation13 + $0x19a0] sm:$0xff]  ;;  %3129 = vmatpush.msra.mxu0 %v2066_v49  ;;  %v4922_v40 = vadd.f32 %v2859_v63, %v2840_v29  ;;  %v1539_v57 = vld [vmem:[#allocation13 + $0x5a8] sm:$0xff] }
 0x268   :  { %v2346_v47 = vld [vmem:[#allocation13 + $0x1ee0] sm:$0xff]  ;;  %3151 = vmatpush.msra.mxu2 %v2178_v50  ;;  %v1651_v24 = vld [vmem:[#allocation13 + $0x928] sm:$0xff] }
 0x269   :  { %v1898_v52 = vld [vmem:[#allocation13 + $0x10e0] sm:$0xff]  ;;  %3166 = vmatpush.msra.mxu1 %v2346_v47  ;;  %v3676_v50 = vadd.f32 %v3667_v38, %v4922_v40  ;;  %v1443_v47 = vld [vmem:[#allocation13 + $0x2a8] sm:$0xff] }
 0x26a   :  { %v2058_v2 = vld [vmem:[#allocation13 + $0x15e0] sm:$0xff]  ;;  %3114 = vmatpush.msrb.mxu3 %v1898_v52  ;;  %v1603_v52 = vld [vmem:[#allocation13 + $0x7a8] sm:$0xff] }
 0x26b   :  { %v2170_v5 = vld [vmem:[#allocation13 + $0x1960] sm:$0xff]  ;;  %3130 = vmatpush.msra.mxu0 %v2058_v2  ;;  %v1643_v29 = vld [vmem:[#allocation13 + $0x8e8] sm:$0xff] }
 0x26c   :  { %v2338_v53 = vld [vmem:[#allocation13 + $0x1ea0] sm:$0xff]  ;;  %3152 = vmatpush.msra.mxu2 %v2170_v5  ;;  %v4932_v5 = vadd.f32 %v3679_v55, %v3676_v50  ;;  %v1635_v63 = vld [vmem:[#allocation13 + $0x8a8] sm:$0xff] }
 0x26d   :  { %v1890_v15 = vld [vmem:[#allocation13 + $0x10a0] sm:$0xff]  ;;  %3167 = vmatpush.msra.mxu1 %v2338_v53  ;;  %v4937_v53 = vld [vmem:[%s5119_s9 + $0x28] sm:$0x3f] }
 0x26e   :  { %v2050_v26 = vld [vmem:[#allocation13 + $0x15a0] sm:$0xff]  ;;  %3115 = vmatpush.msrb.mxu3 %v1890_v15  ;;  %v1435_v15 = vld [vmem:[#allocation13 + $0x268] sm:$0xff] }
 0x26f   :  { %v2162_v58 = vld [vmem:[#allocation13 + $0x1920] sm:$0xff]  ;;  %3131 = vmatpush.msra.mxu0 %v2050_v26  ;;  %v1595_v26 = vld [vmem:[#allocation13 + $0x768] sm:$0xff] }
 0x270   :  { %v2330_v0 = vld [vmem:[#allocation13 + $0x1e60] sm:$0xff]  ;;  %3153 = vmatpush.msra.mxu2 %v2162_v58  ;;  %v1803_v38 = vld [vmem:[#allocation13 + $0xde8] sm:$0xff] }
 0x271   :  { %v4894_v42 = vld [vmem:[%s5119_s9] sm:$0x3f]  ;;  %3168 = vmatpush.msra.mxu1 %v2330_v0  ;;  %v1427_v0 = vld [vmem:[#allocation13 + $0x228] sm:$0xff] }
 0x272   :  { %3038 = vmatmul.f32.vlgmr.msra.gmra.mxu3 %v4894_v42  ;;  %v1882_v31 = vld [vmem:[#allocation13 + $0x1060] sm:$0xff]  ;;  %v1987_v55 = vld [vmem:[#allocation13 + $0x13a8] sm:$0xff] }
 0x273   :  { %v2042_v9 = vld [vmem:[#allocation13 + $0x1560] sm:$0xff]  ;;  %3116 = vmatpush.msrb.mxu3 %v1882_v31  ;;  %v1699_v31 = vld [vmem:[#allocation13 + $0xaa8] sm:$0xff] }
 0x274   :  { %v2154_v3 = vld [vmem:[#allocation13 + $0x18e0] sm:$0xff]  ;;  %3132 = vmatpush.msra.mxu0 %v2042_v9  ;;  %v1867_v9 = vld [vmem:[#allocation13 + $0xfe8] sm:$0xff] }
 0x275   :  { %v2322_v4 = vld [vmem:[#allocation13 + $0x1e20] sm:$0xff]  ;;  %3154 = vmatpush.msra.mxu2 %v2154_v3  ;;  %v4943_v3 = vld [vmem:[%s5119_s9 + $0x38] sm:$0x3f]  ;;  %v1619_v50 = vld [vmem:[#allocation13 + $0x828] sm:$0xff] }
 0x276   :  { %v1874_v8 = vld [vmem:[#allocation13 + $0x1020] sm:$0xff]  ;;  %3169 = vmatpush.msra.mxu1 %v2322_v4  ;;  %v1579_v4 = vld [vmem:[#allocation13 + $0x6e8] sm:$0xff] }
 0x277   :  { %v2034_v7 = vld [vmem:[#allocation13 + $0x1520] sm:$0xff]  ;;  %3117 = vmatpush.msrb.mxu3 %v1874_v8  ;;  %v1859_v8 = vld [vmem:[#allocation13 + $0xfa8] sm:$0xff] }
 0x278   :  { %v2146_v56 = vld [vmem:[#allocation13 + $0x18a0] sm:$0xff]  ;;  %3133 = vmatpush.msra.mxu0 %v2034_v7  ;;  %v1411_v7 = vld [vmem:[#allocation13 + $0x1a8] sm:$0xff] }
 0x279   :  { %v2314_v10 = vld [vmem:[#allocation13 + $0x1de0] sm:$0xff]  ;;  %3155 = vmatpush.msra.mxu2 %v2146_v56  ;;  %3182 = vmatpush.msra.mxu3 %v1483_v51  ;;  %v1571_v56 = vld [vmem:[#allocation13 + $0x6a8] sm:$0xff] }
 0x27a   :  { %v2026_v59 = vld [vmem:[#allocation13 + $0x14e0] sm:$0xff]  ;;  %3170 = vmatpush.msra.mxu1 %v2314_v10  ;;  %v1683_v10 = vld [vmem:[#allocation13 + $0xa28] sm:$0xff] }
 0x27b   :  { %v2138_v11 = vld [vmem:[#allocation13 + $0x1860] sm:$0xff]  ;;  %3134 = vmatpush.msra.mxu0 %v2026_v59  ;;  %3183 = vmatpush.msra.mxu3 %v1475_v21  ;;  %v1851_v51 = vld [vmem:[#allocation13 + $0xf68] sm:$0xff] }
 0x27c   :  { %v2306_v43 = vld [vmem:[#allocation13 + $0x1da0] sm:$0xff]  ;;  %3156 = vmatpush.msra.mxu2 %v2138_v11  ;;  %v1563_v59 = vld [vmem:[#allocation13 + $0x668] sm:$0xff] }
 0x27d   :  { %v2018_v60 = vld [vmem:[#allocation13 + $0x14a0] sm:$0xff]  ;;  %3171 = vmatpush.msra.mxu1 %v2306_v43  ;;  %3184 = vmatpush.msra.mxu3 %v1467_v20  ;;  %v1675_v11 = vld [vmem:[#allocation13 + $0x9e8] sm:$0xff] }
 0x27e   :  { %v2130_v62 = vld [vmem:[#allocation13 + $0x1820] sm:$0xff]  ;;  %3135 = vmatpush.msra.mxu0 %v2018_v60  ;;  %v1555_v43 = vld [vmem:[#allocation13 + $0x628] sm:$0xff] }
 0x27f   :  { %v2298_v27 = vld [vmem:[#allocation13 + $0x1d60] sm:$0xff]  ;;  %3157 = vmatpush.msra.mxu2 %v2130_v62  ;;  %3185 = vmatpush.msra.mxu3 %v1459_v61  ;;  %v1667_v60 = vld [vmem:[#allocation13 + $0x9a8] sm:$0xff] }
 0x280   :  { %v4912_v6 = vld [vmem:[%s5119_s9 + $0x20] sm:$0x3f]  ;;  %3172 = vmatpush.msra.mxu1 %v2298_v27  ;;  %3158 = vmatmul.f32.vlgmr.msra.gmra.mxu2 %v4919_v33  ;;  %v1387_v21 = vld [vmem:[#allocation13 + $0xe8] sm:$0xff] }
 0x281   :  { %3118 = vmatmul.f32.vlgmr.msrb.gmra.mxu3 %v4912_v6  ;;  %v2010_v34 = vld [vmem:[#allocation13 + $0x1460] sm:$0xff]  ;;  %3222 = vmatpush.msrb.mxu2 %v1739_v45  ;;  %v1547_v62 = vld [vmem:[#allocation13 + $0x5e8] sm:$0xff] }
 0x282   :  { %v2290_v44 = vld [vmem:[#allocation13 + $0x1d20] sm:$0xff]  ;;  %3136 = vmatpush.msra.mxu0 %v2010_v34  ;;  %3186 = vmatpush.msra.mxu3 %v1451_v39  ;;  %v1827_v27 = vld [vmem:[#allocation13 + $0xea8] sm:$0xff] }
 0x283   :  { %v2002_v19 = vld [vmem:[#allocation13 + $0x1420] sm:$0xff]  ;;  %3173 = vmatpush.msra.mxu1 %v2290_v44  ;;  %3223 = vmatpush.msrb.mxu2 %v1731_v30  ;;  %v1379_v45 = vld [vmem:[#allocation13 + $0xa8] sm:$0xff] }
 0x284   :  { %v2282_v18 = vld [vmem:[#allocation13 + $0x1ce0] sm:$0xff]  ;;  %3137 = vmatpush.msra.mxu0 %v2002_v19  ;;  %3187 = vmatpush.msra.mxu3 %v1443_v47  ;;  %v1819_v20 = vld [vmem:[#allocation13 + $0xe68] sm:$0xff] }
 0x285   :  { %v2274_v49 = vld [vmem:[#allocation13 + $0x1ca0] sm:$0xff]  ;;  %3174 = vmatpush.msra.mxu1 %v2282_v18  ;;  %3224 = vmatpush.msrb.mxu2 %v1723_v22  ;;  %v1371_v34 = vld [vmem:[#allocation13 + $0x68] sm:$0xff] }
 0x286   :  { %3202 = vmatpush.msrb.mxu0 %v1611_v25  ;;  %v2266_v2 = vld [vmem:[#allocation13 + $0x1c60] sm:$0xff]  ;;  %3188 = vmatpush.msra.mxu3 %v1435_v15  ;;  %v1531_v44 = vld [vmem:[#allocation13 + $0x568] sm:$0xff] }
 0x287   :  { %3175 = vmatpush.msra.mxu1 %v2274_v49  ;;  %3138 = vmatmul.f32.vlgmr.msra.gmra.mxu0 %v4937_v53  ;;  %v2258_v58 = vld [vmem:[#allocation13 + $0x1c20] sm:$0xff]  ;;  %v1811_v61 = vld [vmem:[#allocation13 + $0xe28] sm:$0xff] }
 0x288   :  { %3203 = vmatpush.msrb.mxu0 %v1603_v52  ;;  %3225 = vmatpush.msrb.mxu2 %v1715_v35  ;;  %v1363_v30 = vld [vmem:[#allocation13 + $0x28] sm:$0xff] }
 0x289   :  { %3176 = vmatpush.msra.mxu1 %v2266_v2  ;;  %3189 = vmatpush.msra.mxu3 %v1427_v0  ;;  %v1523_v19 = vld [vmem:[#allocation13 + $0x528] sm:$0xff] }
 0x28a   :  { %3204 = vmatpush.msrb.mxu0 %v1595_v26  ;;  %3226 = vmatpush.msrb.mxu2 %v1707_v54  ;;  %v1995_v18 = vld [vmem:[#allocation13 + $0x13e8] sm:$0xff] }
 0x28b   :  { %3177 = vmatpush.msra.mxu1 %v2258_v58  ;;  %3190 = vmatpush.msra.mxu3 %v1419_v1  ;;  %v1515_v39 = vld [vmem:[#allocation13 + $0x4e8] sm:$0xff] }
 0x28c   :  { %3178 = vmatmul.f32.vlgmr.msra.gmra.mxu1 %v4943_v3  ;;  %3205 = vmatpush.msrb.mxu0 %v1587_v14  ;;  %v1627_v25 = vld [vmem:[#allocation13 + $0x868] sm:$0xff] }
 0x28d   :  { %3227 = vmatpush.msrb.mxu2 %v1699_v31  ;;  %3242 = vmatpush.msrb.mxu1 %v1867_v9  ;;  %v1795_v22 = vld [vmem:[#allocation13 + $0xda8] sm:$0xff] }
 0x28e   :  { %3206 = vmatpush.msrb.mxu0 %v1579_v4  ;;  %3191 = vmatpush.msra.mxu3 %v1411_v7  ;;  %v1507_v49 = vld [vmem:[#allocation13 + $0x4a8] sm:$0xff] }
 0x28f   :  { %3228 = vmatpush.msrb.mxu2 %v1691_v23  ;;  %3243 = vmatpush.msrb.mxu1 %v1859_v8  ;;  %v1787_v47 = vld [vmem:[#allocation13 + $0xd68] sm:$0xff] }
 0x290   :  { %3207 = vmatpush.msrb.mxu0 %v1571_v56  ;;  %3192 = vmatpush.msra.mxu3 %v1403_v36  ;;  %v1979_v52 = vld [vmem:[#allocation13 + $0x1368] sm:$0xff] }
 0x291   :  { %3229 = vmatpush.msrb.mxu2 %v1683_v10  ;;  %3244 = vmatpush.msrb.mxu1 %v1851_v51  ;;  %v2251_v35 = vld [vmem:[#allocation13 + $0x1be8] sm:$0xff] }
 0x292   :  { %3208 = vmatpush.msrb.mxu0 %v1563_v59  ;;  %3193 = vmatpush.msra.mxu3 %v1395_v46  ;;  %v1499_v2 = vld [vmem:[#allocation13 + $0x468] sm:$0xff] }
 0x293   :  { %3230 = vmatpush.msrb.mxu2 %v1675_v11  ;;  %3245 = vmatpush.msrb.mxu1 %v1843_v16  ;;  %v1779_v15 = vld [vmem:[#allocation13 + $0xd28] sm:$0xff] }
 0x294   :  { %3209 = vmatpush.msrb.mxu0 %v1555_v43  ;;  %3194 = vmatpush.msra.mxu3 %v1387_v21  ;;  %v1971_v26 = vld [vmem:[#allocation13 + $0x1328] sm:$0xff] }
 0x295   :  { %3231 = vmatpush.msrb.mxu2 %v1667_v60  ;;  %3246 = vmatpush.msrb.mxu1 %v1835_v37  ;;  %v2243_v54 = vld [vmem:[#allocation13 + $0x1ba8] sm:$0xff] }
 0x296   :  { %3210 = vmatpush.msrb.mxu0 %v1547_v62  ;;  %3195 = vmatpush.msra.mxu3 %v1379_v45  ;;  %v1491_v58 = vld [vmem:[#allocation13 + $0x428] sm:$0xff] }
 0x297   :  { %3232 = vmatpush.msrb.mxu2 %v1659_v13  ;;  %3247 = vmatpush.msrb.mxu1 %v1827_v27  ;;  %v1771_v0 = vld [vmem:[#allocation13 + $0xce8] sm:$0xff] }
 0x298   :  { %3211 = vmatpush.msrb.mxu0 %v1539_v57  ;;  %3196 = vmatpush.msra.mxu3 %v1371_v34  ;;  %v1963_v14 = vld [vmem:[#allocation13 + $0x12e8] sm:$0xff] }
 0x299   :  { %3233 = vmatpush.msrb.mxu2 %v1651_v24  ;;  %3248 = vmatpush.msrb.mxu1 %v1819_v20  ;;  %v2123_v31 = vld [vmem:[#allocation13 + $0x17e8] sm:$0xff] }
 0x29a   :  { %3212 = vmatpush.msrb.mxu0 %v1531_v44  ;;  %3197 = vmatpush.msra.mxu3 %v1363_v30  ;;  %v2235_v9 = vld [vmem:[#allocation13 + $0x1b68] sm:$0xff] }
 0x29b   :  { %3234 = vmatpush.msrb.mxu2 %v1643_v29  ;;  %3249 = vmatpush.msrb.mxu1 %v1811_v61  ;;  %v1763_v1 = vld [vmem:[#allocation13 + $0xca8] sm:$0xff] }
 0x29c   :  { %3213 = vmatpush.msrb.mxu0 %v1523_v19  ;;  %3262 = vmatpush.msrb.mxu3 %v1995_v18  ;;  %v1955_v4 = vld [vmem:[#allocation13 + $0x12a8] sm:$0xff] }
 0x29d   :  { %3235 = vmatpush.msrb.mxu2 %v1635_v63  ;;  %3250 = vmatpush.msrb.mxu1 %v1803_v38  ;;  %v2115_v23 = vld [vmem:[#allocation13 + $0x17a8] sm:$0xff]  ;;  %v2879_v63 = vpop.f32.mrf.mxu3 }
 0x29e   :  { %3214 = vmatpush.msrb.mxu0 %v1515_v39  ;;  %3263 = vmatpush.msrb.mxu3 %v1987_v55  ;;  %v2227_v8 = vld [vmem:[#allocation13 + $0x1b28] sm:$0xff]  ;;  %v2899_v55 = vpop.f32.mrf.mxu0 }
 0x29f   :  { %3236 = vmatpush.msrb.mxu2 %v1627_v25  ;;  %3251 = vmatpush.msrb.mxu1 %v1795_v22  ;;  %v1755_v7 = vld [vmem:[#allocation13 + $0xc68] sm:$0xff] }
 0x2a0   :  { %3215 = vmatpush.msrb.mxu0 %v1507_v49  ;;  %3264 = vmatpush.msrb.mxu3 %v1979_v52  ;;  %v1947_v56 = vld [vmem:[#allocation13 + $0x1268] sm:$0xff] }
 0x2a1   :  { %3237 = vmatpush.msrb.mxu2 %v1619_v50  ;;  %3252 = vmatpush.msrb.mxu1 %v1787_v47  ;;  %v2107_v10 = vld [vmem:[#allocation13 + $0x1768] sm:$0xff]  ;;  %v2900_v47 = vadd.f32 %v2899_v55, %v2879_v63  ;;  %v1604_v55 = vld [vmem:[#allocation13 + $0x7b0] sm:$0xff] }
 0x2a2   :  { %3216 = vmatpush.msrb.mxu0 %v1499_v2  ;;  %3265 = vmatpush.msrb.mxu3 %v1971_v26  ;;  %v2219_v51 = vld [vmem:[#allocation13 + $0x1ae8] sm:$0xff]  ;;  %v2919_v2 = vpop.f32.mrf.mxu2 }
 0x2a3   :  { %3302 = vmatpush.msra.mxu2 %v2251_v35  ;;  %3253 = vmatpush.msrb.mxu1 %v1779_v15  ;;  %v1747_v36 = vld [vmem:[#allocation13 + $0xc28] sm:$0xff] }
 0x2a4   :  { %3217 = vmatpush.msrb.mxu0 %v1491_v58  ;;  %3266 = vmatpush.msrb.mxu3 %v1963_v14  ;;  %v1939_v59 = vld [vmem:[#allocation13 + $0x1228] sm:$0xff] }
 0x2a5   :  { %3303 = vmatpush.msra.mxu2 %v2243_v54  ;;  %3254 = vmatpush.msrb.mxu1 %v1771_v0  ;;  %v2099_v11 = vld [vmem:[#allocation13 + $0x1728] sm:$0xff]  ;;  %v2920_v54 = vadd.f32 %v2919_v2, %v2900_v47  ;;  %v1716_v47 = vld [vmem:[#allocation13 + $0xb30] sm:$0xff] }
 0x2a6   :  { %3282 = vmatpush.msra.mxu0 %v2123_v31  ;;  %3267 = vmatpush.msrb.mxu3 %v1955_v4  ;;  %v2211_v16 = vld [vmem:[#allocation13 + $0x1aa8] sm:$0xff] }
 0x2a7   :  { %3304 = vmatpush.msra.mxu2 %v2235_v9  ;;  %3255 = vmatpush.msrb.mxu1 %v1763_v1  ;;  %v2379_v46 = vld [vmem:[#allocation13 + $0x1fe8] sm:$0xff]  ;;  %v1484_v9 = vld [vmem:[#allocation13 + $0x3f0] sm:$0xff] }
 0x2a8   :  { %3283 = vmatpush.msra.mxu0 %v2115_v23  ;;  %3268 = vmatpush.msrb.mxu3 %v1947_v56  ;;  %v1931_v43 = vld [vmem:[#allocation13 + $0x11e8] sm:$0xff] }
 0x2a9   :  { %3305 = vmatpush.msra.mxu2 %v2227_v8  ;;  %3256 = vmatpush.msrb.mxu1 %v1755_v7  ;;  %v2091_v60 = vld [vmem:[#allocation13 + $0x16e8] sm:$0xff]  ;;  %v2959_v8 = vpop.f32.mrf.mxu3 }
 0x2aa   :  { %3284 = vmatpush.msra.mxu0 %v2107_v10  ;;  %3269 = vmatpush.msrb.mxu3 %v1939_v59  ;;  %v2203_v37 = vld [vmem:[#allocation13 + $0x1a68] sm:$0xff]  ;;  %v2979_v59 = vpop.f32.mrf.mxu0 }
 0x2ab   :  { %3306 = vmatpush.msra.mxu2 %v2219_v51  ;;  %3257 = vmatpush.msrb.mxu1 %v1747_v36  ;;  %v2371_v21 = vld [vmem:[#allocation13 + $0x1fa8] sm:$0xff]  ;;  %v1476_v51 = vld [vmem:[#allocation13 + $0x3b0] sm:$0xff] }
 0x2ac   :  { %3285 = vmatpush.msra.mxu0 %v2099_v11  ;;  %v1923_v62 = vld [vmem:[#allocation13 + $0x11a8] sm:$0xff]  ;;  %3270 = vmatpush.msrb.mxu3 %v1931_v43  ;;  %v1740_v11 = vld [vmem:[#allocation13 + $0xbf0] sm:$0xff] }
 0x2ad   :  { %3307 = vmatpush.msra.mxu2 %v2211_v16  ;;  %3322 = vmatpush.msra.mxu1 %v2379_v46  ;;  %v2083_v13 = vld [vmem:[#allocation13 + $0x16a8] sm:$0xff]  ;;  %v2999_v46 = vpop.f32.mrf.mxu2  ;;  %v1468_v43 = vld [vmem:[#allocation13 + $0x370] sm:$0xff] }
 0x2ae   :  { %v2195_v27 = vld [vmem:[#allocation13 + $0x1a28] sm:$0xff]  ;;  %3286 = vmatpush.msra.mxu0 %v2091_v60  ;;  %3271 = vmatpush.msrb.mxu3 %v1923_v62  ;;  %v1460_v62 = vld [vmem:[#allocation13 + $0x330] sm:$0xff] }
 0x2af   :  { %3308 = vmatpush.msra.mxu2 %v2203_v37  ;;  %v2363_v45 = vld [vmem:[#allocation13 + $0x1f68] sm:$0xff]  ;;  %3323 = vmatpush.msra.mxu1 %v2371_v21 }
 0x2b0   :  { %v1915_v57 = vld [vmem:[#allocation13 + $0x1168] sm:$0xff]  ;;  %3287 = vmatpush.msra.mxu0 %v2083_v13  ;;  %3198 = vmatmul.f32.vlgmr.msra.gmra.mxu3 %v4894_v42  ;;  %v2939_v42 = vpop.f32.mrf.mxu1  ;;  %v1732_v13 = vld [vmem:[#allocation13 + $0xbb0] sm:$0xff] }
 0x2b1   :  { %v2075_v24 = vld [vmem:[#allocation13 + $0x1668] sm:$0xff]  ;;  %3309 = vmatpush.msra.mxu2 %v2195_v27  ;;  %3324 = vmatpush.msra.mxu1 %v2363_v45  ;;  %v2940_v23 = vadd.f32 %v2939_v42, %v2920_v54  ;;  %v3668_v45 = vrot.slane %v4922_v40, 1  ;;  %v3725_v54 = vrot.slane %v4881_v32, 5 }
 0x2b2   :  { %v2187_v20 = vld [vmem:[#allocation13 + $0x19e8] sm:$0xff]  ;;  %3272 = vmatpush.msrb.mxu3 %v1915_v57  ;;  %3288 = vmatpush.msra.mxu0 %v2075_v24  ;;  %v1452_v57 = vld [vmem:[#allocation13 + $0x2f0] sm:$0xff] }
 0x2b3   :  { %v2355_v34 = vld [vmem:[#allocation13 + $0x1f28] sm:$0xff]  ;;  %3310 = vmatpush.msra.mxu2 %v2187_v20  ;;  %v2960_v10 = vadd.f32 %v2959_v8, %v2940_v23  ;;  %3218 = vmatmul.f32.vlgmr.msrb.gmra.mxu0 %v4906_v17  ;;  %v3693_v20 = vrot.slane %v4868_v12, 3 }
 0x2b4   :  { %v1907_v44 = vld [vmem:[#allocation13 + $0x1128] sm:$0xff]  ;;  %3325 = vmatpush.msra.mxu1 %v2355_v34  ;;  %3238 = vmatmul.f32.vlgmr.msrb.gmra.mxu2 %v4900_v41  ;;  %v3680_v34 = vrot.slane %v4881_v32, 2 }
 0x2b5   :  { %v2067_v29 = vld [vmem:[#allocation13 + $0x1628] sm:$0xff]  ;;  %3273 = vmatpush.msrb.mxu3 %v1907_v44  ;;  %v2980_v16 = vadd.f32 %v2979_v59, %v2960_v10  ;;  %v3681_v44 = vrot.slane %v4922_v40, 2  ;;  %3258 = vmatmul.f32.vlgmr.msrb.gmra.mxu1 %v4927_v48  ;;  %v3726_v48 = vrot.slane %v4922_v40, 5  ;;  %v1580_v59 = vld [vmem:[#allocation13 + $0x6f0] sm:$0xff] }
 0x2b6   :  { %v2179_v61 = vld [vmem:[#allocation13 + $0x19a8] sm:$0xff]  ;;  %3289 = vmatpush.msra.mxu0 %v2067_v29  ;;  %v3695_v29 = vrot.slane %v4922_v40, 3 }
 0x2b7   :  { %v2347_v30 = vld [vmem:[#allocation13 + $0x1ee8] sm:$0xff]  ;;  %3311 = vmatpush.msra.mxu2 %v2179_v61  ;;  %v3000_v21 = vadd.f32 %v2999_v46, %v2980_v16  ;;  %v1612_v61 = vld [vmem:[#allocation13 + $0x7f0] sm:$0xff] }
 0x2b8   :  { %v1899_v19 = vld [vmem:[#allocation13 + $0x10e8] sm:$0xff]  ;;  %3326 = vmatpush.msra.mxu1 %v2347_v30  ;;  %v3019_v27 = vpop.f32.mrf.mxu1  ;;  %v1724_v30 = vld [vmem:[#allocation13 + $0xb70] sm:$0xff] }
 0x2b9   :  { %v2059_v38 = vld [vmem:[#allocation13 + $0x15e8] sm:$0xff]  ;;  %3274 = vmatpush.msrb.mxu3 %v1899_v19  ;;  %v4952_v24 = vadd.f32 %v3019_v27, %v3000_v21  ;;  %v1412_v16 = vld [vmem:[#allocation13 + $0x1b0] sm:$0xff] }
 0x2ba   :  { %v2171_v18 = vld [vmem:[#allocation13 + $0x1968] sm:$0xff]  ;;  %3290 = vmatpush.msra.mxu0 %v2059_v38  ;;  %v1572_v46 = vld [vmem:[#allocation13 + $0x6b0] sm:$0xff] }
 0x2bb   :  { %v2339_v39 = vld [vmem:[#allocation13 + $0x1ea8] sm:$0xff]  ;;  %3312 = vmatpush.msra.mxu2 %v2171_v18  ;;  %v3669_v19 = vrot.slane %v4952_v24, 1  ;;  %v3677_v63 = vadd.f32 %v3668_v45, %v4952_v24  ;;  %v3682_v38 = vrot.slane %v4952_v24, 2  ;;  %v3696_v18 = vrot.slane %v4952_v24, 3  ;;  %v1564_v21 = vld [vmem:[#allocation13 + $0x670] sm:$0xff] }
 0x2bc   :  { %v1891_v25 = vld [vmem:[#allocation13 + $0x10a8] sm:$0xff]  ;;  %3327 = vmatpush.msra.mxu1 %v2339_v39  ;;  %v3694_v39 = vrot.slane %v4881_v32, 3  ;;  %v1668_v27 = vld [vmem:[#allocation13 + $0x9b0] sm:$0xff] }
 0x2bd   :  { %v2051_v22 = vld [vmem:[#allocation13 + $0x15a8] sm:$0xff]  ;;  %3275 = vmatpush.msrb.mxu3 %v1891_v25  ;;  %v3710_v25 = vrot.slane %v4922_v40, 4  ;;  %v3691_v2 = vadd.f32 %v3681_v44, %v3669_v19  ;;  %v1436_v40 = vld [vmem:[#allocation13 + $0x270] sm:$0xff] }
 0x2be   :  { %v2163_v49 = vld [vmem:[#allocation13 + $0x1928] sm:$0xff]  ;;  %3291 = vmatpush.msra.mxu0 %v2051_v22  ;;  %v1444_v22 = vld [vmem:[#allocation13 + $0x2b0] sm:$0xff] }
 0x2bf   :  { %v2331_v50 = vld [vmem:[#allocation13 + $0x1e68] sm:$0xff]  ;;  %3313 = vmatpush.msra.mxu2 %v2163_v49  ;;  %v3711_v49 = vrot.slane %v4952_v24, 4  ;;  %v1836_v45 = vld [vmem:[#allocation13 + $0xef0] sm:$0xff] }
 0x2c0   :  { %v1883_v52 = vld [vmem:[#allocation13 + $0x1068] sm:$0xff]  ;;  %3328 = vmatpush.msra.mxu1 %v2331_v50  ;;  %v3709_v50 = vrot.slane %v4881_v32, 4  ;;  %v1428_v32 = vld [vmem:[#allocation13 + $0x230] sm:$0xff] }
 0x2c1   :  { %v2043_v35 = vld [vmem:[#allocation13 + $0x1568] sm:$0xff]  ;;  %3276 = vmatpush.msrb.mxu3 %v1883_v52  ;;  %v1380_v44 = vld [vmem:[#allocation13 + $0xb0] sm:$0xff] }
 0x2c2   :  { %v2155_v15 = vld [vmem:[#allocation13 + $0x18e8] sm:$0xff]  ;;  %3292 = vmatpush.msra.mxu0 %v2043_v35  ;;  %v3690_v35 = vadd.f32 %v3680_v34, %v3677_v63  ;;  %v1828_v34 = vld [vmem:[#allocation13 + $0xeb0] sm:$0xff] }
 0x2c3   :  { %v2323_v26 = vld [vmem:[#allocation13 + $0x1e28] sm:$0xff]  ;;  %3314 = vmatpush.msra.mxu2 %v2155_v15  ;;  %v3706_v15 = vadd.f32 %v3695_v29, %v3682_v38  ;;  %v1540_v29 = vld [vmem:[#allocation13 + $0x5b0] sm:$0xff] }
 0x2c4   :  { %v1875_v58 = vld [vmem:[#allocation13 + $0x1028] sm:$0xff]  ;;  %3329 = vmatpush.msra.mxu1 %v2323_v26  ;;  %v3708_v26 = vrot.slane %v4868_v12, 4  ;;  %v1532_v19 = vld [vmem:[#allocation13 + $0x570] sm:$0xff] }
 0x2c5   :  { %v2035_v0 = vld [vmem:[#allocation13 + $0x1528] sm:$0xff]  ;;  %3277 = vmatpush.msrb.mxu3 %v1875_v58  ;;  %v1596_v58 = vld [vmem:[#allocation13 + $0x770] sm:$0xff]  ;;  %v3721_v23 = vadd.f32 %v3709_v50, %v3706_v15 }
 0x2c6   :  { %v2147_v14 = vld [vmem:[#allocation13 + $0x18a8] sm:$0xff]  ;;  %3293 = vmatpush.msra.mxu0 %v2035_v0  ;;  %3278 = vmatmul.f32.vlgmr.msrb.gmra.mxu3 %v4912_v6  ;;  %v3722_v0 = vadd.f32 %v3710_v25, %v3696_v18  ;;  %v1644_v63 = vld [vmem:[#allocation13 + $0x8f0] sm:$0xff] }
 0x2c7   :  { %v2315_v31 = vld [vmem:[#allocation13 + $0x1de8] sm:$0xff]  ;;  %3315 = vmatpush.msra.mxu2 %v2147_v14  ;;  %3342 = vmatpush.msra.mxu3 %v1484_v9  ;;  %v4971_v14 = vadd.f32 %v3726_v48, %v3711_v49  ;;  %v1708_v9 = vld [vmem:[#allocation13 + $0xaf0] sm:$0xff] }
 0x2c8   :  { %v2027_v1 = vld [vmem:[#allocation13 + $0x14e8] sm:$0xff]  ;;  %3330 = vmatpush.msra.mxu1 %v2315_v31  ;;  %v3724_v31 = vrot.slane %v4868_v12, 5  ;;  %v4976_v8 = vadd.f32 %v3725_v54, %v3722_v0  ;;  %v1812_v38 = vld [vmem:[#allocation13 + $0xe30] sm:$0xff] }
 0x2c9   :  { %v2139_v4 = vld [vmem:[#allocation13 + $0x1868] sm:$0xff]  ;;  %3294 = vmatpush.msra.mxu0 %v2027_v1  ;;  %3343 = vmatpush.msra.mxu3 %v1476_v51  ;;  %v4974_v1 = vadd.f32 %v3693_v20, %v3690_v35  ;;  %v1868_v51 = vld [vmem:[#allocation13 + $0xff0] sm:$0xff] }
 0x2ca   :  { %v2307_v7 = vld [vmem:[#allocation13 + $0x1da8] sm:$0xff]  ;;  %3316 = vmatpush.msra.mxu2 %v2139_v4  ;;  %v3705_v4 = vadd.f32 %v3694_v39, %v3691_v2  ;;  %v4980_v10 = vadd.f32 %v3724_v31, %v3721_v23  ;;  %v1660_v20 = vld [vmem:[#allocation13 + $0x970] sm:$0xff] }
 0x2cb   :  { %v2019_v56 = vld [vmem:[#allocation13 + $0x14a8] sm:$0xff]  ;;  %3331 = vmatpush.msra.mxu1 %v2307_v7  ;;  %3344 = vmatpush.msra.mxu3 %v1468_v43  ;;  %v1700_v7 = vld [vmem:[#allocation13 + $0xab0] sm:$0xff] }
 0x2cc   :  { %v2131_v36 = vld [vmem:[#allocation13 + $0x1828] sm:$0xff]  ;;  %3295 = vmatpush.msra.mxu0 %v2019_v56  ;;  %v4978_v56 = vadd.f32 %v3708_v26, %v3705_v4  ;;  %v1684_v43 = vld [vmem:[#allocation13 + $0xa30] sm:$0xff] }
 0x2cd   :  { %v2299_v41 = vld [vmem:[#allocation13 + $0x1d68] sm:$0xff]  ;;  %3317 = vmatpush.msra.mxu2 %v2131_v36  ;;  %3345 = vmatpush.msra.mxu3 %v1460_v62  ;;  %v1420_v36 = vld [vmem:[#allocation13 + $0x1f0] sm:$0xff] }
 0x2ce   :  { %v2011_v60 = vld [vmem:[#allocation13 + $0x1468] sm:$0xff]  ;;  %3332 = vmatpush.msra.mxu1 %v2299_v41  ;;  %3318 = vmatmul.f32.vlgmr.msra.gmra.mxu2 %v4919_v33  ;;  %v1692_v41 = vld [vmem:[#allocation13 + $0xa70] sm:$0xff] }
 0x2cf   :  { %v2291_v37 = vld [vmem:[#allocation13 + $0x1d28] sm:$0xff]  ;;  %3382 = vmatpush.msrb.mxu2 %v1740_v11  ;;  %3296 = vmatpush.msra.mxu0 %v2011_v60  ;;  %v1860_v11 = vld [vmem:[#allocation13 + $0xfb0] sm:$0xff] }
 0x2d0   :  { %v2003_v17 = vld [vmem:[#allocation13 + $0x1428] sm:$0xff]  ;;  %3333 = vmatpush.msra.mxu1 %v2291_v37  ;;  %3346 = vmatpush.msra.mxu3 %v1452_v57  ;;  %v1852_v60 = vld [vmem:[#allocation13 + $0xf70] sm:$0xff] }
 0x2d1   :  { %v2283_v6 = vld [vmem:[#allocation13 + $0x1ce8] sm:$0xff]  ;;  %3383 = vmatpush.msrb.mxu2 %v1732_v13  ;;  %3297 = vmatpush.msra.mxu0 %v2003_v17  ;;  %v1404_v37 = vld [vmem:[#allocation13 + $0x170] sm:$0xff] }
 0x2d2   :  { %v2275_v33 = vld [vmem:[#allocation13 + $0x1ca8] sm:$0xff]  ;;  %3334 = vmatpush.msra.mxu1 %v2283_v6  ;;  %3298 = vmatmul.f32.vlgmr.msra.gmra.mxu0 %v4937_v53  ;;  %v1588_v53 = vld [vmem:[#allocation13 + $0x730] sm:$0xff] }
 0x2d3   :  { %3362 = vmatpush.msrb.mxu0 %v1612_v61  ;;  %3384 = vmatpush.msrb.mxu2 %v1724_v30  ;;  %v2267_v52 = vld [vmem:[#allocation13 + $0x1c68] sm:$0xff]  ;;  %v1676_v62 = vld [vmem:[#allocation13 + $0x9f0] sm:$0xff] }
 0x2d4   :  { %3335 = vmatpush.msra.mxu1 %v2275_v33  ;;  %3347 = vmatpush.msra.mxu3 %v1444_v22  ;;  %v2259_v42 = vld [vmem:[#allocation13 + $0x1c28] sm:$0xff]  ;;  %v1396_v13 = vld [vmem:[#allocation13 + $0x130] sm:$0xff] }
 0x2d5   :  { %3363 = vmatpush.msrb.mxu0 %v1604_v55  ;;  %3385 = vmatpush.msrb.mxu2 %v1716_v47  ;;  %v1556_v17 = vld [vmem:[#allocation13 + $0x630] sm:$0xff] }
 0x2d6   :  { %3336 = vmatpush.msra.mxu1 %v2267_v52  ;;  %3348 = vmatpush.msra.mxu3 %v1436_v40  ;;  %v1388_v6 = vld [vmem:[#allocation13 + $0xf0] sm:$0xff] }
 0x2d7   :  { %3364 = vmatpush.msrb.mxu0 %v1596_v58  ;;  %3386 = vmatpush.msrb.mxu2 %v1708_v9  ;;  %v1548_v57 = vld [vmem:[#allocation13 + $0x5f0] sm:$0xff] }
 0x2d8   :  { %3337 = vmatpush.msra.mxu1 %v2259_v42  ;;  %3349 = vmatpush.msra.mxu3 %v1428_v32  ;;  %v1652_v61 = vld [vmem:[#allocation13 + $0x930] sm:$0xff] }
 0x2d9   :  { %3338 = vmatmul.f32.vlgmr.msra.gmra.mxu1 %v4943_v3  ;;  %3365 = vmatpush.msrb.mxu0 %v1588_v53  ;;  %v1844_v3 = vld [vmem:[#allocation13 + $0xf30] sm:$0xff] }
 0x2da   :  { %3387 = vmatpush.msrb.mxu2 %v1700_v7  ;;  %3402 = vmatpush.msrb.mxu1 %v1868_v51  ;;  %v1820_v30 = vld [vmem:[#allocation13 + $0xe70] sm:$0xff] }
 0x2db   :  { %3350 = vmatpush.msra.mxu3 %v1420_v36  ;;  %3366 = vmatpush.msrb.mxu0 %v1580_v59  ;;  %v1372_v33 = vld [vmem:[#allocation13 + $0x70] sm:$0xff] }
 0x2dc   :  { %3388 = vmatpush.msrb.mxu2 %v1692_v41  ;;  %3403 = vmatpush.msrb.mxu1 %v1860_v11  ;;  %v1364_v18 = vld [vmem:[#allocation13 + $0x30] sm:$0xff] }
 0x2dd   :  { %3351 = vmatpush.msra.mxu3 %v1412_v16  ;;  %3367 = vmatpush.msrb.mxu0 %v1572_v46  ;;  %v1524_v39 = vld [vmem:[#allocation13 + $0x530] sm:$0xff] }
 0x2de   :  { %3389 = vmatpush.msrb.mxu2 %v1684_v43  ;;  %3404 = vmatpush.msrb.mxu1 %v1852_v60  ;;  %v1636_v25 = vld [vmem:[#allocation13 + $0x8b0] sm:$0xff] }
 0x2df   :  { %3352 = vmatpush.msra.mxu3 %v1404_v37  ;;  %3368 = vmatpush.msrb.mxu0 %v1564_v21  ;;  %v1804_v48 = vld [vmem:[#allocation13 + $0xdf0] sm:$0xff] }
 0x2e0   :  { %3390 = vmatpush.msrb.mxu2 %v1676_v62  ;;  %3405 = vmatpush.msrb.mxu1 %v1844_v3  ;;  %v1996_v22 = vld [vmem:[#allocation13 + $0x13f0] sm:$0xff] }
 0x2e1   :  { %3353 = vmatpush.msra.mxu3 %v1396_v13  ;;  %3369 = vmatpush.msrb.mxu0 %v1556_v17  ;;  %v1516_v55 = vld [vmem:[#allocation13 + $0x4f0] sm:$0xff] }
 0x2e2   :  { %3391 = vmatpush.msrb.mxu2 %v1668_v27  ;;  %3406 = vmatpush.msrb.mxu1 %v1836_v45  ;;  %v1628_v49 = vld [vmem:[#allocation13 + $0x870] sm:$0xff] }
 0x2e3   :  { %3354 = vmatpush.msra.mxu3 %v1388_v6  ;;  %3370 = vmatpush.msrb.mxu0 %v1548_v57  ;;  %v1796_v50 = vld [vmem:[#allocation13 + $0xdb0] sm:$0xff] }
 0x2e4   :  { %3392 = vmatpush.msrb.mxu2 %v1660_v20  ;;  %3407 = vmatpush.msrb.mxu1 %v1828_v34  ;;  %v1988_v47 = vld [vmem:[#allocation13 + $0x13b0] sm:$0xff] }
 0x2e5   :  { %3355 = vmatpush.msra.mxu3 %v1380_v44  ;;  %3371 = vmatpush.msrb.mxu0 %v1540_v29  ;;  %v1508_v52 = vld [vmem:[#allocation13 + $0x4b0] sm:$0xff] }
 0x2e6   :  { %3393 = vmatpush.msrb.mxu2 %v1652_v61  ;;  %3408 = vmatpush.msrb.mxu1 %v1820_v30  ;;  %v1620_v35 = vld [vmem:[#allocation13 + $0x830] sm:$0xff] }
 0x2e7   :  { %3356 = vmatpush.msra.mxu3 %v1372_v33  ;;  %3372 = vmatpush.msrb.mxu0 %v1532_v19  ;;  %v1788_v2 = vld [vmem:[#allocation13 + $0xd70] sm:$0xff] }
 0x2e8   :  { %3394 = vmatpush.msrb.mxu2 %v1644_v63  ;;  %3409 = vmatpush.msrb.mxu1 %v1812_v38  ;;  %v1980_v15 = vld [vmem:[#allocation13 + $0x1370] sm:$0xff] }
 0x2e9   :  { %3357 = vmatpush.msra.mxu3 %v1364_v18  ;;  %3373 = vmatpush.msrb.mxu0 %v1524_v39  ;;  %v2252_v26 = vld [vmem:[#allocation13 + $0x1bf0] sm:$0xff] }
 0x2ea   :  { %3395 = vmatpush.msrb.mxu2 %v1636_v25  ;;  %3410 = vmatpush.msrb.mxu1 %v1804_v48  ;;  %v1500_v54 = vld [vmem:[#allocation13 + $0x470] sm:$0xff] }
 0x2eb   :  { %3422 = vmatpush.msrb.mxu3 %v1996_v22  ;;  %3374 = vmatpush.msrb.mxu0 %v1516_v55  ;;  %v1780_v40 = vld [vmem:[#allocation13 + $0xd30] sm:$0xff]  ;;  %v4986_v55 = vld [vmem:[%s5119_s9] sm:$0x3f] }
 0x2ec   :  { %3396 = vmatpush.msrb.mxu2 %v1628_v49  ;;  %3411 = vmatpush.msrb.mxu1 %v1796_v50  ;;  %v1972_v58 = vld [vmem:[#allocation13 + $0x1330] sm:$0xff] }
 0x2ed   :  { %3423 = vmatpush.msrb.mxu3 %v1988_v47  ;;  %3375 = vmatpush.msrb.mxu0 %v1508_v52  ;;  %v2244_v0 = vld [vmem:[#allocation13 + $0x1bb0] sm:$0xff] }
 0x2ee   :  { %3397 = vmatpush.msrb.mxu2 %v1620_v35  ;;  %3412 = vmatpush.msrb.mxu1 %v1788_v2  ;;  %v1492_v31 = vld [vmem:[#allocation13 + $0x430] sm:$0xff] }
 0x2ef   :  { %3424 = vmatpush.msrb.mxu3 %v1980_v15  ;;  %3376 = vmatpush.msrb.mxu0 %v1500_v54  ;;  %v1772_v9 = vld [vmem:[#allocation13 + $0xcf0] sm:$0xff]  ;;  %v1485_v54 = vld [vmem:[#allocation13 + $0x3f8] sm:$0xff] }
 0x2f0   :  { %3462 = vmatpush.msra.mxu2 %v2252_v26  ;;  %v1964_v42 = vld [vmem:[#allocation13 + $0x12f0] sm:$0xff]  ;;  %3413 = vmatpush.msrb.mxu1 %v1780_v40 }
 0x2f1   :  { %3425 = vmatpush.msrb.mxu3 %v1972_v58  ;;  %v2124_v4 = vld [vmem:[#allocation13 + $0x17f0] sm:$0xff]  ;;  %3377 = vmatpush.msrb.mxu0 %v1492_v31 }
 0x2f2   :  { %v2236_v23 = vld [vmem:[#allocation13 + $0x1b70] sm:$0xff]  ;;  %3463 = vmatpush.msra.mxu2 %v2244_v0  ;;  %3414 = vmatpush.msrb.mxu1 %v1772_v9 }
 0x2f3   :  { %v1764_v32 = vld [vmem:[#allocation13 + $0xcb0] sm:$0xff]  ;;  %3426 = vmatpush.msrb.mxu3 %v1964_v42  ;;  %3442 = vmatpush.msra.mxu0 %v2124_v4  ;;  %v1477_v42 = vld [vmem:[#allocation13 + $0x3b8] sm:$0xff] }
 0x2f4   :  { %v1956_v53 = vld [vmem:[#allocation13 + $0x12b0] sm:$0xff]  ;;  %3464 = vmatpush.msra.mxu2 %v2236_v23  ;;  %3415 = vmatpush.msrb.mxu1 %v1764_v32  ;;  %v4998_v23 = vld [vmem:[%s5119_s9 + $0x8] sm:$0x3f] }
 0x2f5   :  { %v2116_v7 = vld [vmem:[#allocation13 + $0x17b0] sm:$0xff]  ;;  %3427 = vmatpush.msrb.mxu3 %v1956_v53  ;;  %3378 = vmatmul.f32.vlgmr.msrb.gmra.mxu0 %v4998_v23  ;;  %v1741_v53 = vld [vmem:[#allocation13 + $0xbf8] sm:$0xff] }
 0x2f6   :  { %v2228_v51 = vld [vmem:[#allocation13 + $0x1b30] sm:$0xff]  ;;  %3443 = vmatpush.msra.mxu0 %v2116_v7  ;;  %3358 = vmatmul.f32.vlgmr.msra.gmra.mxu3 %v4986_v55  ;;  %v5004_v7 = vld [vmem:[%s5119_s9 + $0x20] sm:$0x3f] }
 0x2f7   :  { %v1756_v36 = vld [vmem:[#allocation13 + $0xc70] sm:$0xff]  ;;  %3465 = vmatpush.msra.mxu2 %v2228_v51  ;;  %v1469_v51 = vld [vmem:[#allocation13 + $0x378] sm:$0xff] }
 0x2f8   :  { %v1948_v59 = vld [vmem:[#allocation13 + $0x1270] sm:$0xff]  ;;  %3416 = vmatpush.msrb.mxu1 %v1756_v36 }
 0x2f9   :  { %v2108_v41 = vld [vmem:[#allocation13 + $0x1770] sm:$0xff]  ;;  %3428 = vmatpush.msrb.mxu3 %v1948_v59 }
 0x2fa   :  { %v2220_v11 = vld [vmem:[#allocation13 + $0x1af0] sm:$0xff]  ;;  %3444 = vmatpush.msra.mxu0 %v2108_v41  ;;  %v1461_v41 = vld [vmem:[#allocation13 + $0x338] sm:$0xff] }
 0x2fb   :  { %v1748_v16 = vld [vmem:[#allocation13 + $0xc30] sm:$0xff]  ;;  %3466 = vmatpush.msra.mxu2 %v2220_v11  ;;  %v1733_v11 = vld [vmem:[#allocation13 + $0xbb8] sm:$0xff] }
 0x2fc   :  { %v1940_v46 = vld [vmem:[#allocation13 + $0x1230] sm:$0xff]  ;;  %3417 = vmatpush.msrb.mxu1 %v1748_v16 }
 0x2fd   :  { %v2100_v43 = vld [vmem:[#allocation13 + $0x1730] sm:$0xff]  ;;  %3429 = vmatpush.msrb.mxu3 %v1940_v46 }
 0x2fe   :  { %v2212_v60 = vld [vmem:[#allocation13 + $0x1ab0] sm:$0xff]  ;;  %3445 = vmatpush.msra.mxu0 %v2100_v43 }
 0x2ff   :  { %v2380_v37 = vld [vmem:[#allocation13 + $0x1ff0] sm:$0xff]  ;;  %3467 = vmatpush.msra.mxu2 %v2212_v60  ;;  %v1453_v60 = vld [vmem:[#allocation13 + $0x2f8] sm:$0xff] }
 0x300   :  { %v1932_v21 = vld [vmem:[#allocation13 + $0x11f0] sm:$0xff]  ;;  %3482 = vmatpush.msra.mxu1 %v2380_v37  ;;  %v5016_v37 = vld [vmem:[%s5119_s9 + $0x18] sm:$0x3f] }
 0x301   :  { %v2092_v62 = vld [vmem:[#allocation13 + $0x16f0] sm:$0xff]  ;;  %3430 = vmatpush.msrb.mxu3 %v1932_v21  ;;  %3418 = vmatmul.f32.vlgmr.msrb.gmra.mxu1 %v5016_v37  ;;  %v1613_v21 = vld [vmem:[#allocation13 + $0x7f8] sm:$0xff] }
 0x302   :  { %v2204_v3 = vld [vmem:[#allocation13 + $0x1a70] sm:$0xff]  ;;  %3446 = vmatpush.msra.mxu0 %v2092_v62  ;;  %v1725_v62 = vld [vmem:[#allocation13 + $0xb78] sm:$0xff] }
 0x303   :  { %v2372_v13 = vld [vmem:[#allocation13 + $0x1fb0] sm:$0xff]  ;;  %3468 = vmatpush.msra.mxu2 %v2204_v3 }
 0x304   :  { %v1924_v17 = vld [vmem:[#allocation13 + $0x11b0] sm:$0xff]  ;;  %3483 = vmatpush.msra.mxu1 %v2372_v13  ;;  %v1445_v13 = vld [vmem:[#allocation13 + $0x2b8] sm:$0xff] }
 0x305   :  { %v2084_v27 = vld [vmem:[#allocation13 + $0x16b0] sm:$0xff]  ;;  %3431 = vmatpush.msrb.mxu3 %v1924_v17  ;;  %v1605_v17 = vld [vmem:[#allocation13 + $0x7b8] sm:$0xff] }
 0x306   :  { %v2196_v45 = vld [vmem:[#allocation13 + $0x1a30] sm:$0xff]  ;;  %3447 = vmatpush.msra.mxu0 %v2084_v27  ;;  %v1717_v27 = vld [vmem:[#allocation13 + $0xb38] sm:$0xff] }
 0x307   :  { %v2364_v6 = vld [vmem:[#allocation13 + $0x1f70] sm:$0xff]  ;;  %3469 = vmatpush.msra.mxu2 %v2196_v45 }
 0x308   :  { %v1916_v57 = vld [vmem:[#allocation13 + $0x1170] sm:$0xff]  ;;  %3484 = vmatpush.msra.mxu1 %v2364_v6  ;;  %v5022_v6 = vld [vmem:[%s5119_s9 + $0x28] sm:$0x3f] }
 0x309   :  { %v2076_v20 = vld [vmem:[#allocation13 + $0x1670] sm:$0xff]  ;;  %3432 = vmatpush.msrb.mxu3 %v1916_v57  ;;  %v1437_v57 = vld [vmem:[#allocation13 + $0x278] sm:$0xff] }
 0x30a   :  { %v2188_v34 = vld [vmem:[#allocation13 + $0x19f0] sm:$0xff]  ;;  %3448 = vmatpush.msra.mxu0 %v2076_v20  ;;  %v1597_v20 = vld [vmem:[#allocation13 + $0x778] sm:$0xff] }
 0x30b   :  { %v2356_v44 = vld [vmem:[#allocation13 + $0x1f30] sm:$0xff]  ;;  %3470 = vmatpush.msra.mxu2 %v2188_v34  ;;  %v1709_v34 = vld [vmem:[#allocation13 + $0xaf8] sm:$0xff] }
 0x30c   :  { %v1908_v29 = vld [vmem:[#allocation13 + $0x1130] sm:$0xff]  ;;  %3485 = vmatpush.msra.mxu1 %v2356_v44 }
 0x30d   :  { %v2068_v61 = vld [vmem:[#allocation13 + $0x1630] sm:$0xff]  ;;  %3433 = vmatpush.msrb.mxu3 %v1908_v29  ;;  %v1429_v29 = vld [vmem:[#allocation13 + $0x238] sm:$0xff] }
 0x30e   :  { %v2180_v30 = vld [vmem:[#allocation13 + $0x19b0] sm:$0xff]  ;;  %3449 = vmatpush.msra.mxu0 %v2068_v61  ;;  %v1589_v61 = vld [vmem:[#allocation13 + $0x738] sm:$0xff] }
 0x30f   :  { %v2348_v33 = vld [vmem:[#allocation13 + $0x1ef0] sm:$0xff]  ;;  %3471 = vmatpush.msra.mxu2 %v2180_v30  ;;  %v1701_v30 = vld [vmem:[#allocation13 + $0xab8] sm:$0xff] }
 0x310   :  { %v1900_v19 = vld [vmem:[#allocation13 + $0x10f0] sm:$0xff]  ;;  %3486 = vmatpush.msra.mxu1 %v2348_v33  ;;  %v1869_v33 = vld [vmem:[#allocation13 + $0xff8] sm:$0xff] }
 0x311   :  { %v2060_v63 = vld [vmem:[#allocation13 + $0x15f0] sm:$0xff]  ;;  %3434 = vmatpush.msrb.mxu3 %v1900_v19  ;;  %v1421_v19 = vld [vmem:[#allocation13 + $0x1f8] sm:$0xff] }
 0x312   :  { %v2172_v38 = vld [vmem:[#allocation13 + $0x1970] sm:$0xff]  ;;  %3450 = vmatpush.msra.mxu0 %v2060_v63  ;;  %v5028_v63 = vld [vmem:[%s5119_s9 + $0x38] sm:$0x3f] }
 0x313   :  { %v2340_v18 = vld [vmem:[#allocation13 + $0x1eb0] sm:$0xff]  ;;  %3472 = vmatpush.msra.mxu2 %v2172_v38  ;;  %v1581_v38 = vld [vmem:[#allocation13 + $0x6f8] sm:$0xff] }
 0x314   :  { %v1892_v39 = vld [vmem:[#allocation13 + $0x10b0] sm:$0xff]  ;;  %3487 = vmatpush.msra.mxu1 %v2340_v18  ;;  %v1693_v18 = vld [vmem:[#allocation13 + $0xa78] sm:$0xff] }
 0x315   :  { %v2052_v25 = vld [vmem:[#allocation13 + $0x15b0] sm:$0xff]  ;;  %3435 = vmatpush.msrb.mxu3 %v1892_v39  ;;  %v1861_v39 = vld [vmem:[#allocation13 + $0xfb8] sm:$0xff] }
 0x316   :  { %v2164_v48 = vld [vmem:[#allocation13 + $0x1930] sm:$0xff]  ;;  %3451 = vmatpush.msra.mxu0 %v2052_v25  ;;  %v1413_v25 = vld [vmem:[#allocation13 + $0x1b8] sm:$0xff] }
 0x317   :  { %v2332_v22 = vld [vmem:[#allocation13 + $0x1e70] sm:$0xff]  ;;  %3473 = vmatpush.msra.mxu2 %v2164_v48  ;;  %v1573_v48 = vld [vmem:[#allocation13 + $0x6b8] sm:$0xff] }
 0x318   :  { %v1884_v49 = vld [vmem:[#allocation13 + $0x1070] sm:$0xff]  ;;  %3488 = vmatpush.msra.mxu1 %v2332_v22  ;;  %v1685_v22 = vld [vmem:[#allocation13 + $0xa38] sm:$0xff] }
 0x319   :  { %v2044_v50 = vld [vmem:[#allocation13 + $0x1570] sm:$0xff]  ;;  %3436 = vmatpush.msrb.mxu3 %v1884_v49  ;;  %v1853_v49 = vld [vmem:[#allocation13 + $0xf78] sm:$0xff] }
 0x31a   :  { %v2156_v47 = vld [vmem:[#allocation13 + $0x18f0] sm:$0xff]  ;;  %3452 = vmatpush.msra.mxu0 %v2044_v50  ;;  %v1405_v50 = vld [vmem:[#allocation13 + $0x178] sm:$0xff] }
 0x31b   :  { %v2324_v52 = vld [vmem:[#allocation13 + $0x1e30] sm:$0xff]  ;;  %3474 = vmatpush.msra.mxu2 %v2156_v47  ;;  %v1565_v47 = vld [vmem:[#allocation13 + $0x678] sm:$0xff] }
 0x31c   :  { %v1876_v35 = vld [vmem:[#allocation13 + $0x1030] sm:$0xff]  ;;  %3489 = vmatpush.msra.mxu1 %v2324_v52  ;;  %v1677_v52 = vld [vmem:[#allocation13 + $0x9f8] sm:$0xff] }
 0x31d   :  { %v2036_v2 = vld [vmem:[#allocation13 + $0x1530] sm:$0xff]  ;;  %3437 = vmatpush.msrb.mxu3 %v1876_v35  ;;  %v1845_v35 = vld [vmem:[#allocation13 + $0xf38] sm:$0xff] }
 0x31e   :  { %v2148_v15 = vld [vmem:[#allocation13 + $0x18b0] sm:$0xff]  ;;  %3453 = vmatpush.msra.mxu0 %v2036_v2  ;;  %3438 = vmatmul.f32.vlgmr.msrb.gmra.mxu3 %v5004_v7  ;;  %v1397_v2 = vld [vmem:[#allocation13 + $0x138] sm:$0xff] }
 0x31f   :  { %v2316_v26 = vld [vmem:[#allocation13 + $0x1df0] sm:$0xff]  ;;  %3475 = vmatpush.msra.mxu2 %v2148_v15  ;;  %3502 = vmatpush.msra.mxu3 %v1485_v54  ;;  %v1557_v15 = vld [vmem:[#allocation13 + $0x638] sm:$0xff] }
 0x320   :  { %v4992_v40 = vld [vmem:[%s5119_s9 + $0x10] sm:$0x3f]  ;;  %3490 = vmatpush.msra.mxu1 %v2316_v26  ;;  %v1669_v26 = vld [vmem:[#allocation13 + $0x9b8] sm:$0xff] }
 0x321   :  { %3398 = vmatmul.f32.vlgmr.msrb.gmra.mxu2 %v4992_v40  ;;  %v2028_v58 = vld [vmem:[#allocation13 + $0x14f0] sm:$0xff]  ;;  %3503 = vmatpush.msra.mxu3 %v1477_v42  ;;  %v1837_v54 = vld [vmem:[#allocation13 + $0xef8] sm:$0xff] }
 0x322   :  { %v2140_v0 = vld [vmem:[#allocation13 + $0x1870] sm:$0xff]  ;;  %3454 = vmatpush.msra.mxu0 %v2028_v58  ;;  %v1389_v58 = vld [vmem:[#allocation13 + $0xf8] sm:$0xff] }
 0x323   :  { %v2308_v31 = vld [vmem:[#allocation13 + $0x1db0] sm:$0xff]  ;;  %3476 = vmatpush.msra.mxu2 %v2140_v0  ;;  %3504 = vmatpush.msra.mxu3 %v1469_v51  ;;  %v1549_v0 = vld [vmem:[#allocation13 + $0x5f8] sm:$0xff] }
 0x324   :  { %v2020_v9 = vld [vmem:[#allocation13 + $0x14b0] sm:$0xff]  ;;  %3491 = vmatpush.msra.mxu1 %v2308_v31  ;;  %v1661_v31 = vld [vmem:[#allocation13 + $0x978] sm:$0xff] }
 0x325   :  { %v2132_v4 = vld [vmem:[#allocation13 + $0x1830] sm:$0xff]  ;;  %3455 = vmatpush.msra.mxu0 %v2020_v9  ;;  %3505 = vmatpush.msra.mxu3 %v1461_v41  ;;  %v1829_v9 = vld [vmem:[#allocation13 + $0xeb8] sm:$0xff] }
 0x326   :  { %v2300_v32 = vld [vmem:[#allocation13 + $0x1d70] sm:$0xff]  ;;  %3477 = vmatpush.msra.mxu2 %v2132_v4  ;;  %v1381_v42 = vld [vmem:[#allocation13 + $0xb8] sm:$0xff] }
 0x327   :  { %v2012_v36 = vld [vmem:[#allocation13 + $0x1470] sm:$0xff]  ;;  %3492 = vmatpush.msra.mxu1 %v2300_v32  ;;  %3506 = vmatpush.msra.mxu3 %v1453_v60  ;;  %v1541_v4 = vld [vmem:[#allocation13 + $0x5b8] sm:$0xff] }
 0x328   :  { %v2292_v59 = vld [vmem:[#allocation13 + $0x1d30] sm:$0xff]  ;;  %3542 = vmatpush.msrb.mxu2 %v1741_v53  ;;  %3456 = vmatpush.msra.mxu0 %v2012_v36  ;;  %v1653_v32 = vld [vmem:[#allocation13 + $0x938] sm:$0xff] }
 0x329   :  { %v2004_v16 = vld [vmem:[#allocation13 + $0x1430] sm:$0xff]  ;;  %3493 = vmatpush.msra.mxu1 %v2292_v59  ;;  %3507 = vmatpush.msra.mxu3 %v1445_v13  ;;  %v1821_v53 = vld [vmem:[#allocation13 + $0xe78] sm:$0xff] }
 0x32a   :  { %v5010_v46 = vld [vmem:[%s5119_s9 + $0x30] sm:$0x3f]  ;;  %3543 = vmatpush.msrb.mxu2 %v1733_v11  ;;  %3457 = vmatpush.msra.mxu0 %v2004_v16  ;;  %v1373_v51 = vld [vmem:[#allocation13 + $0x78] sm:$0xff] }
 0x32b   :  { %3478 = vmatmul.f32.vlgmr.msra.gmra.mxu2 %v5010_v46  ;;  %v2284_v43 = vld [vmem:[#allocation13 + $0x1cf0] sm:$0xff]  ;;  %3458 = vmatmul.f32.vlgmr.msra.gmra.mxu0 %v5022_v6  ;;  %v1533_v36 = vld [vmem:[#allocation13 + $0x578] sm:$0xff] }
 0x32c   :  { %v2276_v3 = vld [vmem:[#allocation13 + $0x1cb0] sm:$0xff]  ;;  %3494 = vmatpush.msra.mxu1 %v2284_v43  ;;  %3522 = vmatpush.msrb.mxu0 %v1613_v21  ;;  %v1645_v59 = vld [vmem:[#allocation13 + $0x8f8] sm:$0xff] }
 0x32d   :  { %3544 = vmatpush.msrb.mxu2 %v1725_v62  ;;  %v2268_v45 = vld [vmem:[#allocation13 + $0x1c70] sm:$0xff]  ;;  %3508 = vmatpush.msra.mxu3 %v1437_v57  ;;  %v1813_v41 = vld [vmem:[#allocation13 + $0xe38] sm:$0xff] }
 0x32e   :  { %3495 = vmatpush.msra.mxu1 %v2276_v3  ;;  %3523 = vmatpush.msrb.mxu0 %v1605_v17  ;;  %v2260_v44 = vld [vmem:[#allocation13 + $0x1c30] sm:$0xff]  ;;  %v1365_v11 = vld [vmem:[#allocation13 + $0x38] sm:$0xff] }
 0x32f   :  { %3545 = vmatpush.msrb.mxu2 %v1717_v27  ;;  %3509 = vmatpush.msra.mxu3 %v1429_v29  ;;  %v1525_v16 = vld [vmem:[#allocation13 + $0x538] sm:$0xff]  ;;  %v3039_v29 = vpop.f32.mrf.mxu3 }
 0x330   :  { %3496 = vmatpush.msra.mxu1 %v2268_v45  ;;  %3524 = vmatpush.msrb.mxu0 %v1597_v20  ;;  %v1637_v43 = vld [vmem:[#allocation13 + $0x8b8] sm:$0xff] }
 0x331   :  { %3546 = vmatpush.msrb.mxu2 %v1709_v34  ;;  %3510 = vmatpush.msra.mxu3 %v1421_v19  ;;  %v1805_v60 = vld [vmem:[#allocation13 + $0xdf8] sm:$0xff] }
 0x332   :  { %3497 = vmatpush.msra.mxu1 %v2260_v44  ;;  %3525 = vmatpush.msrb.mxu0 %v1589_v61  ;;  %v1997_v21 = vld [vmem:[#allocation13 + $0x13f8] sm:$0xff] }
 0x333   :  { %3498 = vmatmul.f32.vlgmr.msra.gmra.mxu1 %v5028_v63  ;;  %3547 = vmatpush.msrb.mxu2 %v1701_v30  ;;  %v1517_v62 = vld [vmem:[#allocation13 + $0x4f8] sm:$0xff] }
 0x334   :  { %3562 = vmatpush.msrb.mxu1 %v1869_v33  ;;  %3526 = vmatpush.msrb.mxu0 %v1581_v38  ;;  %v1629_v3 = vld [vmem:[#allocation13 + $0x878] sm:$0xff] }
 0x335   :  { %3548 = vmatpush.msrb.mxu2 %v1693_v18  ;;  %3511 = vmatpush.msra.mxu3 %v1413_v25  ;;  %v1797_v13 = vld [vmem:[#allocation13 + $0xdb8] sm:$0xff] }
 0x336   :  { %3563 = vmatpush.msrb.mxu1 %v1861_v39  ;;  %3527 = vmatpush.msrb.mxu0 %v1573_v48  ;;  %v1989_v17 = vld [vmem:[#allocation13 + $0x13b8] sm:$0xff]  ;;  %v3059_v39 = vpop.f32.mrf.mxu0 }
 0x337   :  { %3549 = vmatpush.msrb.mxu2 %v1685_v22  ;;  %3512 = vmatpush.msra.mxu3 %v1405_v50  ;;  %v1509_v27 = vld [vmem:[#allocation13 + $0x4b8] sm:$0xff]  ;;  %v3079_v50 = vpop.f32.mrf.mxu2 }
 0x338   :  { %3564 = vmatpush.msrb.mxu1 %v1853_v49  ;;  %3528 = vmatpush.msrb.mxu0 %v1565_v47  ;;  %v1621_v45 = vld [vmem:[#allocation13 + $0x838] sm:$0xff] }
 0x339   :  { %3550 = vmatpush.msrb.mxu2 %v1677_v52  ;;  %3513 = vmatpush.msra.mxu3 %v1397_v2  ;;  %v1789_v57 = vld [vmem:[#allocation13 + $0xd78] sm:$0xff] }
 0x33a   :  { %3565 = vmatpush.msrb.mxu1 %v1845_v35  ;;  %3529 = vmatpush.msrb.mxu0 %v1557_v15  ;;  %v1981_v20 = vld [vmem:[#allocation13 + $0x1378] sm:$0xff] }
 0x33b   :  { %3551 = vmatpush.msrb.mxu2 %v1669_v26  ;;  %3514 = vmatpush.msra.mxu3 %v1389_v58  ;;  %v2253_v34 = vld [vmem:[#allocation13 + $0x1bf8] sm:$0xff] }
 0x33c   :  { %3566 = vmatpush.msrb.mxu1 %v1837_v54  ;;  %3530 = vmatpush.msrb.mxu0 %v1549_v0  ;;  %v1501_v44 = vld [vmem:[#allocation13 + $0x478] sm:$0xff]  ;;  %v3099_v0 = vpop.f32.mrf.mxu1 }
 0x33d   :  { %3552 = vmatpush.msrb.mxu2 %v1661_v31  ;;  %3515 = vmatpush.msra.mxu3 %v1381_v42  ;;  %v1781_v61 = vld [vmem:[#allocation13 + $0xd38] sm:$0xff]  ;;  %v3119_v42 = vpop.f32.mrf.mxu3 }
 0x33e   :  { %3567 = vmatpush.msrb.mxu1 %v1829_v9  ;;  %3531 = vmatpush.msrb.mxu0 %v1541_v4  ;;  %v1973_v30 = vld [vmem:[#allocation13 + $0x1338] sm:$0xff] }
 0x33f   :  { %3553 = vmatpush.msrb.mxu2 %v1653_v32  ;;  %3516 = vmatpush.msra.mxu3 %v1373_v51  ;;  %v2245_v33 = vld [vmem:[#allocation13 + $0x1bb8] sm:$0xff] }
 0x340   :  { %3568 = vmatpush.msrb.mxu1 %v1821_v53  ;;  %3532 = vmatpush.msrb.mxu0 %v1533_v36  ;;  %v1493_v19 = vld [vmem:[#allocation13 + $0x438] sm:$0xff]  ;;  %v3060_v53 = vadd.f32 %v3059_v39, %v3039_v29 }
 0x341   :  { %3554 = vmatpush.msrb.mxu2 %v1645_v59  ;;  %3517 = vmatpush.msra.mxu3 %v1365_v11  ;;  %v1773_v38 = vld [vmem:[#allocation13 + $0xcf8] sm:$0xff]  ;;  %v5031_v11 = vpop.f32.mrf.mxu0 }
 0x342   :  { %3569 = vmatpush.msrb.mxu1 %v1813_v41  ;;  %3533 = vmatpush.msrb.mxu0 %v1525_v16  ;;  %v1965_v18 = vld [vmem:[#allocation13 + $0x12f8] sm:$0xff] }
 0x343   :  { %3555 = vmatpush.msrb.mxu2 %v1637_v43  ;;  %3582 = vmatpush.msrb.mxu3 %v1997_v21  ;;  %v2125_v25 = vld [vmem:[#allocation13 + $0x17f8] sm:$0xff] }
 0x344   :  { %3570 = vmatpush.msrb.mxu1 %v1805_v60  ;;  %3534 = vmatpush.msrb.mxu0 %v1517_v62  ;;  %v2237_v48 = vld [vmem:[#allocation13 + $0x1b78] sm:$0xff]  ;;  %v3080_v62 = vadd.f32 %v3079_v50, %v3060_v53 }
 0x345   :  { %3556 = vmatpush.msrb.mxu2 %v1629_v3  ;;  %3583 = vmatpush.msrb.mxu3 %v1989_v17  ;;  %v1765_v22 = vld [vmem:[#allocation13 + $0xcb8] sm:$0xff]  ;;  %v5033_v3 = vpop.f32.mrf.mxu2 }
 0x346   :  { %3571 = vmatpush.msrb.mxu1 %v1797_v13  ;;  %3535 = vmatpush.msrb.mxu0 %v1509_v27  ;;  %v1957_v49 = vld [vmem:[#allocation13 + $0x12b8] sm:$0xff]  ;;  %v3100_v29 = vadd.f32 %v3099_v0, %v3080_v62 }
 0x347   :  { %3557 = vmatpush.msrb.mxu2 %v1621_v45  ;;  %3584 = vmatpush.msrb.mxu3 %v1981_v20  ;;  %v2117_v47 = vld [vmem:[#allocation13 + $0x17b8] sm:$0xff] }
 0x348   :  { %3572 = vmatpush.msrb.mxu1 %v1789_v57  ;;  %3536 = vmatpush.msrb.mxu0 %v1501_v44  ;;  %v2229_v52 = vld [vmem:[#allocation13 + $0x1b38] sm:$0xff]  ;;  %v3199_v44 = vpop.f32.mrf.mxu3  ;;  %v3120_v50 = vadd.f32 %v3119_v42, %v3100_v29 }
 0x349   :  { %3622 = vmatpush.msra.mxu2 %v2253_v34  ;;  %3585 = vmatpush.msrb.mxu3 %v1973_v30  ;;  %v1757_v35 = vld [vmem:[#allocation13 + $0xc78] sm:$0xff] }
 0x34a   :  { %3573 = vmatpush.msrb.mxu1 %v1781_v61  ;;  %3537 = vmatpush.msrb.mxu0 %v1493_v19  ;;  %v1949_v2 = vld [vmem:[#allocation13 + $0x1278] sm:$0xff]  ;;  %v5035_v61 = vpop.f32.mrf.mxu1  ;;  %v3140_v0 = vadd.f32 %v5031_v11, %v3120_v50 }
 0x34b   :  { %3623 = vmatpush.msra.mxu2 %v2245_v33  ;;  %3586 = vmatpush.msrb.mxu3 %v1965_v18  ;;  %v2109_v15 = vld [vmem:[#allocation13 + $0x1778] sm:$0xff] }
 0x34c   :  { %3574 = vmatpush.msrb.mxu1 %v1773_v38  ;;  %3602 = vmatpush.msra.mxu0 %v2125_v25  ;;  %v2221_v26 = vld [vmem:[#allocation13 + $0x1af8] sm:$0xff]  ;;  %v3219_v25 = vpop.f32.mrf.mxu0 }
 0x34d   :  { %3624 = vmatpush.msra.mxu2 %v2237_v48  ;;  %3587 = vmatpush.msrb.mxu3 %v1957_v49  ;;  %v1749_v54 = vld [vmem:[#allocation13 + $0xc38] sm:$0xff]  ;;  %v3220_v49 = vadd.f32 %v3219_v25, %v3199_v44  ;;  %v5054_v44 = vld [vmem:[#allocation14] sm:$0xff] }
 0x34e   :  { %3575 = vmatpush.msrb.mxu1 %v1765_v22  ;;  %3603 = vmatpush.msra.mxu0 %v2117_v47  ;;  %v1941_v58 = vld [vmem:[#allocation13 + $0x1238] sm:$0xff] }
 0x34f   :  { %3625 = vmatpush.msra.mxu2 %v2229_v52  ;;  %3588 = vmatpush.msrb.mxu3 %v1949_v2  ;;  %v2101_v31 = vld [vmem:[#allocation13 + $0x1738] sm:$0xff]  ;;  %v3239_v52 = vpop.f32.mrf.mxu2 }
 0x350   :  { %3576 = vmatpush.msrb.mxu1 %v1757_v35  ;;  %v2213_v9 = vld [vmem:[#allocation13 + $0x1ab8] sm:$0xff]  ;;  %3604 = vmatpush.msra.mxu0 %v2109_v15  ;;  %v3240_v15 = vadd.f32 %v3239_v52, %v3220_v49 }
 0x351   :  { %3626 = vmatpush.msra.mxu2 %v2221_v26  ;;  %v2381_v4 = vld [vmem:[#allocation13 + $0x1ff8] sm:$0xff]  ;;  %3589 = vmatpush.msrb.mxu3 %v1941_v58 }
 0x352   :  { %v1933_v32 = vld [vmem:[#allocation13 + $0x11f8] sm:$0xff]  ;;  %3577 = vmatpush.msrb.mxu1 %v1749_v54  ;;  %3605 = vmatpush.msra.mxu0 %v2101_v31 }
 0x353   :  { %v2093_v51 = vld [vmem:[#allocation13 + $0x16f8] sm:$0xff]  ;;  %3627 = vmatpush.msra.mxu2 %v2213_v9  ;;  %3590 = vmatpush.msrb.mxu3 %v1933_v32  ;;  %v3259_v9 = vpop.f32.mrf.mxu1  ;;  %v3279_v32 = vpop.f32.mrf.mxu3 }
 0x354   :  { %v2205_v36 = vld [vmem:[#allocation13 + $0x1a78] sm:$0xff]  ;;  %3642 = vmatpush.msra.mxu1 %v2381_v4  ;;  %3606 = vmatpush.msra.mxu0 %v2093_v51  ;;  %v3260_v4 = vadd.f32 %v3259_v9, %v3240_v15 }
 0x355   :  { %v2373_v59 = vld [vmem:[#allocation13 + $0x1fb8] sm:$0xff]  ;;  %3628 = vmatpush.msra.mxu2 %v2205_v36  ;;  %3518 = vmatmul.f32.vlgmr.msra.gmra.mxu3 %v4986_v55 }
 0x356   :  { %v1925_v41 = vld [vmem:[#allocation13 + $0x11b8] sm:$0xff]  ;;  %3643 = vmatpush.msra.mxu1 %v2373_v59  ;;  %3558 = vmatmul.f32.vlgmr.msrb.gmra.mxu2 %v4992_v40  ;;  %v3280_v36 = vadd.f32 %v3279_v32, %v3260_v4  ;;  %v3160_v59 = vadd.f32 %v5033_v3, %v3140_v0 }
 0x357   :  { %v2085_v16 = vld [vmem:[#allocation13 + $0x16b8] sm:$0xff]  ;;  %3591 = vmatpush.msrb.mxu3 %v1925_v41  ;;  %3538 = vmatmul.f32.vlgmr.msrb.gmra.mxu0 %v4998_v23 }
 0x358   :  { %v2197_v43 = vld [vmem:[#allocation13 + $0x1a38] sm:$0xff]  ;;  %3607 = vmatpush.msra.mxu0 %v2085_v16  ;;  %v3299_v16 = vpop.f32.mrf.mxu0  ;;  %3578 = vmatmul.f32.vlgmr.msrb.gmra.mxu1 %v5016_v37  ;;  %v5045_v3 = vadd.f32 %v5035_v61, %v3160_v59 }
 0x359   :  { %v2365_v60 = vld [vmem:[#allocation13 + $0x1f78] sm:$0xff]  ;;  %3629 = vmatpush.msra.mxu2 %v2197_v43 }
 0x35a   :  { %v1917_v21 = vld [vmem:[#allocation13 + $0x1178] sm:$0xff]  ;;  %3644 = vmatpush.msra.mxu1 %v2365_v60  ;;  %v3300_v60 = vadd.f32 %v3299_v16, %v3280_v36  ;;  %v3829_v37 = vrot.slane %v5045_v3, 7 }
 0x35b   :  { %v2077_v13 = vld [vmem:[#allocation13 + $0x1678] sm:$0xff]  ;;  %3592 = vmatpush.msrb.mxu3 %v1917_v21  ;;  %v3319_v21 = vpop.f32.mrf.mxu2 }
 0x35c   :  { %v2189_v17 = vld [vmem:[#allocation13 + $0x19f8] sm:$0xff]  ;;  %3608 = vmatpush.msra.mxu0 %v2077_v13  ;;  %v3320_v13 = vadd.f32 %v3319_v21, %v3300_v60  ;;  %v3772_v60 = vrot.slane %v5045_v3, 3 }
 0x35d   :  { %v2357_v27 = vld [vmem:[#allocation13 + $0x1f38] sm:$0xff]  ;;  %3630 = vmatpush.msra.mxu2 %v2189_v17  ;;  %v3339_v17 = vpop.f32.mrf.mxu1 }
 0x35e   :  { %v1909_v45 = vld [vmem:[#allocation13 + $0x1138] sm:$0xff]  ;;  %3645 = vmatpush.msra.mxu1 %v2357_v27  ;;  %v3745_v27 = vrot.slane %v5045_v3, 1 }
 0x35f   :  { %v2069_v57 = vld [vmem:[#allocation13 + $0x1638] sm:$0xff]  ;;  %3593 = vmatpush.msrb.mxu3 %v1909_v45 }
 0x360   :  { %v2181_v20 = vld [vmem:[#allocation13 + $0x19b8] sm:$0xff]  ;;  %3609 = vmatpush.msra.mxu0 %v2069_v57  ;;  %v5049_v57 = vadd.f32 %v3339_v17, %v3320_v13 }
 0x361   :  { %v2349_v34 = vld [vmem:[#allocation13 + $0x1ef8] sm:$0xff]  ;;  %3631 = vmatpush.msra.mxu2 %v2181_v20 }
 0x362   :  { %v1901_v30 = vld [vmem:[#allocation13 + $0x10f8] sm:$0xff]  ;;  %3646 = vmatpush.msra.mxu1 %v2349_v34  ;;  %v3754_v34 = vadd.f32 %v3745_v27, %v5049_v57  ;;  %v3746_v32 = vrot.slane %v5049_v57, 1  ;;  %v3759_v13 = vrot.slane %v5049_v57, 2  ;;  %v3788_v27 = vrot.slane %v5049_v57, 4 }
 0x363   :  { %v2061_v33 = vld [vmem:[#allocation13 + $0x15f8] sm:$0xff]  ;;  %3594 = vmatpush.msrb.mxu3 %v1901_v30  ;;  %v3860_v30 = vperm.slane %v5054_v44, 0 }
 0x364   :  { %v2173_v19 = vld [vmem:[#allocation13 + $0x1978] sm:$0xff]  ;;  %3610 = vmatpush.msra.mxu0 %v2061_v33  ;;  %v3830_v61 = vrot.slane %v3754_v34, 7  ;;  %v3847_v33 = vsel %vm373_vm10, %v4868_v12, %v3829_v37 }
 0x365   :  { %v2341_v38 = vld [vmem:[#allocation13 + $0x1eb8] sm:$0xff]  ;;  %3632 = vmatpush.msra.mxu2 %v2173_v19 }
 0x366   :  { %v1893_v18 = vld [vmem:[#allocation13 + $0x10b8] sm:$0xff]  ;;  %3647 = vmatpush.msra.mxu1 %v2341_v38  ;;  %v3878_v38 = vmul.f32 %v3860_v30, %v3847_v33 }
 0x367   :  { %v2053_v39 = vld [vmem:[#allocation13 + $0x15b8] sm:$0xff]  ;;  %3595 = vmatpush.msrb.mxu3 %v1893_v18 }
 0x368   :  { %v2165_v48 = vld [vmem:[#allocation13 + $0x1938] sm:$0xff]  ;;  %3611 = vmatpush.msra.mxu0 %v2053_v39 }
 0x369   :  { %v2333_v22 = vld [vmem:[#allocation13 + $0x1e78] sm:$0xff]  ;;  %3633 = vmatpush.msra.mxu2 %v2165_v48 }
 0x36a   :  { %v1885_v47 = vld [vmem:[#allocation13 + $0x1078] sm:$0xff]  ;;  %3648 = vmatpush.msra.mxu1 %v2333_v22 }
 0x36b   :  { %v2045_v35 = vld [vmem:[#allocation13 + $0x1578] sm:$0xff]  ;;  %3596 = vmatpush.msrb.mxu3 %v1885_v47 }
 0x36c   :  { %v2157_v2 = vld [vmem:[#allocation13 + $0x18f8] sm:$0xff]  ;;  %3612 = vmatpush.msra.mxu0 %v2045_v35 }
 0x36d   :  { %v2325_v55 = vld [vmem:[#allocation13 + $0x1e38] sm:$0xff]  ;;  %3634 = vmatpush.msra.mxu2 %v2157_v2 }
 0x36e   :  { %v1877_v26 = vld [vmem:[#allocation13 + $0x1038] sm:$0xff]  ;;  %3649 = vmatpush.msra.mxu1 %v2325_v55 }
 0x36f   :  { %v2037_v54 = vld [vmem:[#allocation13 + $0x1538] sm:$0xff]  ;;  %3597 = vmatpush.msrb.mxu3 %v1877_v26 }
 0x370   :  { %v2149_v58 = vld [vmem:[#allocation13 + $0x18b8] sm:$0xff]  ;;  %3613 = vmatpush.msra.mxu0 %v2037_v54  ;;  %3598 = vmatmul.f32.vlgmr.msrb.gmra.mxu3 %v5004_v7 }
 0x371   :  { %v2317_v31 = vld [vmem:[#allocation13 + $0x1df8] sm:$0xff]  ;;  %3635 = vmatpush.msra.mxu2 %v2149_v58 }
 0x372   :  { %v2029_v42 = vld [vmem:[#allocation13 + $0x14f8] sm:$0xff]  ;;  %3650 = vmatpush.msra.mxu1 %v2317_v31  ;;  %v3379_v12 = vpop.f32.mrf.mxu0 }
 0x373   :  { %v2141_v53 = vld [vmem:[#allocation13 + $0x1878] sm:$0xff]  ;;  %3614 = vmatpush.msra.mxu0 %v2029_v42 }
 0x374   :  { %v2309_v51 = vld [vmem:[#allocation13 + $0x1db8] sm:$0xff]  ;;  %3636 = vmatpush.msra.mxu2 %v2141_v53 }
 0x375   :  { %v2021_v40 = vld [vmem:[#allocation13 + $0x14b8] sm:$0xff]  ;;  %3651 = vmatpush.msra.mxu1 %v2309_v51 }
 0x376   :  { %v2133_v41 = vld [vmem:[#allocation13 + $0x1838] sm:$0xff]  ;;  %3615 = vmatpush.msra.mxu0 %v2021_v40 }
 0x377   :  { %v2301_v11 = vld [vmem:[#allocation13 + $0x1d78] sm:$0xff]  ;;  %3637 = vmatpush.msra.mxu2 %v2133_v41  ;;  %v3758_v41 = vrot.slane %v5045_v3, 2 }
 0x378   :  { %v2013_v43 = vld [vmem:[#allocation13 + $0x1478] sm:$0xff]  ;;  %3652 = vmatpush.msra.mxu1 %v2301_v11  ;;  %3638 = vmatmul.f32.vlgmr.msra.gmra.mxu2 %v5010_v46  ;;  %v3861_v46 = vperm.slane %v5054_v44, 1 }
 0x379   :  { %v2293_v62 = vld [vmem:[#allocation13 + $0x1d38] sm:$0xff]  ;;  %3616 = vmatpush.msra.mxu0 %v2013_v43  ;;  %v3727_v43 = vrot.slane %v4952_v24, 5 }
 0x37a   :  { %v2005_v23 = vld [vmem:[#allocation13 + $0x1438] sm:$0xff]  ;;  %3653 = vmatpush.msra.mxu1 %v2293_v62  ;;  %v3787_v62 = vrot.slane %v5045_v3, 4 }
 0x37b   :  { %v2285_v7 = vld [vmem:[#allocation13 + $0x1cf8] sm:$0xff]  ;;  %3617 = vmatpush.msra.mxu0 %v2005_v23  ;;  %v3803_v23 = vrot.slane %v5045_v3, 5 }
 0x37c   :  { %v2277_v45 = vld [vmem:[#allocation13 + $0x1cb8] sm:$0xff]  ;;  %3654 = vmatpush.msra.mxu1 %v2285_v7  ;;  %3618 = vmatmul.f32.vlgmr.msra.gmra.mxu0 %v5022_v6  ;;  %v3848_v6 = vsel %vm373_vm10, %v4886_v28, %v3830_v61  ;;  %v3359_v28 = vpop.f32.mrf.mxu3  ;;  %v3773_v7 = vrot.slane %v5049_v57, 3 }
 0x37d   :  { %v2269_v20 = vld [vmem:[#allocation13 + $0x1c78] sm:$0xff]  ;;  %v3879_v19 = vmul.f32 %v3861_v46, %v3848_v6 }
 0x37e   :  { %3655 = vmatpush.msra.mxu1 %v2277_v45  ;;  %v2261_v29 = vld [vmem:[#allocation13 + $0x1c38] sm:$0xff]  ;;  %v3419_v22 = vpop.f32.mrf.mxu1  ;;  %v3804_v45 = vrot.slane %v5049_v57, 5 }
 0x37f   :  { %v3895_v18 = vrot.slane %v3879_v19, 6 }
 0x380   :  { %3656 = vmatpush.msra.mxu1 %v2269_v20 }
 0x381   :  { %v5064_v39 = vsel %vm186_vm0, %v3878_v38, %v3895_v18  ;;  %v3862_v18 = vperm.slane %v5054_v44, 2 }
 0x382   :  { %3657 = vmatpush.msra.mxu1 %v2261_v29 }
 0x383   :  { %3658 = vmatmul.f32.vlgmr.msra.gmra.mxu1 %v5028_v63  ;;  %v3380_v63 = vadd.f32 %v3379_v12, %v3359_v28  ;;  %v4008_v12 = vld [vmem:[#allocation14 + $0x8] ss:$0 sm:$0xff] }
 0x3a1   :  { %v3439_v50 = vpop.f32.mrf.mxu3 }
 0x3a4   :  { %v3399_v25 = vpop.f32.mrf.mxu2 }
 0x3a5   :  { %v3400_v48 = vadd.f32 %v3399_v25, %v3380_v63 }
 0x3a7   :  { %v3420_v49 = vadd.f32 %v3419_v22, %v3400_v48 }
 0x3a8   :  { %v3459_v47 = vpop.f32.mrf.mxu0 }
 0x3a9   :  { %v3440_v52 = vadd.f32 %v3439_v50, %v3420_v49  ;;  %v3867_v50 = vperm.slane %v5054_v44, 7 }
 0x3ab   :  { %v3460_v15 = vadd.f32 %v3459_v47, %v3440_v52 }
 0x3ae   :  { %v3479_v35 = vpop.f32.mrf.mxu2 }
 0x3af   :  { %v3480_v54 = vadd.f32 %v3479_v35, %v3460_v15 }
 0x3b0   :  { %v3499_v2 = vpop.f32.mrf.mxu1 }
 0x3b1   :  { %v3500_v42 = vadd.f32 %v3499_v2, %v3480_v54 }
 0x3b3   :  { %v3755_v36 = vadd.f32 %v3746_v32, %v3500_v42  ;;  %v3747_v37 = vrot.slane %v3500_v42, 1  ;;  %v3760_v34 = vrot.slane %v3500_v42, 2  ;;  %v3774_v24 = vrot.slane %v3500_v42, 3 }
 0x3b4   :  { %v3789_v46 = vrot.slane %v3500_v42, 4  ;;  %v3805_v3 = vrot.slane %v3500_v42, 5  ;;  %v3865_v42 = vperm.slane %v5054_v44, 5 }
 0x3b5   :  { %v3768_v16 = vadd.f32 %v3758_v41, %v3755_v36  ;;  %v3864_v36 = vperm.slane %v5054_v44, 4 }
 0x3b7   :  { %v3831_v29 = vrot.slane %v3768_v16, 7 }
 0x3b9   :  { %v3849_v22 = vsel %vm373_vm10, %v4932_v5, %v3831_v29 }
 0x3d4   :  { %v3539_v26 = vpop.f32.mrf.mxu0 }
 0x3d5   :  { %v3579_v9 = vpop.f32.mrf.mxu1 }
 0x3d8   :  { %v3519_v55 = vpop.f32.mrf.mxu3 }
 0x3d9   :  { %v3540_v58 = vadd.f32 %v3539_v26, %v3519_v55  ;;  %v3559_v0 = vpop.f32.mrf.mxu2  ;;  %v3863_v55 = vperm.slane %v5054_v44, 3  ;;  %v3866_v26 = vperm.slane %v5054_v44, 6 }
 0x3db   :  { %v3560_v31 = vadd.f32 %v3559_v0, %v3540_v58 }
 0x3dd   :  { %v3580_v4 = vadd.f32 %v3579_v9, %v3560_v31 }
 0x3f3   :  { %v3599_v53 = vpop.f32.mrf.mxu3 }
 0x3f4   :  { %v3600_v51 = vadd.f32 %v3599_v53, %v3580_v4  ;;  %v3880_v4 = vmul.f32 %v3862_v18, %v3849_v22 }
 0x3f9   :  { %v3619_v40 = vpop.f32.mrf.mxu0 }
 0x3fa   :  { %v3620_v59 = vadd.f32 %v3619_v40, %v3600_v51 }
 0x3fb   :  { %v3639_v11 = vpop.f32.mrf.mxu2 }
 0x3fc   :  { %v3640_v21 = vadd.f32 %v3639_v11, %v3620_v59 }
 0x400   :  { %v3659_v17 = vpop.f32.mrf.mxu1 }
 0x401   :  { %v3660_v20 = vadd.f32 %v3659_v17, %v3640_v21 }
 0x403   :  { %v3748_v61 = vrot.slane %v3660_v20, 1  ;;  %v3756_v30 = vadd.f32 %v3747_v37, %v3660_v20  ;;  %v3761_v33 = vrot.slane %v3660_v20, 2  ;;  %v3775_v6 = vrot.slane %v3660_v20, 3 }
 0x404   :  { %v3790_v19 = vrot.slane %v3660_v20, 4  ;;  %v3983_v38 = vrot.slane %v3660_v20, 12 }
 0x405   :  { %v3769_v28 = vadd.f32 %v3759_v13, %v3756_v30  ;;  %v3770_v63 = vadd.f32 %v3760_v34, %v3748_v61  ;;  %v3785_v25 = vadd.f32 %v3774_v24, %v3761_v33  ;;  %v3801_v57 = vadd.f32 %v3789_v46, %v3775_v6 }
 0x406   :  { %v3818_v48 = vadd.f32 %v3805_v3, %v3790_v19  ;;  %v3855_v49 = vsel %vm373_vm10, %v3727_v43, %v3983_v38 }
 0x407   :  { %v3783_v47 = vadd.f32 %v3772_v60, %v3769_v28  ;;  %v3784_v52 = vadd.f32 %v3773_v7, %v3770_v63  ;;  %v3800_v35 = vadd.f32 %v3788_v27, %v3785_v25  ;;  %v3817_v2 = vadd.f32 %v3804_v45, %v3801_v57 }
 0x408   :  { %v3836_v15 = vrot.slane %v3818_v48, 7  ;;  %v3886_v54 = vmul.f32 %v4008_v12, %v3855_v49  ;;  %v3896_v60 = vrot.slane %v3880_v4, 4 }
 0x409   :  { %v3799_v58 = vadd.f32 %v3787_v62, %v3784_v52  ;;  %v3816_v0 = vadd.f32 %v3803_v23, %v3800_v35  ;;  %v3832_v31 = vrot.slane %v3783_v47, 7  ;;  %v3835_v9 = vrot.slane %v3817_v2, 7 }
 0x40a   :  { %v3854_v5 = vsel %vm373_vm10, %v4971_v14, %v3836_v15  ;;  %3911 = vst [vmem:[#allocation19 + $0x10] sm:$0x3] %v3886_v54 }
 0x40b   :  { %v3834_v32 = vrot.slane %v3816_v0, 7  ;;  %v3833_v53 = vrot.slane %v3799_v58, 7  ;;  %v3850_v51 = vsel %vm373_vm10, %v4974_v1, %v3832_v31  ;;  %v3853_v40 = vsel %vm373_vm10, %v4976_v8, %v3835_v9 }
 0x40c   :  { %v3881_v59 = vmul.f32 %v3863_v55, %v3850_v51  ;;  %v3884_v41 = vmul.f32 %v3866_v26, %v3853_v40  ;;  %v3885_v11 = vmul.f32 %v3867_v50, %v3854_v5 }
 0x40d   :  { %v3851_v14 = vsel %vm373_vm10, %v4978_v56, %v3833_v53  ;;  %v3852_v16 = vsel %vm373_vm10, %v4980_v10, %v3834_v32 }
 0x40e   :  { %v3883_v43 = vmul.f32 %v3865_v42, %v3852_v16  ;;  %v3897_v21 = vrot.slane %v3881_v59, 2  ;;  %v3899_v62 = vrot.slane %v3884_v41, 4  ;;  %v3900_v23 = vrot.slane %v3885_v11, 2 }
 0x40f   :  { %v3882_v1 = vmul.f32 %v3864_v36, %v3851_v14 }
 0x410   :  { %v3898_v8 = vrot.slane %v3883_v43, 6  ;;  %v3902_v44 = vsel %vm1342_vm13, %v3896_v60, %v3897_v21  ;;  %v3905_v10 = vsel %vm1342_vm13, %v3899_v62, %v3900_v23 }
 0x411   :  { %v3903_v56 = vsel %vm1344_vm14, %v5064_v39, %v3902_v44 }
 0x412   :  { %v3904_v13 = vsel %vm186_vm0, %v3882_v1, %v3898_v8  ;;  %3909 = vst [vmem:[#allocation19] sm:$0xff] %v3903_v56 }
 0x413   :  { %v3906_v7 = vsel %vm1344_vm14, %v3904_v13, %v3905_v10 }
 0x414   :  { %3910 = vst [vmem:[#allocation19 + $0x8] sm:$0xff] %v3906_v7 }
 0x415   :  { %3946 = dma.vmem_to_hbm [thread:$0]  %s3942_s13, 288, %s3944_s21, [#allocation18]  }
 0x416   :  { %4307 = dma.done.wait [#allocation4], 32  }
 0x417   :  { %4308 = vsyncadd [#allocation4], 4294967264 }
 0x418   :  { %4309 = dma.done.wait [#allocation18], 336  }
 0x419   :  { %4310 = vsyncadd [#allocation18], 4294966960 }
 0x41a   :  { %3961 = vsyncpa [#allocation3], 1 }
 0x41b   :  { %3962 = vsyncpa [#allocation6], 1 }
 0x41c   :  { %3963 = vsyncpa [#allocation9], 1 }
 0x41d   :  { %3964 = vsyncpa [#allocation12], 1 }
 0x41e   :  { %3965 = vsyncpa [#allocation15], 1 }
 0x41f   :  { %3966 = vsyncpa [#allocation4], 1 }
 0x420   :  { %3967 = vsyncpa [#allocation18], 1 }

</bundles_post_ra>
